<compile_context>
chip_gen: v5e
topology: v5e:2x2
jax: 0.10.0
libtpu: 0.0.40
codegen_flags: <defaults>
</compile_context>

<pallas_src>
import functools

import jax
import jax.numpy as jnp
from jax.experimental import pallas as pl
from jax.experimental.pallas import tpu as pltpu

_BN_EPS = 1e-5
_LANE = 128
_SUBLANE = 8


def _round_up(n, m):
    return ((n + m - 1) // m) * m


# ---------------------------------------------------------------------------
# Fused kernel: full encoder+decoder chain inside one body.
# ---------------------------------------------------------------------------

def _fused_ae_kernel(*refs, slopes):
    """refs = (x_ref, w0, s0, w1, s1, ..., w9, s9, o_ref).

    Computes o = decoder(encoder(x)) with all layers chained in VMEM/vregs.
    """
    x_ref = refs[0]
    o_ref = refs[-1]
    params = refs[1:-1]

    h = x_ref[...]                                    # bf16 (TM, 1024)
    n_layers = len(slopes)
    for li in range(n_layers):
        w = params[2 * li][...]                       # bf16 (K, N)  (BN scale folded in)
        shift = params[2 * li + 1][...]               # f32  (1, N)  (bias/BN shift)
        y = jnp.dot(h, w, preferred_element_type=jnp.float32)   # MXU, f32 accum
        y = y + shift
        slope = slopes[li]
        if slope is not None:
            # LeakyReLU with 0 < slope < 1  <=>  max(y, slope*y): single vmax.
            y = jnp.maximum(y, slope * y)
        # Dropout layers are identity in eval mode.
        h = y.astype(jnp.bfloat16) if li + 1 < n_layers else y
    o_ref[...] = h.astype(o_ref.dtype)


def mordred_autoencoder_forward(x, params):
    """Full forward pass in a single Pallas call.

    x: (B, input_dim) float32.
    """
    weights = params["weights"]   # list of bf16 (K, N), folded + padded
    shifts = params["shifts"]     # list of f32 (1, N)
    slopes = params["slopes"]     # tuple of float|None, one per layer
    in_dim = params["input_dim"]
    d_pad = weights[0].shape[0]
    out_pad = weights[-1].shape[1]

    B = x.shape[0]
    # Batch tile: big tiles for big batches (amortize per-step overhead, fill
    # the MXU), one sublane-aligned tile for small batches (demo case).
    if B >= 256:
        tm = 256
    elif B >= 128:
        tm = 128
    else:
        tm = _round_up(B, _SUBLANE)
    b_pad = _round_up(B, tm)

    xp = jnp.zeros((b_pad, d_pad), jnp.bfloat16)
    xp = xp.at[:B, :in_dim].set(x.astype(jnp.bfloat16))

    in_specs = [pl.BlockSpec((tm, d_pad), lambda i: (i, 0))]
    flat_params = []
    for w, s in zip(weights, shifts):
        # Whole-array, batch-index-independent blocks -> weights stay
        # VMEM-resident across the batch grid (no per-step re-DMA).
        in_specs.append(pl.BlockSpec(w.shape, lambda i: (0, 0)))
        in_specs.append(pl.BlockSpec(s.shape, lambda i: (0, 0)))
        flat_params += [w, s]

    kernel = functools.partial(_fused_ae_kernel, slopes=slopes)
    out = pl.pallas_call(
        kernel,
        out_shape=jax.ShapeDtypeStruct((b_pad, out_pad), jnp.float32),
        grid=(b_pad // tm,),
        in_specs=in_specs,
        out_specs=pl.BlockSpec((tm, out_pad), lambda i: (i, 0)),
        compiler_params=pltpu.CompilerParams(
            dimension_semantics=("parallel",),          # shard batch tiles on v7x
            vmem_limit_bytes=32 * 1024 * 1024,          # ~8 MB used; safe on v5e/v6e/v7x
        ),
    )(xp, *flat_params)

    return out[:B, :in_dim]


# ---------------------------------------------------------------------------
# Parameter construction (deterministic, synthetic — no checkpoint loading).
# ---------------------------------------------------------------------------

def _init_linear(key, fan_in, fan_out):
    """PyTorch-style uniform(-1/sqrt(fan_in), 1/sqrt(fan_in)) init."""
    kw, kb = jax.random.split(key)
    bound = 1.0 / jnp.sqrt(jnp.float32(fan_in))
    # stored as (fan_in, fan_out) == W.T so the kernel does x @ w
    w = jax.random.uniform(kw, (fan_in, fan_out), jnp.float32, -bound, bound)
    b = jax.random.uniform(kb, (fan_out,), jnp.float32, -bound, bound)
    return w, b


def _init_bn(key, num_features):
    """Deterministic (non-trivial) BatchNorm1d parameters / running stats."""
    kg, kb, km, kv = jax.random.split(key, 4)
    gamma = 1.0 + 0.1 * jax.random.normal(kg, (num_features,), jnp.float32)
    beta = 0.1 * jax.random.normal(kb, (num_features,), jnp.float32)
    running_mean = 0.1 * jax.random.normal(km, (num_features,), jnp.float32)
    running_var = 1.0 + 0.1 * jax.random.uniform(kv, (num_features,), jnp.float32)
    return gamma, beta, running_mean, running_var


def build_params(input_dim=932, seed=0, leaky=0.2):
    """Build folded, padded, bf16 parameters for the full encoder+decoder."""
    # (fan_in, fan_out, has_bn_and_act)
    layer_defs = [
        # encoder
        (input_dim, 512, True),
        (512, 256, True),
        (256, 128, True),   # followed by Dropout (identity in eval)
        (128, 64, True),    # followed by Dropout (identity in eval)
        (64, 32, False),
        # decoder
        (32, 64, True),
        (64, 128, True),
        (128, 256, True),
        (256, 512, True),
        (512, input_dim, False),
    ]
    d_pad = _round_up(input_dim, _LANE)
    n_layers = len(layer_defs)

    key = jax.random.PRNGKey(seed)
    weights, shifts, slopes = [], [], []
    for li, (fan_in, fan_out, has_bn) in enumerate(layer_defs):
        key, k_lin, k_bn = jax.random.split(key, 3)
        w, b = _init_linear(k_lin, fan_in, fan_out)
        if has_bn:
            gamma, beta, mean, var = _init_bn(k_bn, fan_out)
            s = gamma / jnp.sqrt(var + _BN_EPS)
            w_folded = w * s[None, :]               # fold BN scale into weight columns
            shift = (b - mean) * s + beta
        else:
            w_folded = w
            shift = b
        # Lane alignment: zero-pad first-layer K and last-layer N to 1024.
        if li == 0 and fan_in != d_pad:
            w_folded = jnp.concatenate(
                [w_folded, jnp.zeros((d_pad - fan_in, fan_out), jnp.float32)], axis=0)
        if li == n_layers - 1 and fan_out != d_pad:
            w_folded = jnp.concatenate(
                [w_folded, jnp.zeros((w_folded.shape[0], d_pad - fan_out), jnp.float32)],
                axis=1)
            shift = jnp.concatenate(
                [shift, jnp.zeros((d_pad - fan_out,), jnp.float32)], axis=0)
        weights.append(w_folded.astype(jnp.bfloat16))
        shifts.append(shift.reshape(1, -1).astype(jnp.float32))
        slopes.append(leaky if has_bn else None)

    return {
        "weights": weights,
        "shifts": shifts,
        "slopes": tuple(slopes),
        "input_dim": input_dim,
    }


# ---------------------------------------------------------------------------
# Pure-JAX reference (same folded bf16 weights, same compute recipe).
# ---------------------------------------------------------------------------

def _reference_forward(x, params):
    weights, shifts, slopes = params["weights"], params["shifts"], params["slopes"]
    in_dim = params["input_dim"]
    d_pad = weights[0].shape[0]
    B = x.shape[0]
    h = jnp.zeros((B, d_pad), jnp.bfloat16).at[:, :in_dim].set(x.astype(jnp.bfloat16))
    n = len(slopes)
    for li, (w, s, slope) in enumerate(zip(weights, shifts, slopes)):
        y = jnp.dot(h, w, preferred_element_type=jnp.float32) + s
        if slope is not None:
            y = jnp.maximum(y, slope * y)
        h = y.astype(jnp.bfloat16) if li + 1 < n else y
    return h[:, :in_dim]


if __name__ == "__main__":
    INPUT_DIM = 932
    BATCH = 8

    key = jax.random.PRNGKey(0)
    x = jax.random.normal(key, (BATCH, INPUT_DIM), jnp.float32)

    params = build_params(input_dim=INPUT_DIM, seed=0)

    out = jax.block_until_ready(mordred_autoencoder_forward(x, params))
    ref = _reference_forward(x, params)

    assert out.shape == (BATCH, INPUT_DIM), out.shape
    max_err = float(jnp.max(jnp.abs(out - ref)))
    assert jnp.allclose(out, ref, atol=2e-2, rtol=2e-2), (
        f"mismatch vs reference (max abs err {max_err})")

    print("KERNEL_OK")
</pallas_src>

<mosaic_0001>
module attributes {stable_mosaic.version = 11 : i64} {
  func.func @_fused_ae_kernel(%arg0: i32, %arg1: memref<8x1024xbf16, #tpu.memory_space<vmem>>, %arg2: memref<1024x512xbf16, #tpu.memory_space<vmem>>, %arg3: memref<1x512xf32, #tpu.memory_space<vmem>>, %arg4: memref<512x256xbf16, #tpu.memory_space<vmem>>, %arg5: memref<1x256xf32, #tpu.memory_space<vmem>>, %arg6: memref<256x128xbf16, #tpu.memory_space<vmem>>, %arg7: memref<1x128xf32, #tpu.memory_space<vmem>>, %arg8: memref<128x64xbf16, #tpu.memory_space<vmem>>, %arg9: memref<1x64xf32, #tpu.memory_space<vmem>>, %arg10: memref<64x32xbf16, #tpu.memory_space<vmem>>, %arg11: memref<1x32xf32, #tpu.memory_space<vmem>>, %arg12: memref<32x64xbf16, #tpu.memory_space<vmem>>, %arg13: memref<1x64xf32, #tpu.memory_space<vmem>>, %arg14: memref<64x128xbf16, #tpu.memory_space<vmem>>, %arg15: memref<1x128xf32, #tpu.memory_space<vmem>>, %arg16: memref<128x256xbf16, #tpu.memory_space<vmem>>, %arg17: memref<1x256xf32, #tpu.memory_space<vmem>>, %arg18: memref<256x512xbf16, #tpu.memory_space<vmem>>, %arg19: memref<1x512xf32, #tpu.memory_space<vmem>>, %arg20: memref<512x1024xbf16, #tpu.memory_space<vmem>>, %arg21: memref<1x1024xf32, #tpu.memory_space<vmem>>, %arg22: memref<8x1024xf32, #tpu.memory_space<vmem>>) attributes {dimension_semantics = [#tpu.dimension_semantics<parallel>], iteration_bounds = array<i64: 1>, scalar_prefetch = 0 : i64, scratch_operands = 0 : i64, tpu.core_type = #tpu.core_type<tc>, window_params = [{transform_indices = @transform_0, window_bounds = array<i64: 8, 1024>}, {pipeline_mode = #tpu.pipeline_mode<synchronous>, transform_indices = @transform_1, window_bounds = array<i64: 1024, 512>}, {pipeline_mode = #tpu.pipeline_mode<synchronous>, transform_indices = @transform_2, window_bounds = array<i64: 1, 512>}, {pipeline_mode = #tpu.pipeline_mode<synchronous>, transform_indices = @transform_3, window_bounds = array<i64: 512, 256>}, {pipeline_mode = #tpu.pipeline_mode<synchronous>, transform_indices = @transform_4, window_bounds = array<i64: 1, 256>}, {pipeline_mode = #tpu.pipeline_mode<synchronous>, transform_indices = @transform_5, window_bounds = array<i64: 256, 128>}, {pipeline_mode = #tpu.pipeline_mode<synchronous>, transform_indices = @transform_6, window_bounds = array<i64: 1, 128>}, {pipeline_mode = #tpu.pipeline_mode<synchronous>, transform_indices = @transform_7, window_bounds = array<i64: 128, 64>}, {pipeline_mode = #tpu.pipeline_mode<synchronous>, transform_indices = @transform_8, window_bounds = array<i64: 1, 64>}, {pipeline_mode = #tpu.pipeline_mode<synchronous>, transform_indices = @transform_9, window_bounds = array<i64: 64, 32>}, {pipeline_mode = #tpu.pipeline_mode<synchronous>, transform_indices = @transform_10, window_bounds = array<i64: 1, 32>}, {pipeline_mode = #tpu.pipeline_mode<synchronous>, transform_indices = @transform_11, window_bounds = array<i64: 32, 64>}, {pipeline_mode = #tpu.pipeline_mode<synchronous>, transform_indices = @transform_12, window_bounds = array<i64: 1, 64>}, {pipeline_mode = #tpu.pipeline_mode<synchronous>, transform_indices = @transform_13, window_bounds = array<i64: 64, 128>}, {pipeline_mode = #tpu.pipeline_mode<synchronous>, transform_indices = @transform_14, window_bounds = array<i64: 1, 128>}, {pipeline_mode = #tpu.pipeline_mode<synchronous>, transform_indices = @transform_15, window_bounds = array<i64: 128, 256>}, {pipeline_mode = #tpu.pipeline_mode<synchronous>, transform_indices = @transform_16, window_bounds = array<i64: 1, 256>}, {pipeline_mode = #tpu.pipeline_mode<synchronous>, transform_indices = @transform_17, window_bounds = array<i64: 256, 512>}, {pipeline_mode = #tpu.pipeline_mode<synchronous>, transform_indices = @transform_18, window_bounds = array<i64: 1, 512>}, {pipeline_mode = #tpu.pipeline_mode<synchronous>, transform_indices = @transform_19, window_bounds = array<i64: 512, 1024>}, {pipeline_mode = #tpu.pipeline_mode<synchronous>, transform_indices = @transform_20, window_bounds = array<i64: 1, 1024>}, {transform_indices = @transform_21, window_bounds = array<i64: 8, 1024>}]} {
    %c0 = arith.constant 0 : index
    %c0_0 = arith.constant 0 : index
    %0 = vector.load %arg1[%c0, %c0_0] : memref<8x1024xbf16, #tpu.memory_space<vmem>>, vector<8x1024xbf16>
    %c0_1 = arith.constant 0 : index
    %c0_2 = arith.constant 0 : index
    %1 = vector.load %arg2[%c0_1, %c0_2] : memref<1024x512xbf16, #tpu.memory_space<vmem>>, vector<1024x512xbf16>
    %c0_3 = arith.constant 0 : index
    %c0_4 = arith.constant 0 : index
    %2 = vector.load %arg3[%c0_3, %c0_4] : memref<1x512xf32, #tpu.memory_space<vmem>>, vector<1x512xf32>
    %cst = arith.constant dense<0.000000e+00> : vector<8x512xf32>
    %3 = tpu.matmul %0, %1, %cst {dimension_numbers = #tpu.dot_dimension_numbers<[1], [0], [0], [1], [0, 0, 1, 1], [], []>} : vector<8x1024xbf16>, vector<1024x512xbf16>, vector<8x512xf32> -> vector<8x512xf32>
    %4 = vector.broadcast %2 : vector<1x512xf32> to vector<8x512xf32>
    %5 = arith.addf %3, %4 : vector<8x512xf32>
    %cst_5 = arith.constant 2.000000e-01 : f32
    %6 = vector.broadcast %cst_5 : f32 to vector<8x512xf32>
    %7 = arith.mulf %6, %5 : vector<8x512xf32>
    %8 = arith.maximumf %5, %7 : vector<8x512xf32>
    %9 = arith.truncf %8 : vector<8x512xf32> to vector<8x512xbf16>
    %c0_6 = arith.constant 0 : index
    %c0_7 = arith.constant 0 : index
    %10 = vector.load %arg4[%c0_6, %c0_7] : memref<512x256xbf16, #tpu.memory_space<vmem>>, vector<512x256xbf16>
    %c0_8 = arith.constant 0 : index
    %c0_9 = arith.constant 0 : index
    %11 = vector.load %arg5[%c0_8, %c0_9] : memref<1x256xf32, #tpu.memory_space<vmem>>, vector<1x256xf32>
    %cst_10 = arith.constant dense<0.000000e+00> : vector<8x256xf32>
    %12 = tpu.matmul %9, %10, %cst_10 {dimension_numbers = #tpu.dot_dimension_numbers<[1], [0], [0], [1], [0, 0, 1, 1], [], []>} : vector<8x512xbf16>, vector<512x256xbf16>, vector<8x256xf32> -> vector<8x256xf32>
    %13 = vector.broadcast %11 : vector<1x256xf32> to vector<8x256xf32>
    %14 = arith.addf %12, %13 : vector<8x256xf32>
    %cst_11 = arith.constant 2.000000e-01 : f32
    %15 = vector.broadcast %cst_11 : f32 to vector<8x256xf32>
    %16 = arith.mulf %15, %14 : vector<8x256xf32>
    %17 = arith.maximumf %14, %16 : vector<8x256xf32>
    %18 = arith.truncf %17 : vector<8x256xf32> to vector<8x256xbf16>
    %c0_12 = arith.constant 0 : index
    %c0_13 = arith.constant 0 : index
    %19 = vector.load %arg6[%c0_12, %c0_13] : memref<256x128xbf16, #tpu.memory_space<vmem>>, vector<256x128xbf16>
    %c0_14 = arith.constant 0 : index
    %c0_15 = arith.constant 0 : index
    %20 = vector.load %arg7[%c0_14, %c0_15] : memref<1x128xf32, #tpu.memory_space<vmem>>, vector<1x128xf32>
    %cst_16 = arith.constant dense<0.000000e+00> : vector<8x128xf32>
    %21 = tpu.matmul %18, %19, %cst_16 {dimension_numbers = #tpu.dot_dimension_numbers<[1], [0], [0], [1], [0, 0, 1, 1], [], []>} : vector<8x256xbf16>, vector<256x128xbf16>, vector<8x128xf32> -> vector<8x128xf32>
    %22 = vector.broadcast %20 : vector<1x128xf32> to vector<8x128xf32>
    %23 = arith.addf %21, %22 : vector<8x128xf32>
    %cst_17 = arith.constant 2.000000e-01 : f32
    %24 = vector.broadcast %cst_17 : f32 to vector<8x128xf32>
    %25 = arith.mulf %24, %23 : vector<8x128xf32>
    %26 = arith.maximumf %23, %25 : vector<8x128xf32>
    %27 = arith.truncf %26 : vector<8x128xf32> to vector<8x128xbf16>
    %c0_18 = arith.constant 0 : index
    %c0_19 = arith.constant 0 : index
    %28 = vector.load %arg8[%c0_18, %c0_19] : memref<128x64xbf16, #tpu.memory_space<vmem>>, vector<128x64xbf16>
    %c0_20 = arith.constant 0 : index
    %c0_21 = arith.constant 0 : index
    %29 = vector.load %arg9[%c0_20, %c0_21] : memref<1x64xf32, #tpu.memory_space<vmem>>, vector<1x64xf32>
    %cst_22 = arith.constant dense<0.000000e+00> : vector<8x64xf32>
    %30 = tpu.matmul %27, %28, %cst_22 {dimension_numbers = #tpu.dot_dimension_numbers<[1], [0], [0], [1], [0, 0, 1, 1], [], []>} : vector<8x128xbf16>, vector<128x64xbf16>, vector<8x64xf32> -> vector<8x64xf32>
    %31 = vector.broadcast %29 : vector<1x64xf32> to vector<8x64xf32>
    %32 = arith.addf %30, %31 : vector<8x64xf32>
    %cst_23 = arith.constant 2.000000e-01 : f32
    %33 = vector.broadcast %cst_23 : f32 to vector<8x64xf32>
    %34 = arith.mulf %33, %32 : vector<8x64xf32>
    %35 = arith.maximumf %32, %34 : vector<8x64xf32>
    %36 = arith.truncf %35 : vector<8x64xf32> to vector<8x64xbf16>
    %c0_24 = arith.constant 0 : index
    %c0_25 = arith.constant 0 : index
    %37 = vector.load %arg10[%c0_24, %c0_25] : memref<64x32xbf16, #tpu.memory_space<vmem>>, vector<64x32xbf16>
    %c0_26 = arith.constant 0 : index
    %c0_27 = arith.constant 0 : index
    %38 = vector.load %arg11[%c0_26, %c0_27] : memref<1x32xf32, #tpu.memory_space<vmem>>, vector<1x32xf32>
    %cst_28 = arith.constant dense<0.000000e+00> : vector<8x32xf32>
    %39 = tpu.matmul %36, %37, %cst_28 {dimension_numbers = #tpu.dot_dimension_numbers<[1], [0], [0], [1], [0, 0, 1, 1], [], []>} : vector<8x64xbf16>, vector<64x32xbf16>, vector<8x32xf32> -> vector<8x32xf32>
    %40 = vector.broadcast %38 : vector<1x32xf32> to vector<8x32xf32>
    %41 = arith.addf %39, %40 : vector<8x32xf32>
    %42 = arith.truncf %41 : vector<8x32xf32> to vector<8x32xbf16>
    %c0_29 = arith.constant 0 : index
    %c0_30 = arith.constant 0 : index
    %43 = vector.load %arg12[%c0_29, %c0_30] : memref<32x64xbf16, #tpu.memory_space<vmem>>, vector<32x64xbf16>
    %c0_31 = arith.constant 0 : index
    %c0_32 = arith.constant 0 : index
    %44 = vector.load %arg13[%c0_31, %c0_32] : memref<1x64xf32, #tpu.memory_space<vmem>>, vector<1x64xf32>
    %cst_33 = arith.constant dense<0.000000e+00> : vector<8x64xf32>
    %45 = tpu.matmul %42, %43, %cst_33 {dimension_numbers = #tpu.dot_dimension_numbers<[1], [0], [0], [1], [0, 0, 1, 1], [], []>} : vector<8x32xbf16>, vector<32x64xbf16>, vector<8x64xf32> -> vector<8x64xf32>
    %46 = vector.broadcast %44 : vector<1x64xf32> to vector<8x64xf32>
    %47 = arith.addf %45, %46 : vector<8x64xf32>
    %cst_34 = arith.constant 2.000000e-01 : f32
    %48 = vector.broadcast %cst_34 : f32 to vector<8x64xf32>
    %49 = arith.mulf %48, %47 : vector<8x64xf32>
    %50 = arith.maximumf %47, %49 : vector<8x64xf32>
    %51 = arith.truncf %50 : vector<8x64xf32> to vector<8x64xbf16>
    %c0_35 = arith.constant 0 : index
    %c0_36 = arith.constant 0 : index
    %52 = vector.load %arg14[%c0_35, %c0_36] : memref<64x128xbf16, #tpu.memory_space<vmem>>, vector<64x128xbf16>
    %c0_37 = arith.constant 0 : index
    %c0_38 = arith.constant 0 : index
    %53 = vector.load %arg15[%c0_37, %c0_38] : memref<1x128xf32, #tpu.memory_space<vmem>>, vector<1x128xf32>
    %cst_39 = arith.constant dense<0.000000e+00> : vector<8x128xf32>
    %54 = tpu.matmul %51, %52, %cst_39 {dimension_numbers = #tpu.dot_dimension_numbers<[1], [0], [0], [1], [0, 0, 1, 1], [], []>} : vector<8x64xbf16>, vector<64x128xbf16>, vector<8x128xf32> -> vector<8x128xf32>
    %55 = vector.broadcast %53 : vector<1x128xf32> to vector<8x128xf32>
    %56 = arith.addf %54, %55 : vector<8x128xf32>
    %cst_40 = arith.constant 2.000000e-01 : f32
    %57 = vector.broadcast %cst_40 : f32 to vector<8x128xf32>
    %58 = arith.mulf %57, %56 : vector<8x128xf32>
    %59 = arith.maximumf %56, %58 : vector<8x128xf32>
    %60 = arith.truncf %59 : vector<8x128xf32> to vector<8x128xbf16>
    %c0_41 = arith.constant 0 : index
    %c0_42 = arith.constant 0 : index
    %61 = vector.load %arg16[%c0_41, %c0_42] : memref<128x256xbf16, #tpu.memory_space<vmem>>, vector<128x256xbf16>
    %c0_43 = arith.constant 0 : index
    %c0_44 = arith.constant 0 : index
    %62 = vector.load %arg17[%c0_43, %c0_44] : memref<1x256xf32, #tpu.memory_space<vmem>>, vector<1x256xf32>
    %cst_45 = arith.constant dense<0.000000e+00> : vector<8x256xf32>
    %63 = tpu.matmul %60, %61, %cst_45 {dimension_numbers = #tpu.dot_dimension_numbers<[1], [0], [0], [1], [0, 0, 1, 1], [], []>} : vector<8x128xbf16>, vector<128x256xbf16>, vector<8x256xf32> -> vector<8x256xf32>
    %64 = vector.broadcast %62 : vector<1x256xf32> to vector<8x256xf32>
    %65 = arith.addf %63, %64 : vector<8x256xf32>
    %cst_46 = arith.constant 2.000000e-01 : f32
    %66 = vector.broadcast %cst_46 : f32 to vector<8x256xf32>
    %67 = arith.mulf %66, %65 : vector<8x256xf32>
    %68 = arith.maximumf %65, %67 : vector<8x256xf32>
    %69 = arith.truncf %68 : vector<8x256xf32> to vector<8x256xbf16>
    %c0_47 = arith.constant 0 : index
    %c0_48 = arith.constant 0 : index
    %70 = vector.load %arg18[%c0_47, %c0_48] : memref<256x512xbf16, #tpu.memory_space<vmem>>, vector<256x512xbf16>
    %c0_49 = arith.constant 0 : index
    %c0_50 = arith.constant 0 : index
    %71 = vector.load %arg19[%c0_49, %c0_50] : memref<1x512xf32, #tpu.memory_space<vmem>>, vector<1x512xf32>
    %cst_51 = arith.constant dense<0.000000e+00> : vector<8x512xf32>
    %72 = tpu.matmul %69, %70, %cst_51 {dimension_numbers = #tpu.dot_dimension_numbers<[1], [0], [0], [1], [0, 0, 1, 1], [], []>} : vector<8x256xbf16>, vector<256x512xbf16>, vector<8x512xf32> -> vector<8x512xf32>
    %73 = vector.broadcast %71 : vector<1x512xf32> to vector<8x512xf32>
    %74 = arith.addf %72, %73 : vector<8x512xf32>
    %cst_52 = arith.constant 2.000000e-01 : f32
    %75 = vector.broadcast %cst_52 : f32 to vector<8x512xf32>
    %76 = arith.mulf %75, %74 : vector<8x512xf32>
    %77 = arith.maximumf %74, %76 : vector<8x512xf32>
    %78 = arith.truncf %77 : vector<8x512xf32> to vector<8x512xbf16>
    %c0_53 = arith.constant 0 : index
    %c0_54 = arith.constant 0 : index
    %79 = vector.load %arg20[%c0_53, %c0_54] : memref<512x1024xbf16, #tpu.memory_space<vmem>>, vector<512x1024xbf16>
    %c0_55 = arith.constant 0 : index
    %c0_56 = arith.constant 0 : index
    %80 = vector.load %arg21[%c0_55, %c0_56] : memref<1x1024xf32, #tpu.memory_space<vmem>>, vector<1x1024xf32>
    %cst_57 = arith.constant dense<0.000000e+00> : vector<8x1024xf32>
    %81 = tpu.matmul %78, %79, %cst_57 {dimension_numbers = #tpu.dot_dimension_numbers<[1], [0], [0], [1], [0, 0, 1, 1], [], []>} : vector<8x512xbf16>, vector<512x1024xbf16>, vector<8x1024xf32> -> vector<8x1024xf32>
    %82 = vector.broadcast %80 : vector<1x1024xf32> to vector<8x1024xf32>
    %83 = arith.addf %81, %82 : vector<8x1024xf32>
    %c0_58 = arith.constant 0 : index
    %c0_59 = arith.constant 0 : index
    %84 = vector.load %arg22[%c0_58, %c0_59] : memref<8x1024xf32, #tpu.memory_space<vmem>>, vector<8x1024xf32>
    tpu.vector_store %arg22[%c0_58, %c0_59], %83 {strides = array<i32>} : memref<8x1024xf32, #tpu.memory_space<vmem>>, vector<8x1024xf32>,
    return
  }
  func.func @transform_0(%arg0: i32) -> (i32, i32) {
    %c0_i32 = arith.constant 0 : i32
    %c0_i32_0 = arith.constant 0 : i32
    return %arg0, %c0_i32 : i32, i32
  }
  func.func @transform_1(%arg0: i32) -> (i32, i32) {
    %c0_i32 = arith.constant 0 : i32
    %c0_i32_0 = arith.constant 0 : i32
    %c0_i32_1 = arith.constant 0 : i32
    return %c0_i32, %c0_i32_0 : i32, i32
  }
  func.func @transform_2(%arg0: i32) -> (i32, i32) {
    %c0_i32 = arith.constant 0 : i32
    %c0_i32_0 = arith.constant 0 : i32
    %c0_i32_1 = arith.constant 0 : i32
    return %c0_i32, %c0_i32_0 : i32, i32
  }
  func.func @transform_3(%arg0: i32) -> (i32, i32) {
    %c0_i32 = arith.constant 0 : i32
    %c0_i32_0 = arith.constant 0 : i32
    %c0_i32_1 = arith.constant 0 : i32
    return %c0_i32, %c0_i32_0 : i32, i32
  }
  func.func @transform_4(%arg0: i32) -> (i32, i32) {
    %c0_i32 = arith.constant 0 : i32
    %c0_i32_0 = arith.constant 0 : i32
    %c0_i32_1 = arith.constant 0 : i32
    return %c0_i32, %c0_i32_0 : i32, i32
  }
  func.func @transform_5(%arg0: i32) -> (i32, i32) {
    %c0_i32 = arith.constant 0 : i32
    %c0_i32_0 = arith.constant 0 : i32
    %c0_i32_1 = arith.constant 0 : i32
    return %c0_i32, %c0_i32_0 : i32, i32
  }
  func.func @transform_6(%arg0: i32) -> (i32, i32) {
    %c0_i32 = arith.constant 0 : i32
    %c0_i32_0 = arith.constant 0 : i32
    %c0_i32_1 = arith.constant 0 : i32
    return %c0_i32, %c0_i32_0 : i32, i32
  }
  func.func @transform_7(%arg0: i32) -> (i32, i32) {
    %c0_i32 = arith.constant 0 : i32
    %c0_i32_0 = arith.constant 0 : i32
    %c0_i32_1 = arith.constant 0 : i32
    return %c0_i32, %c0_i32_0 : i32, i32
  }
  func.func @transform_8(%arg0: i32) -> (i32, i32) {
    %c0_i32 = arith.constant 0 : i32
    %c0_i32_0 = arith.constant 0 : i32
    %c0_i32_1 = arith.constant 0 : i32
    return %c0_i32, %c0_i32_0 : i32, i32
  }
  func.func @transform_9(%arg0: i32) -> (i32, i32) {
    %c0_i32 = arith.constant 0 : i32
    %c0_i32_0 = arith.constant 0 : i32
    %c0_i32_1 = arith.constant 0 : i32
    return %c0_i32, %c0_i32_0 : i32, i32
  }
  func.func @transform_10(%arg0: i32) -> (i32, i32) {
    %c0_i32 = arith.constant 0 : i32
    %c0_i32_0 = arith.constant 0 : i32
    %c0_i32_1 = arith.constant 0 : i32
    return %c0_i32, %c0_i32_0 : i32, i32
  }
  func.func @transform_11(%arg0: i32) -> (i32, i32) {
    %c0_i32 = arith.constant 0 : i32
    %c0_i32_0 = arith.constant 0 : i32
    %c0_i32_1 = arith.constant 0 : i32
    return %c0_i32, %c0_i32_0 : i32, i32
  }
  func.func @transform_12(%arg0: i32) -> (i32, i32) {
    %c0_i32 = arith.constant 0 : i32
    %c0_i32_0 = arith.constant 0 : i32
    %c0_i32_1 = arith.constant 0 : i32
    return %c0_i32, %c0_i32_0 : i32, i32
  }
  func.func @transform_13(%arg0: i32) -> (i32, i32) {
    %c0_i32 = arith.constant 0 : i32
    %c0_i32_0 = arith.constant 0 : i32
    %c0_i32_1 = arith.constant 0 : i32
    return %c0_i32, %c0_i32_0 : i32, i32
  }
  func.func @transform_14(%arg0: i32) -> (i32, i32) {
    %c0_i32 = arith.constant 0 : i32
    %c0_i32_0 = arith.constant 0 : i32
    %c0_i32_1 = arith.constant 0 : i32
    return %c0_i32, %c0_i32_0 : i32, i32
  }
  func.func @transform_15(%arg0: i32) -> (i32, i32) {
    %c0_i32 = arith.constant 0 : i32
    %c0_i32_0 = arith.constant 0 : i32
    %c0_i32_1 = arith.constant 0 : i32
    return %c0_i32, %c0_i32_0 : i32, i32
  }
  func.func @transform_16(%arg0: i32) -> (i32, i32) {
    %c0_i32 = arith.constant 0 : i32
    %c0_i32_0 = arith.constant 0 : i32
    %c0_i32_1 = arith.constant 0 : i32
    return %c0_i32, %c0_i32_0 : i32, i32
  }
  func.func @transform_17(%arg0: i32) -> (i32, i32) {
    %c0_i32 = arith.constant 0 : i32
    %c0_i32_0 = arith.constant 0 : i32
    %c0_i32_1 = arith.constant 0 : i32
    return %c0_i32, %c0_i32_0 : i32, i32
  }
  func.func @transform_18(%arg0: i32) -> (i32, i32) {
    %c0_i32 = arith.constant 0 : i32
    %c0_i32_0 = arith.constant 0 : i32
    %c0_i32_1 = arith.constant 0 : i32
    return %c0_i32, %c0_i32_0 : i32, i32
  }
  func.func @transform_19(%arg0: i32) -> (i32, i32) {
    %c0_i32 = arith.constant 0 : i32
    %c0_i32_0 = arith.constant 0 : i32
    %c0_i32_1 = arith.constant 0 : i32
    return %c0_i32, %c0_i32_0 : i32, i32
  }
  func.func @transform_20(%arg0: i32) -> (i32, i32) {
    %c0_i32 = arith.constant 0 : i32
    %c0_i32_0 = arith.constant 0 : i32
    %c0_i32_1 = arith.constant 0 : i32
    return %c0_i32, %c0_i32_0 : i32, i32
  }
  func.func @transform_21(%arg0: i32) -> (i32, i32) {
    %c0_i32 = arith.constant 0 : i32
    %c0_i32_0 = arith.constant 0 : i32
    return %arg0, %c0_i32 : i32, i32
  }
}

</mosaic_0001>

<bundles_post_ra>
// kernel: tpu_custom_call.1
= control target key start
LH: loop header
LB: loop body
LE: loop exit
PB: predicated region body
PF: predicated region fallthrough
CT: control target
= control target key end

     0   :  { %s9774_s0 = inlined_call_operand.vmem [shape: bf16[8,1024], index: 0, kind: input, shape index: {}]   ;;  %s9775_s1 = inlined_call_operand.hbm [shape: bf16[1024,512], index: 1, kind: input, shape index: {}]   ;;  %s9776_s2 = inlined_call_operand.vmem [shape: f32[1,512], index: 2, kind: input, shape index: {}]   ;;  %s9777_s3 = inlined_call_operand.hbm [shape: bf16[512,256], index: 3, kind: input, shape index: {}]   ;;  %s9778_s4 = inlined_call_operand.vmem [shape: f32[1,256], index: 4, kind: input, shape index: {}]   ;;  %s9779_s5 = inlined_call_operand.hbm [shape: bf16[256,128], index: 5, kind: input, shape index: {}]   ;;  %s9780_s6 = inlined_call_operand.vmem [shape: f32[1,128], index: 6, kind: input, shape index: {}]   ;;  %s9781_s7 = inlined_call_operand.vmem [shape: bf16[128,64], index: 7, kind: input, shape index: {}]   ;;  %s9782_s8 = inlined_call_operand.vmem [shape: f32[1,64], index: 8, kind: input, shape index: {}]   ;;  %s9783_s9 = inlined_call_operand.vmem [shape: bf16[64,32], index: 9, kind: input, shape index: {}]   ;;  %s9784_s10 = inlined_call_operand.vmem [shape: f32[1,32], index: 10, kind: input, shape index: {}]   ;;  %s9785_s11 = inlined_call_operand.vmem [shape: bf16[32,64], index: 11, kind: input, shape index: {}]   ;;  %s9786_s12 = inlined_call_operand.vmem [shape: f32[1,64], index: 12, kind: input, shape index: {}]   ;;  %s9787_s13 = inlined_call_operand.vmem [shape: bf16[64,128], index: 13, kind: input, shape index: {}]   ;;  %s9788_s14 = inlined_call_operand.vmem [shape: f32[1,128], index: 14, kind: input, shape index: {}]   ;;  %s9789_s15 = inlined_call_operand.hbm [shape: bf16[128,256], index: 15, kind: input, shape index: {}]   ;;  %s9790_s16 = inlined_call_operand.vmem [shape: f32[1,256], index: 16, kind: input, shape index: {}]   ;;  %s9791_s17 = inlined_call_operand.hbm [shape: bf16[256,512], index: 17, kind: input, shape index: {}]   ;;  %s9792_s18 = inlined_call_operand.vmem [shape: f32[1,512], index: 18, kind: input, shape index: {}]   ;;  %s9793_s19 = inlined_call_operand.hbm [shape: bf16[512,1024], index: 19, kind: input, shape index: {}]   ;;  %s9794_s20 = inlined_call_operand.vmem [shape: f32[1,1024], index: 20, kind: input, shape index: {}]   ;;  %s9795_s21 = inlined_call_operand.hbm [shape: f32[8,1024], index: 21, kind: output, shape index: {}]  }
   0x1   :  { %9798 = sst [smem:[#allocation19_spill]] %s9774_s0 }
   0x2   :  { %9799 = sst [smem:[#allocation20_spill]] %s9775_s1 }
   0x3   :  { %9800 = sst [smem:[#allocation21_spill]] %s9776_s2 }
   0x4   :  { %9801 = sst [smem:[#allocation22_spill]] %s9777_s3 }
   0x5   :  { %9802 = sst [smem:[#allocation23_spill]] %s9778_s4 }
   0x6   :  { %9803 = sst [smem:[#allocation24_spill]] %s9779_s5 }
   0x7   :  { %9804 = sst [smem:[#allocation25_spill]] %s9792_s18 }
   0x8   :  { %9805 = sst [smem:[#allocation26_spill]] %s9794_s20 }
   0x9   :  { %9806 = sst [smem:[#allocation27_spill]] %s9795_s21 }
   0xa   :  { %26 = vsyncpa [#allocation3], 0 }
   0xb   :  { %27 = vsyncpa [#allocation6], 0 }
   0xc   :  { %28 = vsyncpa [#allocation9], 0 }
   0xd   :  { %29 = vsyncpa [#allocation12], 0  ;;  %s9807_s26 = sld [smem:[#allocation22_spill]] }
  0x13   :  { %s52_s27 = sshll.u32 %s9807_s26, 4  ;;  %s53_s27 = int_to_ptr.hbm [resolvable:$true] %s52_s27 }
  0x14   :  { %30 = vsyncpa [#allocation4], 0  ;;  %s9358_s3 = smov [#allocation5]   ;;  %s98_s4 = sshll.u32 %s9789_s15, 4  ;;  %s99_s4 = int_to_ptr.hbm [resolvable:$true] %s98_s4 }
  0x15   :  { %s54_s28 = sshll.u32 %s9358_s3, 4  ;;  %s9359_s30 = smov 128   ;;  %s55_s28 = int_to_ptr.vmem [resolvable:$true] %s54_s28 }
  0x16   :  { %s9360_s5 = smov 8   ;;  %s9361_s22 = smov [#allocation8]  }
  0x17   :  { %60 = dma.hbm_to_vmem [thread:$0]  %s53_s27, 8192, %s55_s28, [#allocation6], %s9359_s30, %s9359_s30, %s9360_s5  }
  0x18   :  { %s100_s23 = sshll.u32 %s9361_s22, 4  ;;  %s9808_s21 = sld [smem:[#allocation20_spill]]  ;;  %s101_s23 = int_to_ptr.vmem [resolvable:$true] %s100_s23 }
  0x19   :  { %106 = dma.hbm_to_vmem [thread:$0]  %s99_s4, 2048, %s101_s23, [#allocation9], %s9359_s30, %s9359_s30, %s9360_s5  }
  0x1a   :  { %s9362_s25 = smov [#allocation2]   ;;  %s9809_s29 = sld [smem:[#allocation24_spill]] }
  0x1b   :  { %s39_s26 = sshll.u32 %s9362_s25, 4  ;;  %s9363_s0 = smov 256   ;;  %s40_s26 = int_to_ptr.vmem [resolvable:$true] %s39_s26 }
  0x1c   :  { %s9364_s18 = smov 16   ;;  %s9365_s27 = smov [#allocation7]  }
  0x1d   :  { %s69_s28 = sshll.u32 %s9365_s27, 4  ;;  %s9366_s22 = smov 64   ;;  %s70_s28 = int_to_ptr.vmem [resolvable:$true] %s69_s28 }
  0x1e   :  { %s37_s2 = sshll.u32 %s9808_s21, 4  ;;  %s9367_s1 = smov 4   ;;  %s38_s2 = int_to_ptr.hbm [resolvable:$true] %s37_s2 }
  0x1f   :  { %45 = dma.hbm_to_vmem [thread:$0]  %s38_s2, 32768, %s40_s26, [#allocation3], %s9363_s0, %s9363_s0, %s9364_s18  }
  0x20   :  { %s67_s15 = sshll.u32 %s9809_s29, 4  ;;  %s113_s4 = sshll.u32 %s9791_s17, 4  ;;  %s68_s15 = int_to_ptr.hbm [resolvable:$true] %s67_s15  ;;  %s114_s4 = int_to_ptr.hbm [resolvable:$true] %s113_s4 }
  0x21   :  { %75 = dma.hbm_to_vmem [thread:$0]  %s68_s15, 2048, %s70_s28, [#allocation6], %s9366_s22, %s9366_s22, %s9367_s1  }
  0x22   :  { %s9368_s30 = smov [#allocation10]   ;;  %s128_s25 = sshll.u32 %s9793_s19, 4  ;;  %s129_s25 = int_to_ptr.hbm [resolvable:$true] %s128_s25 }
  0x23   :  { %s115_s5 = sshll.u32 %s9368_s30, 4  ;;  %s9369_s2 = smov [#allocation11]   ;;  %s116_s5 = int_to_ptr.vmem [resolvable:$true] %s115_s5 }
  0x24   :  { %121 = dma.hbm_to_vmem [thread:$0]  %s114_s4, 8192, %s116_s5, [#allocation9], %s9363_s0, %s9363_s0, %s9364_s18  }
  0x25   :  { %s130_s26 = sshll.u32 %s9369_s2, 4  ;;  %s9370_s3 = smov 512   ;;  %s131_s26 = int_to_ptr.vmem [resolvable:$true] %s130_s26 }
  0x26   :  { %s9371_s29 = smov 32  }
  0x27   :  { %136 = dma.hbm_to_vmem [thread:$0]  %s129_s25, 32768, %s131_s26, [#allocation12], %s9370_s3, %s9370_s3, %s9371_s29  }
  0x28   :  { %9348 = dma.done.wait [#allocation3], 32768  }
  0x29   :  { %9349 = vsyncadd [#allocation3], 4294934528 }
  0x2a   :  { %9350 = dma.done.wait [#allocation6], 10240  }
  0x2b   :  { %9351 = vsyncadd [#allocation6], 4294957056 }
  0x2c   :  { %9352 = dma.done.wait [#allocation9], 10240  }
  0x2d   :  { %9353 = vsyncadd [#allocation9], 4294957056 }
  0x2e   :  { %9354 = dma.done.wait [#allocation12], 32768  }
  0x2f   :  { %9355 = vsyncadd [#allocation12], 4294934528  ;;  %v5820_v0 = vld [vmem:[#allocation2 + $0xe0] sm:$0xf]  ;;  %v8499_v1 = vld [vmem:[#allocation2 + $0xec] sm:$0xf0] }
  0x30   :  { %v5948_v2 = vld [vmem:[#allocation2 + $0x1e0] sm:$0xf]  ;;  %v5821_v3 = vor.u32 %v8499_v1, %v5820_v0  ;;  %v8531_v4 = vld [vmem:[#allocation2 + $0x1ec] sm:$0xf0]  ;;  %s9810_s19 = sld [smem:[#allocation19_spill]]  ;;  %vm2951_vm0 = vcmask 523264  }
  0x31   :  { %v6076_v5 = vld [vmem:[#allocation2 + $0x2e0] sm:$0xf]  ;;  %v8563_v6 = vld [vmem:[#allocation2 + $0x2ec] sm:$0xf0]  ;;  %v5949_v7 = vor.u32 %v8531_v4, %v5948_v2  ;;  %s9811_s4 = sld [smem:[#allocation21_spill]]  ;;  %vm2989_vm1 = vcmask 261120  }
  0x32   :  { %v6077_v8 = vor.u32 %v8563_v6, %v6076_v5  ;;  %v6204_v9 = vld [vmem:[#allocation2 + $0x3e0] sm:$0xf]  ;;  %v8595_v10 = vld [vmem:[#allocation2 + $0x3ec] sm:$0xf0]  ;;  %1742 = vmatpush.bf16.msra.mxu0 %v5821_v3  ;;  %s9812_s25 = sld [smem:[#allocation23_spill]]  ;;  %s9372_s26 = smov [#allocation13]  }
  0x33   :  { %v5804_v11 = vld [vmem:[#allocation2 + $0xc0] sm:$0xf]  ;;  %v6205_v12 = vor.u32 %v8595_v10, %v6204_v9  ;;  %v8495_v13 = vld [vmem:[#allocation2 + $0xcc] sm:$0xf0]  ;;  %1755 = vmatpush.bf16.msra.mxu1 %v5949_v7  ;;  %s9813_s23 = sld [smem:[#allocation25_spill]]  ;;  %s5691_s3 = sshll.u32 %s9372_s26, 4  ;;  %s5692_s3 = int_to_ptr.vmem [resolvable:$true] %s5691_s3 }
  0x34   :  { %v5932_v14 = vld [vmem:[#allocation2 + $0x1c0] sm:$0xf]  ;;  %v8527_v15 = vld [vmem:[#allocation2 + $0x1cc] sm:$0xf0]  ;;  %1768 = vmatpush.bf16.msra.mxu2 %v6077_v8  ;;  %v5805_v16 = vor.u32 %v8495_v13, %v5804_v11 }
  0x35   :  { %v5933_v17 = vor.u32 %v8527_v15, %v5932_v14  ;;  %v6060_v18 = vld [vmem:[#allocation2 + $0x2c0] sm:$0xf]  ;;  %v8559_v19 = vld [vmem:[#allocation2 + $0x2cc] sm:$0xf0]  ;;  %1781 = vmatpush.bf16.msra.mxu3 %v6205_v12 }
  0x36   :  { %v6188_v20 = vld [vmem:[#allocation2 + $0x3c0] sm:$0xf]  ;;  %v6061_v21 = vor.u32 %v8559_v19, %v6060_v18  ;;  %v8591_v22 = vld [vmem:[#allocation2 + $0x3cc] sm:$0xf0]  ;;  %1743 = vmatpush.bf16.msra.mxu0 %v5805_v16 }
  0x37   :  { %v5788_v23 = vld [vmem:[#allocation2 + $0xa0] sm:$0xf]  ;;  %v8491_v24 = vld [vmem:[#allocation2 + $0xac] sm:$0xf0]  ;;  %v6189_v25 = vor.u32 %v8591_v22, %v6188_v20  ;;  %1756 = vmatpush.bf16.msra.mxu1 %v5933_v17 }
  0x38   :  { %v5916_v26 = vld [vmem:[#allocation2 + $0x1a0] sm:$0xf]  ;;  %v8523_v27 = vld [vmem:[#allocation2 + $0x1ac] sm:$0xf0]  ;;  %v5789_v29 = vor.u32 %v8491_v24, %v5788_v23  ;;  %1769 = vmatpush.bf16.msra.mxu2 %v6061_v21 }
  0x39   :  { %v6044_v28 = vld [vmem:[#allocation2 + $0x2a0] sm:$0xf]  ;;  %v8555_v30 = vld [vmem:[#allocation2 + $0x2ac] sm:$0xf0]  ;;  %v5917_v33 = vor.u32 %v8523_v27, %v5916_v26  ;;  %1782 = vmatpush.bf16.msra.mxu3 %v6189_v25 }
  0x3a   :  { %v6172_v31 = vld [vmem:[#allocation2 + $0x3a0] sm:$0xf]  ;;  %v8587_v32 = vld [vmem:[#allocation2 + $0x3ac] sm:$0xf0]  ;;  %v6045_v34 = vor.u32 %v8555_v30, %v6044_v28  ;;  %1744 = vmatpush.bf16.msra.mxu0 %v5789_v29 }
  0x3b   :  { %v5772_v35 = vld [vmem:[#allocation2 + $0x80] sm:$0xf]  ;;  %v8487_v36 = vld [vmem:[#allocation2 + $0x8c] sm:$0xf0]  ;;  %v6173_v38 = vor.u32 %v8587_v32, %v6172_v31  ;;  %1757 = vmatpush.bf16.msra.mxu1 %v5917_v33 }
  0x3c   :  { %v5900_v37 = vld [vmem:[#allocation2 + $0x180] sm:$0xf]  ;;  %v8519_v39 = vld [vmem:[#allocation2 + $0x18c] sm:$0xf0]  ;;  %v5773_v44 = vor.u32 %v8487_v36, %v5772_v35  ;;  %1770 = vmatpush.bf16.msra.mxu2 %v6045_v34 }
  0x3d   :  { %v6028_v40 = vld [vmem:[#allocation2 + $0x280] sm:$0xf]  ;;  %v8551_v41 = vld [vmem:[#allocation2 + $0x28c] sm:$0xf0]  ;;  %v5901_v45 = vor.u32 %v8519_v39, %v5900_v37  ;;  %1783 = vmatpush.bf16.msra.mxu3 %v6173_v38 }
  0x3e   :  { %v6156_v42 = vld [vmem:[#allocation2 + $0x380] sm:$0xf]  ;;  %v8583_v43 = vld [vmem:[#allocation2 + $0x38c] sm:$0xf0]  ;;  %v6029_v46 = vor.u32 %v8551_v41, %v6028_v40  ;;  %1745 = vmatpush.bf16.msra.mxu0 %v5773_v44 }
  0x3f   :  { %v5756_v47 = vld [vmem:[#allocation2 + $0x60] sm:$0xf]  ;;  %v8483_v48 = vld [vmem:[#allocation2 + $0x6c] sm:$0xf0]  ;;  %v6157_v50 = vor.u32 %v8583_v43, %v6156_v42  ;;  %1758 = vmatpush.bf16.msra.mxu1 %v5901_v45 }
  0x40   :  { %v5884_v49 = vld [vmem:[#allocation2 + $0x160] sm:$0xf]  ;;  %v8515_v51 = vld [vmem:[#allocation2 + $0x16c] sm:$0xf0]  ;;  %v5757_v56 = vor.u32 %v8483_v48, %v5756_v47  ;;  %1771 = vmatpush.bf16.msra.mxu2 %v6029_v46 }
  0x41   :  { %v6012_v52 = vld [vmem:[#allocation2 + $0x260] sm:$0xf]  ;;  %v8547_v53 = vld [vmem:[#allocation2 + $0x26c] sm:$0xf0]  ;;  %v5885_v57 = vor.u32 %v8515_v51, %v5884_v49  ;;  %1784 = vmatpush.bf16.msra.mxu3 %v6157_v50 }
  0x42   :  { %v6140_v54 = vld [vmem:[#allocation2 + $0x360] sm:$0xf]  ;;  %v8579_v55 = vld [vmem:[#allocation2 + $0x36c] sm:$0xf0]  ;;  %v6013_v58 = vor.u32 %v8547_v53, %v6012_v52  ;;  %1746 = vmatpush.bf16.msra.mxu0 %v5757_v56 }
  0x43   :  { %v5740_v59 = vld [vmem:[#allocation2 + $0x40] sm:$0xf]  ;;  %v8479_v60 = vld [vmem:[#allocation2 + $0x4c] sm:$0xf0]  ;;  %v6141_v62 = vor.u32 %v8579_v55, %v6140_v54  ;;  %1759 = vmatpush.bf16.msra.mxu1 %v5885_v57 }
  0x44   :  { %v5868_v61 = vld [vmem:[#allocation2 + $0x140] sm:$0xf]  ;;  %v8511_v63 = vld [vmem:[#allocation2 + $0x14c] sm:$0xf0]  ;;  %v5741_v4 = vor.u32 %v8479_v60, %v5740_v59  ;;  %1772 = vmatpush.bf16.msra.mxu2 %v6013_v58  ;;  %v165_v58 = vld [vmem:[%s9810_s19 + $0x8] sm:$0xff] }
  0x45   :  { %v5996_v0 = vld [vmem:[#allocation2 + $0x240] sm:$0xf]  ;;  %v8543_v1 = vld [vmem:[#allocation2 + $0x24c] sm:$0xf0]  ;;  %v5869_v5 = vor.u32 %v8511_v63, %v5868_v61  ;;  %1785 = vmatpush.bf16.msra.mxu3 %v6141_v62  ;;  %v440_v63 = vunpack.c.l.b16 %v165_v58 }
  0x46   :  { %v6124_v2 = vld [vmem:[#allocation2 + $0x340] sm:$0xf]  ;;  %v8575_v3 = vld [vmem:[#allocation2 + $0x34c] sm:$0xf0]  ;;  %v5997_v6 = vor.u32 %v8543_v1, %v5996_v0  ;;  %1747 = vmatpush.bf16.msra.mxu0 %v5741_v4  ;;  %v441_v0 = vunpack.c.h.b16 %v165_v58 }
  0x47   :  { %v5724_v7 = vld [vmem:[#allocation2 + $0x20] sm:$0xf]  ;;  %v8475_v8 = vld [vmem:[#allocation2 + $0x2c] sm:$0xf0]  ;;  %v6125_v10 = vor.u32 %v8575_v3, %v6124_v2  ;;  %1760 = vmatpush.bf16.msra.mxu1 %v5869_v5  ;;  %v9504_v4 = vpack.c.b16 %v440_v63, %v440_v63 }
  0x48   :  { %v5852_v9 = vld [vmem:[#allocation2 + $0x120] sm:$0xf]  ;;  %v8507_v11 = vld [vmem:[#allocation2 + $0x12c] sm:$0xf0]  ;;  %v5725_v16 = vor.u32 %v8475_v8, %v5724_v7  ;;  %1773 = vmatpush.bf16.msra.mxu2 %v5997_v6  ;;  %v9509_v6 = vpack.c.b16 %v441_v0, %v441_v0 }
  0x49   :  { %v5980_v12 = vld [vmem:[#allocation2 + $0x220] sm:$0xf]  ;;  %v8539_v13 = vld [vmem:[#allocation2 + $0x22c] sm:$0xf0]  ;;  %v5853_v19 = vor.u32 %v8507_v11, %v5852_v9  ;;  %1786 = vmatpush.bf16.msra.mxu3 %v6125_v10 }
  0x4a   :  { %v6108_v14 = vld [vmem:[#allocation2 + $0x320] sm:$0xf]  ;;  %v8571_v15 = vld [vmem:[#allocation2 + $0x32c] sm:$0xf0]  ;;  %v5981_v20 = vor.u32 %v8539_v13, %v5980_v12  ;;  %1748 = vmatpush.bf16.msra.mxu0 %v5725_v16 }
  0x4b   :  { %v5708_v17 = vld [vmem:[#allocation2] sm:$0xf]  ;;  %v8471_v18 = vld [vmem:[#allocation2 + $0xc] sm:$0xf0]  ;;  %v6109_v24 = vor.u32 %v8571_v15, %v6108_v14  ;;  %1761 = vmatpush.bf16.msra.mxu1 %v5853_v19 }
  0x4c   :  { %v5836_v21 = vld [vmem:[#allocation2 + $0x100] sm:$0xf]  ;;  %v8503_v22 = vld [vmem:[#allocation2 + $0x10c] sm:$0xf0]  ;;  %v5709_v31 = vor.u32 %v8471_v18, %v5708_v17  ;;  %1774 = vmatpush.bf16.msra.mxu2 %v5981_v20 }
  0x4d   :  { %v5964_v23 = vld [vmem:[#allocation2 + $0x200] sm:$0xf]  ;;  %v8535_v25 = vld [vmem:[#allocation2 + $0x20c] sm:$0xf0]  ;;  %v5837_v35 = vor.u32 %v8503_v22, %v5836_v21  ;;  %1787 = vmatpush.bf16.msra.mxu3 %v6109_v24 }
  0x4e   :  { %v6092_v26 = vld [vmem:[#allocation2 + $0x300] sm:$0xf]  ;;  %v8567_v27 = vld [vmem:[#allocation2 + $0x30c] sm:$0xf0]  ;;  %v5965_v36 = vor.u32 %v8535_v25, %v5964_v23  ;;  %1749 = vmatpush.bf16.msra.mxu0 %v5709_v31 }
  0x4f   :  { %v6332_v28 = vld [vmem:[#allocation2 + $0x4e0] sm:$0xf]  ;;  %v8627_v29 = vld [vmem:[#allocation2 + $0x4ec] sm:$0xf0]  ;;  %v6093_v39 = vor.u32 %v8567_v27, %v6092_v26  ;;  %1762 = vmatpush.bf16.msra.mxu1 %v5837_v35 }
  0x50   :  { %v6460_v30 = vld [vmem:[#allocation2 + $0x5e0] sm:$0xf]  ;;  %v8659_v32 = vld [vmem:[#allocation2 + $0x5ec] sm:$0xf0]  ;;  %v6333_v40 = vor.u32 %v8627_v29, %v6332_v28  ;;  %1775 = vmatpush.bf16.msra.mxu2 %v5965_v36 }
  0x51   :  { %v6588_v33 = vld [vmem:[#allocation2 + $0x6e0] sm:$0xf]  ;;  %v8691_v34 = vld [vmem:[#allocation2 + $0x6ec] sm:$0xf0]  ;;  %v6461_v41 = vor.u32 %v8659_v32, %v6460_v30  ;;  %1788 = vmatpush.bf16.msra.mxu3 %v6093_v39 }
  0x52   :  { %v6716_v37 = vld [vmem:[#allocation2 + $0x7e0] sm:$0xf]  ;;  %v8723_v38 = vld [vmem:[#allocation2 + $0x7ec] sm:$0xf0]  ;;  %v6589_v42 = vor.u32 %v8691_v34, %v6588_v33  ;;  %1794 = vmatpush.bf16.msrb.mxu0 %v6333_v40 }
  0x53   :  { %v6316_v43 = vld [vmem:[#allocation2 + $0x4c0] sm:$0xf]  ;;  %v8623_v44 = vld [vmem:[#allocation2 + $0x4cc] sm:$0xf0]  ;;  %v6717_v46 = vor.u32 %v8723_v38, %v6716_v37  ;;  %1807 = vmatpush.bf16.msrb.mxu1 %v6461_v41  ;;  %1776 = vmatmul.bf16.vlgmr.msra.gmra.mxu2 %v9504_v4 }
  0x54   :  { %v6444_v45 = vld [vmem:[#allocation2 + $0x5c0] sm:$0xf]  ;;  %v8655_v47 = vld [vmem:[#allocation2 + $0x5cc] sm:$0xf0]  ;;  %v6317_v52 = vor.u32 %v8623_v44, %v6316_v43  ;;  %1820 = vmatpush.bf16.msrb.mxu2 %v6589_v42  ;;  %1789 = vmatmul.bf16.vlgmr.msra.gmra.mxu3 %v9509_v6 }
  0x55   :  { %v6572_v48 = vld [vmem:[#allocation2 + $0x6c0] sm:$0xf]  ;;  %v8687_v49 = vld [vmem:[#allocation2 + $0x6cc] sm:$0xf0]  ;;  %v6445_v54 = vor.u32 %v8655_v47, %v6444_v45  ;;  %1833 = vmatpush.bf16.msrb.mxu3 %v6717_v46 }
  0x56   :  { %v6700_v50 = vld [vmem:[#allocation2 + $0x7c0] sm:$0xf]  ;;  %v8719_v51 = vld [vmem:[#allocation2 + $0x7cc] sm:$0xf0]  ;;  %v6573_v55 = vor.u32 %v8687_v49, %v6572_v48  ;;  %1795 = vmatpush.bf16.msrb.mxu0 %v6317_v52 }
  0x57   :  { %v6300_v53 = vld [vmem:[#allocation2 + $0x4a0] sm:$0xf]  ;;  %v8619_v56 = vld [vmem:[#allocation2 + $0x4ac] sm:$0xf0]  ;;  %v6701_v59 = vor.u32 %v8719_v51, %v6700_v50  ;;  %1808 = vmatpush.bf16.msrb.mxu1 %v6445_v54 }
  0x58   :  { %v6428_v57 = vld [vmem:[#allocation2 + $0x5a0] sm:$0xf]  ;;  %v8651_v60 = vld [vmem:[#allocation2 + $0x5ac] sm:$0xf0]  ;;  %v6301_v3 = vor.u32 %v8619_v56, %v6300_v53  ;;  %1821 = vmatpush.bf16.msrb.mxu2 %v6573_v55 }
  0x59   :  { %v6556_v61 = vld [vmem:[#allocation2 + $0x6a0] sm:$0xf]  ;;  %v8683_v62 = vld [vmem:[#allocation2 + $0x6ac] sm:$0xf0]  ;;  %v6429_v7 = vor.u32 %v8651_v60, %v6428_v57  ;;  %1834 = vmatpush.bf16.msrb.mxu3 %v6701_v59 }
  0x5a   :  { %v6684_v1 = vld [vmem:[#allocation2 + $0x7a0] sm:$0xf]  ;;  %v8715_v2 = vld [vmem:[#allocation2 + $0x7ac] sm:$0xf0]  ;;  %v6557_v8 = vor.u32 %v8683_v62, %v6556_v61  ;;  %1796 = vmatpush.bf16.msrb.mxu0 %v6301_v3  ;;  %v167_v3 = vld [vmem:[%s9810_s19 + $0x18] sm:$0xff] }
  0x5b   :  { %v164_v5 = vld [vmem:[%s9810_s19] sm:$0xff]  ;;  %v8615_v10 = vld [vmem:[#allocation2 + $0x48c] sm:$0xf0]  ;;  %v6685_v14 = vor.u32 %v8715_v2, %v6684_v1  ;;  %1809 = vmatpush.bf16.msrb.mxu1 %v6429_v7 }
  0x5c   :  { %v6284_v9 = vld [vmem:[#allocation2 + $0x480] sm:$0xf]  ;;  %v438_v12 = vunpack.c.l.b16 %v164_v5  ;;  %v439_v13 = vunpack.c.h.b16 %v164_v5  ;;  %v8647_v15 = vld [vmem:[#allocation2 + $0x58c] sm:$0xf0]  ;;  %1822 = vmatpush.bf16.msrb.mxu2 %v6557_v8 }
  0x5d   :  { %v6412_v11 = vld [vmem:[#allocation2 + $0x580] sm:$0xf]  ;;  %v8679_v17 = vld [vmem:[#allocation2 + $0x68c] sm:$0xf0]  ;;  %v6285_v22 = vor.u32 %v8615_v10, %v6284_v9  ;;  %1835 = vmatpush.bf16.msrb.mxu3 %v6685_v14  ;;  %v8497_v10 = vld [vmem:[#allocation2 + $0xe4] sm:$0xf] }
  0x5e   :  { %v6540_v16 = vld [vmem:[#allocation2 + $0x680] sm:$0xf]  ;;  %v8711_v19 = vld [vmem:[#allocation2 + $0x78c] sm:$0xf0]  ;;  %v9512_v20 = vpack.c.b16 %v438_v12, %v438_v12  ;;  %v9515_v21 = vpack.c.b16 %v439_v13, %v439_v13  ;;  %v6413_v23 = vor.u32 %v8647_v15, %v6412_v11  ;;  %v5822_v11 = vld [vmem:[#allocation2 + $0xf0] sm:$0xf0] }
  0x5f   :  { %v6668_v18 = vld [vmem:[#allocation2 + $0x780] sm:$0xf]  ;;  %v6541_v24 = vor.u32 %v8679_v17, %v6540_v16  ;;  %v8611_v26 = vld [vmem:[#allocation2 + $0x46c] sm:$0xf0]  ;;  %1797 = vmatpush.bf16.msrb.mxu0 %v6285_v22  ;;  %v8529_v12 = vld [vmem:[#allocation2 + $0x1e4] sm:$0xf]  ;;  %v444_v17 = vunpack.c.l.b16 %v167_v3 }
  0x60   :  { %v6268_v25 = vld [vmem:[#allocation2 + $0x460] sm:$0xf]  ;;  %v6669_v28 = vor.u32 %v8711_v19, %v6668_v18  ;;  %v8643_v29 = vld [vmem:[#allocation2 + $0x56c] sm:$0xf0]  ;;  %1750 = vmatmul.bf16.vlgmr.msra.gmra.mxu0 %v9512_v20  ;;  %1763 = vmatmul.bf16.vlgmr.msra.gmra.mxu1 %v9515_v21  ;;  %v5950_v14 = vld [vmem:[#allocation2 + $0x1f0] sm:$0xf0] }
  0x61   :  { %v6396_v27 = vld [vmem:[#allocation2 + $0x560] sm:$0xf]  ;;  %v8675_v31 = vld [vmem:[#allocation2 + $0x66c] sm:$0xf0]  ;;  %v6269_v34 = vor.u32 %v8611_v26, %v6268_v25  ;;  %1810 = vmatpush.bf16.msrb.mxu1 %v6413_v23  ;;  %1823 = vmatpush.bf16.msrb.mxu2 %v6541_v24  ;;  %v8561_v15 = vld [vmem:[#allocation2 + $0x2e4] sm:$0xf]  ;;  %v445_v25 = vunpack.c.h.b16 %v167_v3 }
  0x62   :  { %v6524_v30 = vld [vmem:[#allocation2 + $0x660] sm:$0xf]  ;;  %v8707_v33 = vld [vmem:[#allocation2 + $0x76c] sm:$0xf0]  ;;  %v6397_v35 = vor.u32 %v8643_v29, %v6396_v27  ;;  %1836 = vmatpush.bf16.msrb.mxu3 %v6669_v28  ;;  %v6078_v16 = vld [vmem:[#allocation2 + $0x2f0] sm:$0xf0]  ;;  %v5825_v27 = vor.u32 %v8497_v10, %v5822_v11  ;;  %v5953_v29 = vor.u32 %v8529_v12, %v5950_v14 }
  0x63   :  { %v6652_v32 = vld [vmem:[#allocation2 + $0x760] sm:$0xf]  ;;  %v6525_v36 = vor.u32 %v8675_v31, %v6524_v30  ;;  %v8607_v38 = vld [vmem:[#allocation2 + $0x44c] sm:$0xf0]  ;;  %1798 = vmatpush.bf16.msrb.mxu0 %v6269_v34  ;;  %v8593_v22 = vld [vmem:[#allocation2 + $0x3e4] sm:$0xf]  ;;  %v6081_v30 = vor.u32 %v8561_v15, %v6078_v16 }
  0x64   :  { %v6252_v37 = vld [vmem:[#allocation2 + $0x440] sm:$0xf]  ;;  %v6653_v40 = vor.u32 %v8707_v33, %v6652_v32  ;;  %v8639_v41 = vld [vmem:[#allocation2 + $0x54c] sm:$0xf0]  ;;  %v6206_v23 = vld [vmem:[#allocation2 + $0x3f0] sm:$0xf0] }
  0x65   :  { %v6380_v39 = vld [vmem:[#allocation2 + $0x540] sm:$0xf]  ;;  %v8671_v43 = vld [vmem:[#allocation2 + $0x64c] sm:$0xf0]  ;;  %v6253_v46 = vor.u32 %v8607_v38, %v6252_v37  ;;  %1811 = vmatpush.bf16.msrb.mxu1 %v6397_v35  ;;  %1824 = vmatpush.bf16.msrb.mxu2 %v6525_v36  ;;  %v8493_v31 = vld [vmem:[#allocation2 + $0xc4] sm:$0xf]  ;;  %v6209_v34 = vor.u32 %v8593_v22, %v6206_v23  ;;  %v9525_v38 = vpack.c.b16 %v444_v17, %v444_v17 }
  0x66   :  { %v6508_v42 = vld [vmem:[#allocation2 + $0x640] sm:$0xf]  ;;  %v8703_v45 = vld [vmem:[#allocation2 + $0x74c] sm:$0xf0]  ;;  %v6381_v47 = vor.u32 %v8639_v41, %v6380_v39  ;;  %1837 = vmatpush.bf16.msrb.mxu3 %v6653_v40  ;;  %v5806_v32 = vld [vmem:[#allocation2 + $0xd0] sm:$0xf0] }
  0x67   :  { %v6636_v44 = vld [vmem:[#allocation2 + $0x740] sm:$0xf]  ;;  %v6509_v48 = vor.u32 %v8671_v43, %v6508_v42  ;;  %v8603_v50 = vld [vmem:[#allocation2 + $0x42c] sm:$0xf0]  ;;  %1799 = vmatpush.bf16.msrb.mxu0 %v6253_v46  ;;  %v8525_v33 = vld [vmem:[#allocation2 + $0x1c4] sm:$0xf]  ;;  %v9529_v42 = vpack.c.b16 %v445_v25, %v445_v25  ;;  %v5809_v43 = vor.u32 %v8493_v31, %v5806_v32 }
  0x68   :  { %v6236_v49 = vld [vmem:[#allocation2 + $0x420] sm:$0xf]  ;;  %v6637_v52 = vor.u32 %v8703_v45, %v6636_v44  ;;  %v8635_v53 = vld [vmem:[#allocation2 + $0x52c] sm:$0xf0]  ;;  %v5934_v35 = vld [vmem:[#allocation2 + $0x1d0] sm:$0xf0] }
  0x69   :  { %v6364_v51 = vld [vmem:[#allocation2 + $0x520] sm:$0xf]  ;;  %v8667_v55 = vld [vmem:[#allocation2 + $0x62c] sm:$0xf0]  ;;  %v6237_v59 = vor.u32 %v8603_v50, %v6236_v49  ;;  %1812 = vmatpush.bf16.msrb.mxu1 %v6381_v47  ;;  %1825 = vmatpush.bf16.msrb.mxu2 %v6509_v48  ;;  %v8557_v36 = vld [vmem:[#allocation2 + $0x2c4] sm:$0xf]  ;;  %v5937_v45 = vor.u32 %v8525_v33, %v5934_v35 }
  0x6a   :  { %v6492_v54 = vld [vmem:[#allocation2 + $0x620] sm:$0xf]  ;;  %v8699_v57 = vld [vmem:[#allocation2 + $0x72c] sm:$0xf0]  ;;  %v6365_v63 = vor.u32 %v8635_v53, %v6364_v51  ;;  %1838 = vmatpush.bf16.msrb.mxu3 %v6637_v52  ;;  %v6062_v37 = vld [vmem:[#allocation2 + $0x2d0] sm:$0xf0] }
  0x6b   :  { %v6620_v56 = vld [vmem:[#allocation2 + $0x720] sm:$0xf]  ;;  %v8599_v60 = vld [vmem:[#allocation2 + $0x40c] sm:$0xf0]  ;;  %v6493_v0 = vor.u32 %v8667_v55, %v6492_v54  ;;  %1800 = vmatpush.bf16.msrb.mxu0 %v6237_v59  ;;  %v8589_v39 = vld [vmem:[#allocation2 + $0x3c4] sm:$0xf]  ;;  %v6065_v46 = vor.u32 %v8557_v36, %v6062_v37 }
  0x6c   :  { %v6220_v58 = vld [vmem:[#allocation2 + $0x400] sm:$0xf]  ;;  %v8631_v62 = vld [vmem:[#allocation2 + $0x50c] sm:$0xf0]  ;;  %v6621_v5 = vor.u32 %v8699_v57, %v6620_v56  ;;  %v6190_v40 = vld [vmem:[#allocation2 + $0x3d0] sm:$0xf0] }
  0x6d   :  { %v6348_v61 = vld [vmem:[#allocation2 + $0x500] sm:$0xf]  ;;  %v8663_v2 = vld [vmem:[#allocation2 + $0x60c] sm:$0xf0]  ;;  %v6221_v13 = vor.u32 %v8599_v60, %v6220_v58  ;;  %1813 = vmatpush.bf16.msrb.mxu1 %v6365_v63  ;;  %1826 = vmatpush.bf16.msrb.mxu2 %v6493_v0  ;;  %v8489_v47 = vld [vmem:[#allocation2 + $0xa4] sm:$0xf]  ;;  %v6193_v50 = vor.u32 %v8589_v39, %v6190_v40 }
  0x6e   :  { %v6476_v1 = vld [vmem:[#allocation2 + $0x600] sm:$0xf]  ;;  %v8695_v8 = vld [vmem:[#allocation2 + $0x70c] sm:$0xf0]  ;;  %v6349_v18 = vor.u32 %v8631_v62, %v6348_v61  ;;  %1839 = vmatpush.bf16.msrb.mxu3 %v6621_v5  ;;  %v5790_v48 = vld [vmem:[#allocation2 + $0xb0] sm:$0xf0] }
  0x6f   :  { %v6604_v7 = vld [vmem:[#allocation2 + $0x700] sm:$0xf]  ;;  %v166_v9 = vld [vmem:[%s9810_s19 + $0x10] sm:$0xff]  ;;  %v6477_v19 = vor.u32 %v8663_v2, %v6476_v1  ;;  %1801 = vmatpush.bf16.msrb.mxu0 %v6221_v13  ;;  %v8521_v49 = vld [vmem:[#allocation2 + $0x1a4] sm:$0xf]  ;;  %v5793_v56 = vor.u32 %v8489_v47, %v5790_v48 }
  0x70   :  { %v442_v24 = vunpack.c.l.b16 %v166_v9  ;;  %v6605_v26 = vor.u32 %v8695_v8, %v6604_v7  ;;  %v443_v28 = vunpack.c.h.b16 %v166_v9  ;;  %v5918_v51 = vld [vmem:[#allocation2 + $0x1b0] sm:$0xf0]  ;;  %v8553_v52 = vld [vmem:[#allocation2 + $0x2a4] sm:$0xf] }
  0x71   :  { %1814 = vmatpush.bf16.msrb.mxu1 %v6349_v18  ;;  %1827 = vmatpush.bf16.msrb.mxu2 %v6477_v19  ;;  %v6046_v53 = vld [vmem:[#allocation2 + $0x2b0] sm:$0xf0]  ;;  %v8585_v54 = vld [vmem:[#allocation2 + $0x3a4] sm:$0xf]  ;;  %v5921_v57 = vor.u32 %v8521_v49, %v5918_v51 }
  0x72   :  { %v9527_v41 = vpack.c.b16 %v442_v24, %v442_v24  ;;  %1840 = vmatpush.bf16.msrb.mxu3 %v6605_v26  ;;  %v9531_v44 = vpack.c.b16 %v443_v28, %v443_v28  ;;  %v6174_v55 = vld [vmem:[#allocation2 + $0x3b0] sm:$0xf0]  ;;  %v6049_v58 = vor.u32 %v8553_v52, %v6046_v53  ;;  %v8485_v59 = vld [vmem:[#allocation2 + $0x84] sm:$0xf] }
  0x73   :  { %1846 = vmatpush.bf16.msra.mxu0 %v5825_v27  ;;  %v5774_v60 = vld [vmem:[#allocation2 + $0x90] sm:$0xf0]  ;;  %v8517_v61 = vld [vmem:[#allocation2 + $0x184] sm:$0xf]  ;;  %v6177_v62 = vor.u32 %v8585_v54, %v6174_v55 }
  0x74   :  { %1828 = vmatmul.bf16.vlgmr.msrb.gmra.mxu2 %v9525_v38  ;;  %1802 = vmatmul.bf16.vlgmr.msrb.gmra.mxu0 %v9527_v41  ;;  %v5902_v63 = vld [vmem:[#allocation2 + $0x190] sm:$0xf0]  ;;  %v8549_v0 = vld [vmem:[#allocation2 + $0x284] sm:$0xf]  ;;  %v5777_v5 = vor.u32 %v8485_v59, %v5774_v60 }
  0x75   :  { %1859 = vmatpush.bf16.msra.mxu1 %v5953_v29  ;;  %1872 = vmatpush.bf16.msra.mxu2 %v6081_v30  ;;  %v6030_v1 = vld [vmem:[#allocation2 + $0x290] sm:$0xf0]  ;;  %v8581_v2 = vld [vmem:[#allocation2 + $0x384] sm:$0xf]  ;;  %v5905_v7 = vor.u32 %v8517_v61, %v5902_v63 }
  0x76   :  { %1885 = vmatpush.bf16.msra.mxu3 %v6209_v34  ;;  %1815 = vmatmul.bf16.vlgmr.msrb.gmra.mxu1 %v9531_v44  ;;  %v6158_v3 = vld [vmem:[#allocation2 + $0x390] sm:$0xf0]  ;;  %v6033_v8 = vor.u32 %v8549_v0, %v6030_v1  ;;  %v8481_v9 = vld [vmem:[#allocation2 + $0x64] sm:$0xf] }
  0x77   :  { %1841 = vmatmul.bf16.vlgmr.msrb.gmra.mxu3 %v9529_v42  ;;  %1847 = vmatpush.bf16.msra.mxu0 %v5809_v43  ;;  %v5758_v10 = vld [vmem:[#allocation2 + $0x70] sm:$0xf0]  ;;  %v8513_v11 = vld [vmem:[#allocation2 + $0x164] sm:$0xf]  ;;  %v6161_v12 = vor.u32 %v8581_v2, %v6158_v3 }
  0x78   :  { %v5886_v13 = vld [vmem:[#allocation2 + $0x170] sm:$0xf0]  ;;  %v8545_v14 = vld [vmem:[#allocation2 + $0x264] sm:$0xf]  ;;  %v5761_v18 = vor.u32 %v8481_v9, %v5758_v10 }
  0x79   :  { %1860 = vmatpush.bf16.msra.mxu1 %v5937_v45  ;;  %1873 = vmatpush.bf16.msra.mxu2 %v6065_v46  ;;  %v6014_v15 = vld [vmem:[#allocation2 + $0x270] sm:$0xf0]  ;;  %v8577_v16 = vld [vmem:[#allocation2 + $0x364] sm:$0xf]  ;;  %v5889_v19 = vor.u32 %v8513_v11, %v5886_v13 }
  0x7a   :  { %1886 = vmatpush.bf16.msra.mxu3 %v6193_v50  ;;  %v6142_v17 = vld [vmem:[#allocation2 + $0x370] sm:$0xf0]  ;;  %v6017_v22 = vor.u32 %v8545_v14, %v6014_v15  ;;  %v8477_v23 = vld [vmem:[#allocation2 + $0x44] sm:$0xf] }
  0x7b   :  { %1848 = vmatpush.bf16.msra.mxu0 %v5793_v56  ;;  %v5742_v24 = vld [vmem:[#allocation2 + $0x50] sm:$0xf0]  ;;  %v8509_v25 = vld [vmem:[#allocation2 + $0x144] sm:$0xf]  ;;  %v6145_v26 = vor.u32 %v8577_v16, %v6142_v17 }
  0x7c   :  { %v5870_v27 = vld [vmem:[#allocation2 + $0x150] sm:$0xf0]  ;;  %v8541_v28 = vld [vmem:[#allocation2 + $0x244] sm:$0xf]  ;;  %v5745_v32 = vor.u32 %v8477_v23, %v5742_v24 }
  0x7d   :  { %1861 = vmatpush.bf16.msra.mxu1 %v5921_v57  ;;  %1874 = vmatpush.bf16.msra.mxu2 %v6049_v58  ;;  %v5998_v29 = vld [vmem:[#allocation2 + $0x250] sm:$0xf0]  ;;  %v8573_v30 = vld [vmem:[#allocation2 + $0x344] sm:$0xf]  ;;  %v5873_v35 = vor.u32 %v8509_v25, %v5870_v27 }
  0x7e   :  { %1887 = vmatpush.bf16.msra.mxu3 %v6177_v62  ;;  %v6126_v31 = vld [vmem:[#allocation2 + $0x350] sm:$0xf0]  ;;  %v8473_v33 = vld [vmem:[#allocation2 + $0x24] sm:$0xf]  ;;  %v6001_v36 = vor.u32 %v8541_v28, %v5998_v29 }
  0x7f   :  { %1849 = vmatpush.bf16.msra.mxu0 %v5777_v5  ;;  %v5726_v34 = vld [vmem:[#allocation2 + $0x30] sm:$0xf0]  ;;  %v8505_v37 = vld [vmem:[#allocation2 + $0x124] sm:$0xf]  ;;  %v6129_v43 = vor.u32 %v8573_v30, %v6126_v31 }
  0x80   :  { %v5854_v39 = vld [vmem:[#allocation2 + $0x130] sm:$0xf0]  ;;  %v8537_v40 = vld [vmem:[#allocation2 + $0x224] sm:$0xf]  ;;  %v5729_v48 = vor.u32 %v8473_v33, %v5726_v34 }
  0x81   :  { %1862 = vmatpush.bf16.msra.mxu1 %v5905_v7  ;;  %1875 = vmatpush.bf16.msra.mxu2 %v6033_v8  ;;  %v5982_v45 = vld [vmem:[#allocation2 + $0x230] sm:$0xf0]  ;;  %v8569_v46 = vld [vmem:[#allocation2 + $0x324] sm:$0xf]  ;;  %v5857_v51 = vor.u32 %v8505_v37, %v5854_v39 }
  0x82   :  { %1888 = vmatpush.bf16.msra.mxu3 %v6161_v12  ;;  %v6110_v47 = vld [vmem:[#allocation2 + $0x330] sm:$0xf0]  ;;  %v8469_v49 = vld [vmem:[#allocation2 + $0x4] sm:$0xf]  ;;  %v5985_v52 = vor.u32 %v8537_v40, %v5982_v45 }
  0x83   :  { %1850 = vmatpush.bf16.msra.mxu0 %v5761_v18  ;;  %v5710_v50 = vld [vmem:[#allocation2 + $0x10] sm:$0xf0]  ;;  %v8501_v53 = vld [vmem:[#allocation2 + $0x104] sm:$0xf]  ;;  %v6113_v56 = vor.u32 %v8569_v46, %v6110_v47 }
  0x84   :  { %v5838_v54 = vld [vmem:[#allocation2 + $0x110] sm:$0xf0]  ;;  %v8533_v55 = vld [vmem:[#allocation2 + $0x204] sm:$0xf]  ;;  %v5713_v63 = vor.u32 %v8469_v49, %v5710_v50 }
  0x85   :  { %1863 = vmatpush.bf16.msra.mxu1 %v5889_v19  ;;  %1876 = vmatpush.bf16.msra.mxu2 %v6017_v22  ;;  %v5966_v57 = vld [vmem:[#allocation2 + $0x210] sm:$0xf0]  ;;  %v8565_v58 = vld [vmem:[#allocation2 + $0x304] sm:$0xf]  ;;  %v5841_v3 = vor.u32 %v8501_v53, %v5838_v54 }
  0x86   :  { %1889 = vmatpush.bf16.msra.mxu3 %v6145_v26  ;;  %v6094_v59 = vld [vmem:[#allocation2 + $0x310] sm:$0xf0]  ;;  %v8625_v60 = vld [vmem:[#allocation2 + $0x4e4] sm:$0xf]  ;;  %v5969_v5 = vor.u32 %v8533_v55, %v5966_v57 }
  0x87   :  { %1851 = vmatpush.bf16.msra.mxu0 %v5745_v32  ;;  %v6334_v61 = vld [vmem:[#allocation2 + $0x4f0] sm:$0xf0]  ;;  %v8657_v62 = vld [vmem:[#allocation2 + $0x5e4] sm:$0xf]  ;;  %v6097_v9 = vor.u32 %v8565_v58, %v6094_v59 }
  0x88   :  { %v6462_v0 = vld [vmem:[#allocation2 + $0x5f0] sm:$0xf0]  ;;  %v8689_v1 = vld [vmem:[#allocation2 + $0x6e4] sm:$0xf]  ;;  %v6337_v10 = vor.u32 %v8625_v60, %v6334_v61 }
  0x89   :  { %1864 = vmatpush.bf16.msra.mxu1 %v5873_v35  ;;  %1877 = vmatpush.bf16.msra.mxu2 %v6001_v36  ;;  %v6590_v2 = vld [vmem:[#allocation2 + $0x6f0] sm:$0xf0]  ;;  %v8721_v7 = vld [vmem:[#allocation2 + $0x7e4] sm:$0xf]  ;;  %v6465_v11 = vor.u32 %v8657_v62, %v6462_v0 }
  0x8a   :  { %1890 = vmatpush.bf16.msra.mxu3 %v6129_v43  ;;  %v6718_v8 = vld [vmem:[#allocation2 + $0x7f0] sm:$0xf0]  ;;  %v6593_v12 = vor.u32 %v8689_v1, %v6590_v2  ;;  %v8621_v13 = vld [vmem:[#allocation2 + $0x4c4] sm:$0xf] }
  0x8b   :  { %1852 = vmatpush.bf16.msra.mxu0 %v5729_v48  ;;  %v6318_v14 = vld [vmem:[#allocation2 + $0x4d0] sm:$0xf0]  ;;  %v8653_v15 = vld [vmem:[#allocation2 + $0x5c4] sm:$0xf]  ;;  %v6721_v16 = vor.u32 %v8721_v7, %v6718_v8 }
  0x8c   :  { %v6446_v17 = vld [vmem:[#allocation2 + $0x5d0] sm:$0xf0]  ;;  %v8685_v18 = vld [vmem:[#allocation2 + $0x6c4] sm:$0xf]  ;;  %v6321_v24 = vor.u32 %v8621_v13, %v6318_v14 }
  0x8d   :  { %1865 = vmatpush.bf16.msra.mxu1 %v5857_v51  ;;  %1878 = vmatpush.bf16.msra.mxu2 %v5985_v52  ;;  %v6574_v19 = vld [vmem:[#allocation2 + $0x6d0] sm:$0xf0]  ;;  %v8717_v22 = vld [vmem:[#allocation2 + $0x7c4] sm:$0xf]  ;;  %v6449_v25 = vor.u32 %v8653_v15, %v6446_v17 }
  0x8e   :  { %1891 = vmatpush.bf16.msra.mxu3 %v6113_v56  ;;  %v6702_v23 = vld [vmem:[#allocation2 + $0x7d0] sm:$0xf0]  ;;  %v6577_v26 = vor.u32 %v8685_v18, %v6574_v19  ;;  %v8617_v27 = vld [vmem:[#allocation2 + $0x4a4] sm:$0xf] }
  0x8f   :  { %1853 = vmatpush.bf16.msra.mxu0 %v5713_v63  ;;  %v6302_v28 = vld [vmem:[#allocation2 + $0x4b0] sm:$0xf0]  ;;  %v8649_v29 = vld [vmem:[#allocation2 + $0x5a4] sm:$0xf]  ;;  %v6705_v30 = vor.u32 %v8717_v22, %v6702_v23 }
  0x90   :  { %v6430_v31 = vld [vmem:[#allocation2 + $0x5b0] sm:$0xf0]  ;;  %v8681_v32 = vld [vmem:[#allocation2 + $0x6a4] sm:$0xf]  ;;  %v6305_v36 = vor.u32 %v8617_v27, %v6302_v28 }
  0x91   :  { %1866 = vmatpush.bf16.msra.mxu1 %v5841_v3  ;;  %1879 = vmatpush.bf16.msra.mxu2 %v5969_v5  ;;  %v6558_v33 = vld [vmem:[#allocation2 + $0x6b0] sm:$0xf0]  ;;  %v8713_v34 = vld [vmem:[#allocation2 + $0x7a4] sm:$0xf]  ;;  %v6433_v37 = vor.u32 %v8649_v29, %v6430_v31 }
  0x92   :  { %1892 = vmatpush.bf16.msra.mxu3 %v6097_v9  ;;  %v6686_v35 = vld [vmem:[#allocation2 + $0x7b0] sm:$0xf0]  ;;  %1854 = vmatmul.bf16.vlgmr.msra.gmra.mxu0 %v9512_v20  ;;  %v6561_v39 = vor.u32 %v8681_v32, %v6558_v33  ;;  %v8613_v40 = vld [vmem:[#allocation2 + $0x484] sm:$0xf] }
  0x93   :  { %1898 = vmatpush.bf16.msrb.mxu0 %v6337_v10  ;;  %v6286_v43 = vld [vmem:[#allocation2 + $0x490] sm:$0xf0]  ;;  %v8645_v45 = vld [vmem:[#allocation2 + $0x584] sm:$0xf]  ;;  %v6689_v46 = vor.u32 %v8713_v34, %v6686_v35 }
  0x94   :  { %1880 = vmatmul.bf16.vlgmr.msra.gmra.mxu2 %v9504_v4  ;;  %1867 = vmatmul.bf16.vlgmr.msra.gmra.mxu1 %v9515_v21  ;;  %v6414_v47 = vld [vmem:[#allocation2 + $0x590] sm:$0xf0]  ;;  %v8677_v48 = vld [vmem:[#allocation2 + $0x684] sm:$0xf]  ;;  %v6289_v52 = vor.u32 %v8613_v40, %v6286_v43  ;;  %v5828_v43 = vld [vmem:[#allocation2 + $0xe8] sm:$0xf] }
  0x95   :  { %1911 = vmatpush.bf16.msrb.mxu1 %v6465_v11  ;;  %1924 = vmatpush.bf16.msrb.mxu2 %v6593_v12  ;;  %v6542_v49 = vld [vmem:[#allocation2 + $0x690] sm:$0xf0]  ;;  %v8709_v50 = vld [vmem:[#allocation2 + $0x784] sm:$0xf]  ;;  %v6417_v53 = vor.u32 %v8645_v45, %v6414_v47  ;;  %v8500_v45 = vld [vmem:[#allocation2 + $0xf4] sm:$0xf0] }
  0x96   :  { %1937 = vmatpush.bf16.msrb.mxu3 %v6721_v16  ;;  %v6670_v51 = vld [vmem:[#allocation2 + $0x790] sm:$0xf0]  ;;  %v6545_v54 = vor.u32 %v8677_v48, %v6542_v49  ;;  %v8609_v55 = vld [vmem:[#allocation2 + $0x464] sm:$0xf]  ;;  %v8532_v48 = vld [vmem:[#allocation2 + $0x1f4] sm:$0xf0] }
  0x97   :  { %1893 = vmatmul.bf16.vlgmr.msra.gmra.mxu3 %v9509_v6  ;;  %1899 = vmatpush.bf16.msrb.mxu0 %v6321_v24  ;;  %v6270_v56 = vld [vmem:[#allocation2 + $0x470] sm:$0xf0]  ;;  %v8641_v57 = vld [vmem:[#allocation2 + $0x564] sm:$0xf]  ;;  %v6673_v58 = vor.u32 %v8709_v50, %v6670_v51  ;;  %v6084_v49 = vld [vmem:[#allocation2 + $0x2e8] sm:$0xf] }
  0x98   :  { %v6398_v59 = vld [vmem:[#allocation2 + $0x570] sm:$0xf0]  ;;  %v8673_v60 = vld [vmem:[#allocation2 + $0x664] sm:$0xf]  ;;  %v6273_v0 = vor.u32 %v8609_v55, %v6270_v56  ;;  %v8564_v50 = vld [vmem:[#allocation2 + $0x2f4] sm:$0xf0]  ;;  %v5829_v56 = vor.u32 %v8500_v45, %v5828_v43 }
  0x99   :  { %1912 = vmatpush.bf16.msrb.mxu1 %v6449_v25  ;;  %1925 = vmatpush.bf16.msrb.mxu2 %v6577_v26  ;;  %v6526_v61 = vld [vmem:[#allocation2 + $0x670] sm:$0xf0]  ;;  %v8705_v62 = vld [vmem:[#allocation2 + $0x764] sm:$0xf]  ;;  %v6401_v1 = vor.u32 %v8641_v57, %v6398_v59  ;;  %v5812_v59 = vld [vmem:[#allocation2 + $0xc8] sm:$0xf] }
  0x9a   :  { %1938 = vmatpush.bf16.msrb.mxu3 %v6705_v30  ;;  %v6654_v63 = vld [vmem:[#allocation2 + $0x770] sm:$0xf0]  ;;  %v6529_v2 = vor.u32 %v8673_v60, %v6526_v61  ;;  %v8605_v3 = vld [vmem:[#allocation2 + $0x444] sm:$0xf]  ;;  %v8496_v60 = vld [vmem:[#allocation2 + $0xd4] sm:$0xf0] }
  0x9b   :  { %1900 = vmatpush.bf16.msrb.mxu0 %v6305_v36  ;;  %v6254_v5 = vld [vmem:[#allocation2 + $0x450] sm:$0xf0]  ;;  %v8637_v7 = vld [vmem:[#allocation2 + $0x544] sm:$0xf]  ;;  %v6657_v8 = vor.u32 %v8705_v62, %v6654_v63  ;;  %v5940_v61 = vld [vmem:[#allocation2 + $0x1c8] sm:$0xf] }
  0x9c   :  { %v6382_v9 = vld [vmem:[#allocation2 + $0x550] sm:$0xf0]  ;;  %v8669_v10 = vld [vmem:[#allocation2 + $0x644] sm:$0xf]  ;;  %v6257_v14 = vor.u32 %v8605_v3, %v6254_v5  ;;  %v8528_v63 = vld [vmem:[#allocation2 + $0x1d4] sm:$0xf0]  ;;  %v5813_v5 = vor.u32 %v8496_v60, %v5812_v59 }
  0x9d   :  { %1913 = vmatpush.bf16.msrb.mxu1 %v6433_v37  ;;  %1926 = vmatpush.bf16.msrb.mxu2 %v6561_v39  ;;  %v6510_v11 = vld [vmem:[#allocation2 + $0x650] sm:$0xf0]  ;;  %v8701_v12 = vld [vmem:[#allocation2 + $0x744] sm:$0xf]  ;;  %v6385_v15 = vor.u32 %v8637_v7, %v6382_v9  ;;  %v8592_v3 = vld [vmem:[#allocation2 + $0x3d4] sm:$0xf0]  ;;  %v5941_v7 = vor.u32 %v8528_v63, %v5940_v61 }
  0x9e   :  { %1939 = vmatpush.bf16.msrb.mxu3 %v6689_v46  ;;  %v6638_v13 = vld [vmem:[#allocation2 + $0x750] sm:$0xf0]  ;;  %v6513_v16 = vor.u32 %v8669_v10, %v6510_v11  ;;  %v8601_v17 = vld [vmem:[#allocation2 + $0x424] sm:$0xf]  ;;  %v5956_v46 = vld [vmem:[#allocation2 + $0x1e8] sm:$0xf] }
  0x9f   :  { %1901 = vmatpush.bf16.msrb.mxu0 %v6289_v52  ;;  %v6238_v18 = vld [vmem:[#allocation2 + $0x430] sm:$0xf0]  ;;  %v8633_v19 = vld [vmem:[#allocation2 + $0x524] sm:$0xf]  ;;  %v6641_v22 = vor.u32 %v8701_v12, %v6638_v13  ;;  %v5957_v57 = vor.u32 %v8532_v48, %v5956_v46  ;;  %v5796_v9 = vld [vmem:[#allocation2 + $0xa8] sm:$0xf] }
  0xa0   :  { %v6366_v23 = vld [vmem:[#allocation2 + $0x530] sm:$0xf0]  ;;  %v8665_v24 = vld [vmem:[#allocation2 + $0x624] sm:$0xf]  ;;  %v6241_v28 = vor.u32 %v8601_v17, %v6238_v18  ;;  %v8492_v10 = vld [vmem:[#allocation2 + $0xb4] sm:$0xf0] }
  0xa1   :  { %1914 = vmatpush.bf16.msrb.mxu1 %v6417_v53  ;;  %1927 = vmatpush.bf16.msrb.mxu2 %v6545_v54  ;;  %v6494_v25 = vld [vmem:[#allocation2 + $0x630] sm:$0xf0]  ;;  %v8697_v26 = vld [vmem:[#allocation2 + $0x724] sm:$0xf]  ;;  %v6369_v31 = vor.u32 %v8633_v19, %v6366_v23  ;;  %v6212_v53 = vld [vmem:[#allocation2 + $0x3e8] sm:$0xf]  ;;  %v5797_v18 = vor.u32 %v8492_v10, %v5796_v9 }
  0xa2   :  { %1940 = vmatpush.bf16.msrb.mxu3 %v6673_v58  ;;  %v6622_v27 = vld [vmem:[#allocation2 + $0x730] sm:$0xf0]  ;;  %v8597_v29 = vld [vmem:[#allocation2 + $0x404] sm:$0xf]  ;;  %v6497_v32 = vor.u32 %v8665_v24, %v6494_v25  ;;  %v8596_v54 = vld [vmem:[#allocation2 + $0x3f4] sm:$0xf0]  ;;  %v6085_v58 = vor.u32 %v8564_v50, %v6084_v49 }
  0xa3   :  { %1902 = vmatpush.bf16.msrb.mxu0 %v6273_v0  ;;  %v6222_v30 = vld [vmem:[#allocation2 + $0x410] sm:$0xf0]  ;;  %v8629_v33 = vld [vmem:[#allocation2 + $0x504] sm:$0xf]  ;;  %v6625_v36 = vor.u32 %v8697_v26, %v6622_v27  ;;  %v6213_v62 = vor.u32 %v8596_v54, %v6212_v53  ;;  %v6068_v0 = vld [vmem:[#allocation2 + $0x2c8] sm:$0xf] }
  0xa4   :  { %v6350_v34 = vld [vmem:[#allocation2 + $0x510] sm:$0xf0]  ;;  %v8661_v35 = vld [vmem:[#allocation2 + $0x604] sm:$0xf]  ;;  %v6225_v47 = vor.u32 %v8597_v29, %v6222_v30  ;;  %v5924_v11 = vld [vmem:[#allocation2 + $0x1a8] sm:$0xf] }
  0xa5   :  { %1915 = vmatpush.bf16.msrb.mxu1 %v6401_v1  ;;  %1928 = vmatpush.bf16.msrb.mxu2 %v6529_v2  ;;  %v6478_v37 = vld [vmem:[#allocation2 + $0x610] sm:$0xf0]  ;;  %v8693_v39 = vld [vmem:[#allocation2 + $0x704] sm:$0xf]  ;;  %v6353_v51 = vor.u32 %v8629_v33, %v6350_v34  ;;  %v8560_v1 = vld [vmem:[#allocation2 + $0x2d4] sm:$0xf0] }
  0xa6   :  { %1941 = vmatpush.bf16.msrb.mxu3 %v6657_v8  ;;  %v6606_v40 = vld [vmem:[#allocation2 + $0x710] sm:$0xf0]  ;;  %v6481_v52 = vor.u32 %v8661_v35, %v6478_v37  ;;  %v6196_v2 = vld [vmem:[#allocation2 + $0x3c8] sm:$0xf]  ;;  %v6069_v8 = vor.u32 %v8560_v1, %v6068_v0  ;;  %v8524_v13 = vld [vmem:[#allocation2 + $0x1b4] sm:$0xf0] }
  0xa7   :  { %1903 = vmatpush.bf16.msrb.mxu0 %v6257_v14  ;;  %v6609_v55 = vor.u32 %v8693_v39, %v6606_v40  ;;  %v6197_v12 = vor.u32 %v8592_v3, %v6196_v2  ;;  %v6052_v14 = vld [vmem:[#allocation2 + $0x2a8] sm:$0xf]  ;;  %v8588_v17 = vld [vmem:[#allocation2 + $0x3b4] sm:$0xf0]  ;;  %v5925_v19 = vor.u32 %v8524_v13, %v5924_v11 }
  0xa8   :  { %v5780_v23 = vld [vmem:[#allocation2 + $0x88] sm:$0xf]  ;;  %v8488_v24 = vld [vmem:[#allocation2 + $0x94] sm:$0xf0] }
  0xa9   :  { %1916 = vmatpush.bf16.msrb.mxu1 %v6385_v15  ;;  %1929 = vmatpush.bf16.msrb.mxu2 %v6513_v16  ;;  %v8556_v15 = vld [vmem:[#allocation2 + $0x2b4] sm:$0xf0]  ;;  %v6180_v16 = vld [vmem:[#allocation2 + $0x3a8] sm:$0xf] }
  0xaa   :  { %1942 = vmatpush.bf16.msrb.mxu3 %v6641_v22  ;;  %v6053_v22 = vor.u32 %v8556_v15, %v6052_v14  ;;  %v5908_v25 = vld [vmem:[#allocation2 + $0x188] sm:$0xf]  ;;  %v6181_v26 = vor.u32 %v8588_v17, %v6180_v16  ;;  %v8520_v27 = vld [vmem:[#allocation2 + $0x194] sm:$0xf0] }
  0xab   :  { %1904 = vmatpush.bf16.msrb.mxu0 %v6241_v28  ;;  %v6036_v28 = vld [vmem:[#allocation2 + $0x288] sm:$0xf]  ;;  %v8552_v29 = vld [vmem:[#allocation2 + $0x294] sm:$0xf0]  ;;  %v5909_v33 = vor.u32 %v8520_v27, %v5908_v25 }
  0xac   :  { %v6164_v30 = vld [vmem:[#allocation2 + $0x388] sm:$0xf]  ;;  %v6037_v34 = vor.u32 %v8552_v29, %v6036_v28  ;;  %v8516_v40 = vld [vmem:[#allocation2 + $0x174] sm:$0xf0] }
  0xad   :  { %1917 = vmatpush.bf16.msrb.mxu1 %v6369_v31  ;;  %1930 = vmatpush.bf16.msrb.mxu2 %v6497_v32  ;;  %v8584_v31 = vld [vmem:[#allocation2 + $0x394] sm:$0xf0]  ;;  %v5781_v32 = vor.u32 %v8488_v24, %v5780_v23  ;;  %v5764_v35 = vld [vmem:[#allocation2 + $0x68] sm:$0xf] }
  0xae   :  { %1943 = vmatpush.bf16.msrb.mxu3 %v6625_v36  ;;  %v8484_v36 = vld [vmem:[#allocation2 + $0x74] sm:$0xf0]  ;;  %v5892_v37 = vld [vmem:[#allocation2 + $0x168] sm:$0xf]  ;;  %v6165_v39 = vor.u32 %v8584_v31, %v6164_v30 }
  0xaf   :  { %1905 = vmatpush.bf16.msrb.mxu0 %v6225_v47  ;;  %v6020_v43 = vld [vmem:[#allocation2 + $0x268] sm:$0xf]  ;;  %v8548_v45 = vld [vmem:[#allocation2 + $0x274] sm:$0xf0]  ;;  %v5765_v48 = vor.u32 %v8484_v36, %v5764_v35  ;;  %v5893_v49 = vor.u32 %v8516_v40, %v5892_v37 }
  0xb0   :  { %v6148_v46 = vld [vmem:[#allocation2 + $0x368] sm:$0xf]  ;;  %v8580_v47 = vld [vmem:[#allocation2 + $0x374] sm:$0xf0]  ;;  %v6021_v50 = vor.u32 %v8548_v45, %v6020_v43 }
  0xb1   :  { %1918 = vmatpush.bf16.msrb.mxu1 %v6353_v51  ;;  %1931 = vmatpush.bf16.msrb.mxu2 %v6481_v52  ;;  %v5748_v51 = vld [vmem:[#allocation2 + $0x48] sm:$0xf]  ;;  %v8480_v52 = vld [vmem:[#allocation2 + $0x54] sm:$0xf0]  ;;  %v6149_v54 = vor.u32 %v8580_v47, %v6148_v46 }
  0xb2   :  { %1944 = vmatpush.bf16.msrb.mxu3 %v6609_v55  ;;  %1906 = vmatmul.bf16.vlgmr.msrb.gmra.mxu0 %v9527_v41  ;;  %v5876_v53 = vld [vmem:[#allocation2 + $0x148] sm:$0xf]  ;;  %v8512_v55 = vld [vmem:[#allocation2 + $0x154] sm:$0xf0]  ;;  %v5749_v60 = vor.u32 %v8480_v52, %v5748_v51 }
  0xb3   :  { %1950 = vmatpush.bf16.msra.mxu0 %v5829_v56  ;;  %v6004_v56 = vld [vmem:[#allocation2 + $0x248] sm:$0xf]  ;;  %v8576_v59 = vld [vmem:[#allocation2 + $0x354] sm:$0xf0]  ;;  %v5877_v61 = vor.u32 %v8512_v55, %v5876_v53 }
  0xb4   :  { %1932 = vmatmul.bf16.vlgmr.msrb.gmra.mxu2 %v9525_v38  ;;  %1919 = vmatmul.bf16.vlgmr.msrb.gmra.mxu1 %v9531_v44  ;;  %v5732_v63 = vld [vmem:[#allocation2 + $0x28] sm:$0xf]  ;;  %v8476_v0 = vld [vmem:[#allocation2 + $0x34] sm:$0xf0] }
  0xb5   :  { %1963 = vmatpush.bf16.msra.mxu1 %v5957_v57  ;;  %1976 = vmatpush.bf16.msra.mxu2 %v6085_v58  ;;  %v8544_v57 = vld [vmem:[#allocation2 + $0x254] sm:$0xf0]  ;;  %v6132_v58 = vld [vmem:[#allocation2 + $0x348] sm:$0xf]  ;;  %v5733_v10 = vor.u32 %v8476_v0, %v5732_v63 }
  0xb6   :  { %1989 = vmatpush.bf16.msra.mxu3 %v6213_v62  ;;  %v6005_v62 = vor.u32 %v8544_v57, %v6004_v56  ;;  %v5860_v1 = vld [vmem:[#allocation2 + $0x128] sm:$0xf]  ;;  %v6133_v2 = vor.u32 %v8576_v59, %v6132_v58  ;;  %v8508_v3 = vld [vmem:[#allocation2 + $0x134] sm:$0xf0] }
  0xb7   :  { %1945 = vmatmul.bf16.vlgmr.msrb.gmra.mxu3 %v9529_v42  ;;  %1951 = vmatpush.bf16.msra.mxu0 %v5813_v5  ;;  %v5988_v5 = vld [vmem:[#allocation2 + $0x228] sm:$0xf]  ;;  %v8572_v9 = vld [vmem:[#allocation2 + $0x334] sm:$0xf0]  ;;  %v5861_v13 = vor.u32 %v8508_v3, %v5860_v1 }
  0xb8   :  { %v5716_v11 = vld [vmem:[#allocation2 + $0x8] sm:$0xf]  ;;  %v8504_v16 = vld [vmem:[#allocation2 + $0x114] sm:$0xf0] }
  0xb9   :  { %1964 = vmatpush.bf16.msra.mxu1 %v5941_v7  ;;  %1977 = vmatpush.bf16.msra.mxu2 %v6069_v8  ;;  %v8540_v7 = vld [vmem:[#allocation2 + $0x234] sm:$0xf0]  ;;  %v6116_v8 = vld [vmem:[#allocation2 + $0x328] sm:$0xf] }
  0xba   :  { %1990 = vmatpush.bf16.msra.mxu3 %v6197_v12  ;;  %v8472_v12 = vld [vmem:[#allocation2 + $0x14] sm:$0xf0]  ;;  %v5989_v14 = vor.u32 %v8540_v7, %v5988_v5  ;;  %v5844_v15 = vld [vmem:[#allocation2 + $0x108] sm:$0xf] }
  0xbb   :  { %1952 = vmatpush.bf16.msra.mxu0 %v5797_v18  ;;  %v5972_v17 = vld [vmem:[#allocation2 + $0x208] sm:$0xf]  ;;  %v6117_v18 = vor.u32 %v8572_v9, %v6116_v8  ;;  %v8568_v23 = vld [vmem:[#allocation2 + $0x314] sm:$0xf0]  ;;  %v5717_v27 = vor.u32 %v8472_v12, %v5716_v11  ;;  %v5845_v31 = vor.u32 %v8504_v16, %v5844_v15 }
  0xbc   :  { %v6340_v24 = vld [vmem:[#allocation2 + $0x4e8] sm:$0xf]  ;;  %v8628_v25 = vld [vmem:[#allocation2 + $0x4f4] sm:$0xf0] }
  0xbd   :  { %1965 = vmatpush.bf16.msra.mxu1 %v5925_v19  ;;  %1978 = vmatpush.bf16.msra.mxu2 %v6053_v22  ;;  %v8536_v19 = vld [vmem:[#allocation2 + $0x214] sm:$0xf0]  ;;  %v6100_v22 = vld [vmem:[#allocation2 + $0x308] sm:$0xf]  ;;  %v6341_v36 = vor.u32 %v8628_v25, %v6340_v24 }
  0xbe   :  { %1991 = vmatpush.bf16.msra.mxu3 %v6181_v26  ;;  %v6468_v26 = vld [vmem:[#allocation2 + $0x5e8] sm:$0xf]  ;;  %v8660_v28 = vld [vmem:[#allocation2 + $0x5f4] sm:$0xf0]  ;;  %v6101_v35 = vor.u32 %v8568_v23, %v6100_v22  ;;  %v9552_v22 = vld [vmem:[%s9811_s4] sm:$0xf] }
  0xbf   :  { %1953 = vmatpush.bf16.msra.mxu0 %v5781_v32  ;;  %v6596_v29 = vld [vmem:[#allocation2 + $0x6e8] sm:$0xf]  ;;  %v8692_v30 = vld [vmem:[#allocation2 + $0x6f4] sm:$0xf0]  ;;  %v5973_v32 = vor.u32 %v8536_v19, %v5972_v17  ;;  %v6469_v37 = vor.u32 %v8660_v28, %v6468_v26 }
  0xc0   :  { %v6324_v40 = vld [vmem:[#allocation2 + $0x4c8] sm:$0xf]  ;;  %v8624_v43 = vld [vmem:[#allocation2 + $0x4d4] sm:$0xf0] }
  0xc1   :  { %1966 = vmatpush.bf16.msra.mxu1 %v5909_v33  ;;  %1979 = vmatpush.bf16.msra.mxu2 %v6037_v34  ;;  %v6724_v33 = vld [vmem:[#allocation2 + $0x7e8] sm:$0xf]  ;;  %v8724_v34 = vld [vmem:[#allocation2 + $0x7f4] sm:$0xf0]  ;;  %v6325_v52 = vor.u32 %v8624_v43, %v6324_v40 }
  0xc2   :  { %1992 = vmatpush.bf16.msra.mxu3 %v6165_v39  ;;  %v6597_v39 = vor.u32 %v8692_v30, %v6596_v29  ;;  %v6452_v45 = vld [vmem:[#allocation2 + $0x5c8] sm:$0xf]  ;;  %v6725_v46 = vor.u32 %v8724_v34, %v6724_v33  ;;  %v8656_v47 = vld [vmem:[#allocation2 + $0x5d4] sm:$0xf0]  ;;  %v426_v30 = vperm.slane %v9552_v22, 0 }
  0xc3   :  { %1954 = vmatpush.bf16.msra.mxu0 %v5765_v48  ;;  %v6580_v48 = vld [vmem:[#allocation2 + $0x6c8] sm:$0xf]  ;;  %v8720_v51 = vld [vmem:[#allocation2 + $0x7d4] sm:$0xf0]  ;;  %v6453_v53 = vor.u32 %v8656_v47, %v6452_v45 }
  0xc4   :  { %v6308_v55 = vld [vmem:[#allocation2 + $0x4a8] sm:$0xf]  ;;  %v8620_v56 = vld [vmem:[#allocation2 + $0x4b4] sm:$0xf0] }
  0xc5   :  { %1967 = vmatpush.bf16.msra.mxu1 %v5893_v49  ;;  %1980 = vmatpush.bf16.msra.mxu2 %v6021_v50  ;;  %v8688_v49 = vld [vmem:[#allocation2 + $0x6d4] sm:$0xf0]  ;;  %v6708_v50 = vld [vmem:[#allocation2 + $0x7c8] sm:$0xf]  ;;  %v6309_v0 = vor.u32 %v8620_v56, %v6308_v55 }
  0xc6   :  { %1993 = vmatpush.bf16.msra.mxu3 %v6149_v54  ;;  %v6581_v54 = vor.u32 %v8688_v49, %v6580_v48  ;;  %v6436_v57 = vld [vmem:[#allocation2 + $0x5a8] sm:$0xf]  ;;  %v6709_v58 = vor.u32 %v8720_v51, %v6708_v50  ;;  %v8652_v59 = vld [vmem:[#allocation2 + $0x5b4] sm:$0xf0] }
  0xc7   :  { %1955 = vmatpush.bf16.msra.mxu0 %v5749_v60  ;;  %v6564_v60 = vld [vmem:[#allocation2 + $0x6a8] sm:$0xf]  ;;  %v8716_v63 = vld [vmem:[#allocation2 + $0x7b4] sm:$0xf0]  ;;  %v6437_v1 = vor.u32 %v8652_v59, %v6436_v57 }
  0xc8   :  { %v6292_v3 = vld [vmem:[#allocation2 + $0x488] sm:$0xf]  ;;  %v8616_v5 = vld [vmem:[#allocation2 + $0x494] sm:$0xf0] }
  0xc9   :  { %1968 = vmatpush.bf16.msra.mxu1 %v5877_v61  ;;  %1981 = vmatpush.bf16.msra.mxu2 %v6005_v62  ;;  %v8684_v61 = vld [vmem:[#allocation2 + $0x6b4] sm:$0xf0]  ;;  %v6692_v62 = vld [vmem:[#allocation2 + $0x7a8] sm:$0xf] }
  0xca   :  { %1994 = vmatpush.bf16.msra.mxu3 %v6133_v2  ;;  %v6565_v2 = vor.u32 %v8684_v61, %v6564_v60  ;;  %v6420_v7 = vld [vmem:[#allocation2 + $0x588] sm:$0xf]  ;;  %v6693_v8 = vor.u32 %v8716_v63, %v6692_v62  ;;  %v8648_v9 = vld [vmem:[#allocation2 + $0x594] sm:$0xf0] }
  0xcb   :  { %1956 = vmatpush.bf16.msra.mxu0 %v5733_v10  ;;  %v6548_v10 = vld [vmem:[#allocation2 + $0x688] sm:$0xf]  ;;  %v8680_v11 = vld [vmem:[#allocation2 + $0x694] sm:$0xf0]  ;;  %v6421_v16 = vor.u32 %v8648_v9, %v6420_v7 }
  0xcc   :  { %v6676_v12 = vld [vmem:[#allocation2 + $0x788] sm:$0xf]  ;;  %v6549_v17 = vor.u32 %v8680_v11, %v6548_v10  ;;  %v8644_v24 = vld [vmem:[#allocation2 + $0x574] sm:$0xf0] }
  0xcd   :  { %1969 = vmatpush.bf16.msra.mxu1 %v5861_v13  ;;  %1982 = vmatpush.bf16.msra.mxu2 %v5989_v14  ;;  %v8712_v13 = vld [vmem:[#allocation2 + $0x794] sm:$0xf0]  ;;  %v6293_v14 = vor.u32 %v8616_v5, %v6292_v3  ;;  %v6276_v15 = vld [vmem:[#allocation2 + $0x468] sm:$0xf] }
  0xce   :  { %1995 = vmatpush.bf16.msra.mxu3 %v6117_v18  ;;  %v8612_v18 = vld [vmem:[#allocation2 + $0x474] sm:$0xf0]  ;;  %v6404_v19 = vld [vmem:[#allocation2 + $0x568] sm:$0xf]  ;;  %v6677_v23 = vor.u32 %v8712_v13, %v6676_v12 }
  0xcf   :  { %1957 = vmatpush.bf16.msra.mxu0 %v5717_v27  ;;  %v6532_v25 = vld [vmem:[#allocation2 + $0x668] sm:$0xf]  ;;  %v8676_v26 = vld [vmem:[#allocation2 + $0x674] sm:$0xf0]  ;;  %v6277_v29 = vor.u32 %v8612_v18, %v6276_v15  ;;  %v8530_v18 = vld [vmem:[#allocation2 + $0x1ec] sm:$0xf] }
  0xd0   :  { %v6660_v27 = vld [vmem:[#allocation2 + $0x768] sm:$0xf]  ;;  %v8708_v28 = vld [vmem:[#allocation2 + $0x774] sm:$0xf0] }
  0xd1   :  { %1970 = vmatpush.bf16.msra.mxu1 %v5845_v31  ;;  %1983 = vmatpush.bf16.msra.mxu2 %v5973_v32  ;;  %v6405_v31 = vor.u32 %v8644_v24, %v6404_v19  ;;  %v6533_v32 = vor.u32 %v8676_v26, %v6532_v25  ;;  %v6260_v33 = vld [vmem:[#allocation2 + $0x448] sm:$0xf]  ;;  %v8608_v34 = vld [vmem:[#allocation2 + $0x454] sm:$0xf0]  ;;  %v5958_v24 = vld [vmem:[#allocation2 + $0x1f8] sm:$0xf0] }
  0xd2   :  { %1996 = vmatpush.bf16.msra.mxu3 %v6101_v35  ;;  %1958 = vmatmul.bf16.vlgmr.msra.gmra.mxu0 %v9512_v20  ;;  %v6388_v35 = vld [vmem:[#allocation2 + $0x548] sm:$0xf]  ;;  %v8672_v40 = vld [vmem:[#allocation2 + $0x654] sm:$0xf0]  ;;  %v6261_v47 = vor.u32 %v8608_v34, %v6260_v33  ;;  %v8562_v25 = vld [vmem:[#allocation2 + $0x2ec] sm:$0xf] }
  0xd3   :  { %2002 = vmatpush.bf16.msrb.mxu0 %v6341_v36  ;;  %v6661_v36 = vor.u32 %v8708_v28, %v6660_v27  ;;  %v6644_v43 = vld [vmem:[#allocation2 + $0x748] sm:$0xf]  ;;  %v8704_v45 = vld [vmem:[#allocation2 + $0x754] sm:$0xf0]  ;;  %v6086_v26 = vld [vmem:[#allocation2 + $0x2f8] sm:$0xf0] }
  0xd4   :  { %1984 = vmatmul.bf16.vlgmr.msra.gmra.mxu2 %v9504_v4  ;;  %1971 = vmatmul.bf16.vlgmr.msra.gmra.mxu1 %v9515_v21  ;;  %v6645_v56 = vor.u32 %v8704_v45, %v6644_v43  ;;  %v8636_v57 = vld [vmem:[#allocation2 + $0x534] sm:$0xf0]  ;;  %v6628_v62 = vld [vmem:[#allocation2 + $0x728] sm:$0xf]  ;;  %v8526_v43 = vld [vmem:[#allocation2 + $0x1cc] sm:$0xf] }
  0xd5   :  { %2015 = vmatpush.bf16.msrb.mxu1 %v6469_v37  ;;  %2028 = vmatpush.bf16.msrb.mxu2 %v6597_v39  ;;  %v8640_v37 = vld [vmem:[#allocation2 + $0x554] sm:$0xf0]  ;;  %v6516_v39 = vld [vmem:[#allocation2 + $0x648] sm:$0xf] }
  0xd6   :  { %2041 = vmatpush.bf16.msrb.mxu3 %v6725_v46  ;;  %v6389_v50 = vor.u32 %v8640_v37, %v6388_v35  ;;  %v6517_v51 = vor.u32 %v8672_v40, %v6516_v39  ;;  %v1777_v55 = vpop.f32.mrf.mxu2  ;;  %v8668_v59 = vld [vmem:[#allocation2 + $0x634] sm:$0xf0]  ;;  %v6484_v10 = vld [vmem:[#allocation2 + $0x608] sm:$0xf]  ;;  %v6089_v37 = vor.u32 %v8562_v25, %v6086_v26  ;;  %v8494_v39 = vld [vmem:[#allocation2 + $0xcc] sm:$0xf] }
  0xd7   :  { %1997 = vmatmul.bf16.vlgmr.msra.gmra.mxu3 %v9509_v6  ;;  %2003 = vmatpush.bf16.msrb.mxu0 %v6325_v52  ;;  %v6244_v52 = vld [vmem:[#allocation2 + $0x428] sm:$0xf]  ;;  %v1790_v61 = vpop.f32.mrf.mxu3  ;;  %v8700_v63 = vld [vmem:[#allocation2 + $0x734] sm:$0xf0]  ;;  %v5814_v40 = vld [vmem:[#allocation2 + $0xd8] sm:$0xf0] }
  0xd8   :  { %v8632_v9 = vld [vmem:[#allocation2 + $0x514] sm:$0xf0]  ;;  %v6629_v11 = vor.u32 %v8700_v63, %v6628_v62  ;;  %v6612_v13 = vld [vmem:[#allocation2 + $0x708] sm:$0xf]  ;;  %v6182_v62 = vld [vmem:[#allocation2 + $0x3b8] sm:$0xf0] }
  0xd9   :  { %2016 = vmatpush.bf16.msrb.mxu1 %v6453_v53  ;;  %2029 = vmatpush.bf16.msrb.mxu2 %v6581_v54  ;;  %v8604_v53 = vld [vmem:[#allocation2 + $0x434] sm:$0xf0]  ;;  %v6372_v54 = vld [vmem:[#allocation2 + $0x528] sm:$0xf] }
  0xda   :  { %2042 = vmatpush.bf16.msrb.mxu3 %v6709_v58  ;;  %v6500_v58 = vld [vmem:[#allocation2 + $0x628] sm:$0xf]  ;;  %v6373_v5 = vor.u32 %v8636_v57, %v6372_v54  ;;  %v8664_v12 = vld [vmem:[#allocation2 + $0x614] sm:$0xf0]  ;;  %v8490_v54 = vld [vmem:[#allocation2 + $0xac] sm:$0xf] }
  0xdb   :  { %2004 = vmatpush.bf16.msrb.mxu0 %v6309_v0  ;;  %v6245_v0 = vor.u32 %v8604_v53, %v6244_v52  ;;  %v6501_v7 = vor.u32 %v8668_v59, %v6500_v58  ;;  %v5926_v58 = vld [vmem:[#allocation2 + $0x1b8] sm:$0xf0]  ;;  %v8554_v59 = vld [vmem:[#allocation2 + $0x2ac] sm:$0xf] }
  0xdd   :  { %2017 = vmatpush.bf16.msrb.mxu1 %v6437_v1  ;;  %2030 = vmatpush.bf16.msrb.mxu2 %v6565_v2  ;;  %v1751_v46 = vpop.f32.mrf.mxu0  ;;  %v1764_v49 = vpop.f32.mrf.mxu1  ;;  %v6228_v1 = vld [vmem:[#allocation2 + $0x408] sm:$0xf]  ;;  %v8600_v2 = vld [vmem:[#allocation2 + $0x414] sm:$0xf0] }
  0xde   :  { %2043 = vmatpush.bf16.msrb.mxu3 %v6693_v8  ;;  %v1752_v48 = vadd.f32 %v1751_v46, %v426_v30  ;;  %v6356_v8 = vld [vmem:[#allocation2 + $0x508] sm:$0xf]  ;;  %v8594_v30 = vld [vmem:[#allocation2 + $0x3ec] sm:$0xf]  ;;  %v5942_v46 = vld [vmem:[#allocation2 + $0x1d8] sm:$0xf0] }
  0xdf   :  { %2005 = vmatpush.bf16.msrb.mxu0 %v6293_v14  ;;  %v8696_v14 = vld [vmem:[#allocation2 + $0x714] sm:$0xf0]  ;;  %v6357_v28 = vor.u32 %v8632_v9, %v6356_v8  ;;  %v1792_v35 = vpop.f32.mrf.mxu3  ;;  %v5945_v52 = vor.u32 %v8526_v43, %v5942_v46  ;;  %v5910_v8 = vld [vmem:[#allocation2 + $0x198] sm:$0xf0]  ;;  %v8550_v9 = vld [vmem:[#allocation2 + $0x28c] sm:$0xf] }
  0xe0   :  { %v1765_v60 = vadd.f32 %v1764_v49, %v1752_v48  ;;  %v6613_v33 = vor.u32 %v8696_v14, %v6612_v13  ;;  %v6070_v48 = vld [vmem:[#allocation2 + $0x2d8] sm:$0xf0]  ;;  %v8590_v49 = vld [vmem:[#allocation2 + $0x3cc] sm:$0xf] }
  0xe1   :  { %2018 = vmatpush.bf16.msrb.mxu1 %v6421_v16  ;;  %2031 = vmatpush.bf16.msrb.mxu2 %v6549_v17  ;;  %v8498_v16 = vld [vmem:[#allocation2 + $0xec] sm:$0xf]  ;;  %v5830_v17 = vld [vmem:[#allocation2 + $0xf8] sm:$0xf0] }
  0xe2   :  { %2044 = vmatpush.bf16.msrb.mxu3 %v6677_v23  ;;  %v1778_v3 = vadd.f32 %v1777_v55, %v1765_v60  ;;  %v6229_v23 = vor.u32 %v8600_v2, %v6228_v1  ;;  %v5833_v34 = vor.u32 %v8498_v16, %v5830_v17  ;;  %v5798_v55 = vld [vmem:[#allocation2 + $0xb8] sm:$0xf0]  ;;  %v8486_v2 = vld [vmem:[#allocation2 + $0x8c] sm:$0xf] }
  0xe3   :  { %2006 = vmatpush.bf16.msrb.mxu0 %v6277_v29  ;;  %v6485_v29 = vor.u32 %v8664_v12, %v6484_v10  ;;  %v6054_v60 = vld [vmem:[#allocation2 + $0x2b8] sm:$0xf0]  ;;  %v5801_v63 = vor.u32 %v8490_v54, %v5798_v55 }
  0xe4   :  { %v9555_v15 = vadd.f32 %v1790_v61, %v1778_v3  ;;  %v8586_v61 = vld [vmem:[#allocation2 + $0x3ac] sm:$0xf]  ;;  %v6057_v1 = vor.u32 %v8554_v59, %v6054_v60  ;;  %v5782_v3 = vld [vmem:[#allocation2 + $0x98] sm:$0xf0] }
  0xe5   :  { %2019 = vmatpush.bf16.msrb.mxu1 %v6405_v31  ;;  %2032 = vmatpush.bf16.msrb.mxu2 %v6533_v32  ;;  %v1753_v19 = vpop.f32.mrf.mxu0  ;;  %v1766_v27 = vpop.f32.mrf.mxu1  ;;  %v6214_v31 = vld [vmem:[#allocation2 + $0x3f8] sm:$0xf0]  ;;  %v5785_v13 = vor.u32 %v8486_v2, %v5782_v3  ;;  %v8470_v3 = vld [vmem:[#allocation2 + $0xc] sm:$0xf] }
  0xe6   :  { %2045 = vmatpush.bf16.msrb.mxu3 %v6661_v36  ;;  %v1779_v32 = vpop.f32.mrf.mxu2  ;;  %v5961_v36 = vor.u32 %v8530_v18, %v5958_v24  ;;  %v6217_v45 = vor.u32 %v8594_v30, %v6214_v31  ;;  %v6038_v10 = vld [vmem:[#allocation2 + $0x298] sm:$0xf0]  ;;  %v8482_v18 = vld [vmem:[#allocation2 + $0x6c] sm:$0xf] }
  0xe7   :  { %2007 = vmatpush.bf16.msrb.mxu0 %v6261_v47  ;;  %v8558_v47 = vld [vmem:[#allocation2 + $0x2cc] sm:$0xf]  ;;  %v6166_v12 = vld [vmem:[#allocation2 + $0x398] sm:$0xf0]  ;;  %v6041_v17 = vor.u32 %v8550_v9, %v6038_v10 }
  0xe8   :  { %v6073_v53 = vor.u32 %v8558_v47, %v6070_v48  ;;  %v5766_v19 = vld [vmem:[#allocation2 + $0x78] sm:$0xf0]  ;;  %v8578_v30 = vld [vmem:[#allocation2 + $0x36c] sm:$0xf] }
  0xe9   :  { %2020 = vmatpush.bf16.msrb.mxu1 %v6389_v50  ;;  %2033 = vmatpush.bf16.msrb.mxu2 %v6517_v51  ;;  %v6198_v50 = vld [vmem:[#allocation2 + $0x3d8] sm:$0xf0]  ;;  %v5817_v51 = vor.u32 %v8494_v39, %v5814_v40  ;;  %v8510_v39 = vld [vmem:[#allocation2 + $0x14c] sm:$0xf] }
  0xea   :  { %2046 = vmatpush.bf16.msrb.mxu3 %v6645_v56  ;;  %v8522_v56 = vld [vmem:[#allocation2 + $0x1ac] sm:$0xf]  ;;  %v6201_v57 = vor.u32 %v8590_v49, %v6198_v50  ;;  %v5894_v27 = vld [vmem:[#allocation2 + $0x178] sm:$0xf0] }
  0xeb   :  { %2008 = vmatpush.bf16.msrb.mxu0 %v6245_v0  ;;  %v5929_v0 = vor.u32 %v8522_v56, %v5926_v58  ;;  %v6150_v31 = vld [vmem:[#allocation2 + $0x378] sm:$0xf0]  ;;  %v8574_v49 = vld [vmem:[#allocation2 + $0x34c] sm:$0xf] }
  0xec   :  { %v5878_v43 = vld [vmem:[#allocation2 + $0x158] sm:$0xf0]  ;;  %v8474_v56 = vld [vmem:[#allocation2 + $0x2c] sm:$0xf] }
  0xed   :  { %2021 = vmatpush.bf16.msrb.mxu1 %v6373_v5  ;;  %2034 = vmatpush.bf16.msrb.mxu2 %v6501_v7  ;;  %v8518_v5 = vld [vmem:[#allocation2 + $0x18c] sm:$0xf]  ;;  %v6185_v7 = vor.u32 %v8586_v61, %v6182_v62  ;;  %v6006_v46 = vld [vmem:[#allocation2 + $0x258] sm:$0xf0]  ;;  %v5881_v54 = vor.u32 %v8510_v39, %v5878_v43 }
  0xee   :  { %2047 = vmatpush.bf16.msrb.mxu3 %v6629_v11  ;;  %v8582_v11 = vld [vmem:[#allocation2 + $0x38c] sm:$0xf]  ;;  %v5913_v16 = vor.u32 %v8518_v5, %v5910_v8  ;;  %v6134_v50 = vld [vmem:[#allocation2 + $0x358] sm:$0xf0] }
  0xef   :  { %2009 = vmatpush.bf16.msrb.mxu0 %v6229_v23  ;;  %v8514_v23 = vld [vmem:[#allocation2 + $0x16c] sm:$0xf]  ;;  %v6169_v26 = vor.u32 %v8582_v11, %v6166_v12  ;;  %v6137_v60 = vor.u32 %v8574_v49, %v6134_v50  ;;  %v5862_v61 = vld [vmem:[#allocation2 + $0x138] sm:$0xf0] }
  0xf0   :  { %v8506_v58 = vld [vmem:[#allocation2 + $0x12c] sm:$0xf]  ;;  %v5718_v5 = vld [vmem:[#allocation2 + $0x18] sm:$0xf0] }
  0xf1   :  { %2022 = vmatpush.bf16.msrb.mxu1 %v6357_v28  ;;  %2035 = vmatpush.bf16.msrb.mxu2 %v6485_v29  ;;  %v1803_v14 = vpop.f32.mrf.mxu0  ;;  %v8546_v28 = vld [vmem:[#allocation2 + $0x26c] sm:$0xf]  ;;  %v6022_v29 = vld [vmem:[#allocation2 + $0x278] sm:$0xf0] }
  0xf2   :  { %2048 = vmatpush.bf16.msrb.mxu3 %v6613_v33  ;;  %2010 = vmatmul.bf16.vlgmr.msrb.gmra.mxu0 %v9527_v41  ;;  %v1804_v24 = vadd.f32 %v1803_v14, %v9555_v15  ;;  %v5769_v33 = vor.u32 %v8482_v18, %v5766_v19  ;;  %v6025_v35 = vor.u32 %v8546_v28, %v6022_v29  ;;  %v8538_v62 = vld [vmem:[#allocation2 + $0x22c] sm:$0xf]  ;;  %v5846_v10 = vld [vmem:[#allocation2 + $0x118] sm:$0xf0] }
  0xf3   :  { %2054 = vmatpush.bf16.msra.mxu0 %v5833_v34  ;;  %v1816_v25 = vpop.f32.mrf.mxu1  ;;  %v5897_v34 = vor.u32 %v8514_v23, %v5894_v27  ;;  %v6153_v15 = vor.u32 %v8578_v30, %v6150_v31  ;;  %v8502_v9 = vld [vmem:[#allocation2 + $0x10c] sm:$0xf]  ;;  %v5974_v14 = vld [vmem:[#allocation2 + $0x218] sm:$0xf0] }
  0xf4   :  { %2036 = vmatmul.bf16.vlgmr.msrb.gmra.mxu2 %v9525_v38  ;;  %2023 = vmatmul.bf16.vlgmr.msrb.gmra.mxu1 %v9531_v44  ;;  %v1817_v32 = vadd.f32 %v1816_v25, %v1804_v24  ;;  %v8534_v11 = vld [vmem:[#allocation2 + $0x20c] sm:$0xf]  ;;  %v6342_v23 = vld [vmem:[#allocation2 + $0x4f8] sm:$0xf0]  ;;  %v5721_v25 = vor.u32 %v8470_v3, %v5718_v5  ;;  %v5849_v29 = vor.u32 %v8502_v9, %v5846_v10 }
  0xf5   :  { %2067 = vmatpush.bf16.msra.mxu1 %v5961_v36  ;;  %2080 = vmatpush.bf16.msra.mxu2 %v6089_v37  ;;  %v8478_v36 = vld [vmem:[#allocation2 + $0x4c] sm:$0xf]  ;;  %v5750_v37 = vld [vmem:[#allocation2 + $0x58] sm:$0xf0]  ;;  %v5977_v30 = vor.u32 %v8534_v11, %v5974_v14 }
  0xf6   :  { %2093 = vmatpush.bf16.msra.mxu3 %v6217_v45  ;;  %v8542_v45 = vld [vmem:[#allocation2 + $0x24c] sm:$0xf]  ;;  %v6598_v28 = vld [vmem:[#allocation2 + $0x6f8] sm:$0xf0] }
  0xf7   :  { %2049 = vmatmul.bf16.vlgmr.msrb.gmra.mxu3 %v9529_v42  ;;  %2055 = vmatpush.bf16.msra.mxu0 %v5817_v51  ;;  %v1829_v40 = vpop.f32.mrf.mxu2  ;;  %v5753_v51 = vor.u32 %v8478_v36, %v5750_v37  ;;  %v6009_v55 = vor.u32 %v8542_v45, %v6006_v46  ;;  %v8626_v19 = vld [vmem:[#allocation2 + $0x4ec] sm:$0xf]  ;;  %v6326_v39 = vld [vmem:[#allocation2 + $0x4d8] sm:$0xf0] }
  0xf8   :  { %v1830_v47 = vadd.f32 %v1829_v40, %v1817_v32  ;;  %v8658_v24 = vld [vmem:[#allocation2 + $0x5ec] sm:$0xf]  ;;  %v6726_v32 = vld [vmem:[#allocation2 + $0x7f8] sm:$0xf0] }
  0xf9   :  { %2068 = vmatpush.bf16.msra.mxu1 %v5945_v52  ;;  %2081 = vmatpush.bf16.msra.mxu2 %v6073_v53  ;;  %v1805_v53 = vpop.f32.mrf.mxu0  ;;  %v8690_v27 = vld [vmem:[#allocation2 + $0x6ec] sm:$0xf]  ;;  %v6454_v43 = vld [vmem:[#allocation2 + $0x5d8] sm:$0xf0] }
  0xfa   :  { %2094 = vmatpush.bf16.msra.mxu3 %v6201_v57  ;;  %v1842_v48 = vpop.f32.mrf.mxu3  ;;  %v5734_v57 = vld [vmem:[#allocation2 + $0x38] sm:$0xf0]  ;;  %v8722_v31 = vld [vmem:[#allocation2 + $0x7ec] sm:$0xf]  ;;  %v6601_v36 = vor.u32 %v8690_v27, %v6598_v28 }
  0xfb   :  { %2056 = vmatpush.bf16.msra.mxu0 %v5801_v63  ;;  %v9562_v52 = vadd.f32 %v1842_v48, %v1830_v47  ;;  %v1818_v59 = vpop.f32.mrf.mxu1  ;;  %v5990_v63 = vld [vmem:[#allocation2 + $0x238] sm:$0xf0]  ;;  %v5737_v2 = vor.u32 %v8474_v56, %v5734_v57  ;;  %v8622_v37 = vld [vmem:[#allocation2 + $0x4cc] sm:$0xf] }
  0xfc   :  { %v5993_v8 = vor.u32 %v8538_v62, %v5990_v63  ;;  %v8654_v40 = vld [vmem:[#allocation2 + $0x5cc] sm:$0xf]  ;;  %v6582_v46 = vld [vmem:[#allocation2 + $0x6d8] sm:$0xf0]  ;;  %v6329_v49 = vor.u32 %v8622_v37, %v6326_v39 }
  0xfd   :  { %2069 = vmatpush.bf16.msra.mxu1 %v5929_v0  ;;  %2082 = vmatpush.bf16.msra.mxu2 %v6057_v1  ;;  %v8570_v0 = vld [vmem:[#allocation2 + $0x32c] sm:$0xf]  ;;  %v6118_v1 = vld [vmem:[#allocation2 + $0x338] sm:$0xf0]  ;;  %v6457_v50 = vor.u32 %v8654_v40, %v6454_v43 }
  0xfe   :  { %2095 = vmatpush.bf16.msra.mxu3 %v6185_v7  ;;  %v5865_v7 = vor.u32 %v8506_v58, %v5862_v61  ;;  %v8686_v45 = vld [vmem:[#allocation2 + $0x6cc] sm:$0xf]  ;;  %v6710_v48 = vld [vmem:[#allocation2 + $0x7d8] sm:$0xf0] }
  0xff   :  { %2057 = vmatpush.bf16.msra.mxu0 %v5785_v13  ;;  %v1831_v12 = vpop.f32.mrf.mxu2  ;;  %v6121_v13 = vor.u32 %v8570_v0, %v6118_v1  ;;  %v8718_v47 = vld [vmem:[#allocation2 + $0x7cc] sm:$0xf]  ;;  %v6438_v57 = vld [vmem:[#allocation2 + $0x5b8] sm:$0xf0] }
 0x100   :  { %v8618_v53 = vld [vmem:[#allocation2 + $0x4ac] sm:$0xf]  ;;  %v6713_v56 = vor.u32 %v8718_v47, %v6710_v48  ;;  %v6566_v59 = vld [vmem:[#allocation2 + $0x6b8] sm:$0xf0] }
 0x101   :  { %2070 = vmatpush.bf16.msra.mxu1 %v5913_v16  ;;  %2083 = vmatpush.bf16.msra.mxu2 %v6041_v17  ;;  %v8566_v16 = vld [vmem:[#allocation2 + $0x30c] sm:$0xf]  ;;  %v6102_v17 = vld [vmem:[#allocation2 + $0x318] sm:$0xf0] }
 0x102   :  { %2096 = vmatpush.bf16.msra.mxu3 %v6169_v26  ;;  %v1844_v18 = vpop.f32.mrf.mxu3  ;;  %v6470_v26 = vld [vmem:[#allocation2 + $0x5f8] sm:$0xf0]  ;;  %v8682_v58 = vld [vmem:[#allocation2 + $0x6ac] sm:$0xf] }
 0x103   :  { %2058 = vmatpush.bf16.msra.mxu0 %v5769_v33  ;;  %v6105_v33 = vor.u32 %v8566_v16, %v6102_v17  ;;  %v6694_v61 = vld [vmem:[#allocation2 + $0x7b8] sm:$0xf0]  ;;  %v6569_v0 = vor.u32 %v8682_v58, %v6566_v59  ;;  %v8614_v1 = vld [vmem:[#allocation2 + $0x48c] sm:$0xf]  ;;  %v427_v58 = vperm.slane %v9552_v22, 1 }
 0x104   :  { %v6422_v5 = vld [vmem:[#allocation2 + $0x598] sm:$0xf0]  ;;  %v8710_v9 = vld [vmem:[#allocation2 + $0x78c] sm:$0xf] }
 0x105   :  { %2071 = vmatpush.bf16.msra.mxu1 %v5897_v34  ;;  %2084 = vmatpush.bf16.msra.mxu2 %v6025_v35  ;;  %v6345_v34 = vor.u32 %v8626_v19, %v6342_v23  ;;  %v6473_v35 = vor.u32 %v8658_v24, %v6470_v26  ;;  %v8610_v12 = vld [vmem:[#allocation2 + $0x46c] sm:$0xf]  ;;  %v6406_v18 = vld [vmem:[#allocation2 + $0x578] sm:$0xf0] }
 0x106   :  { %2097 = vmatpush.bf16.msra.mxu3 %v6153_v15  ;;  %v6729_v15 = vor.u32 %v8722_v31, %v6726_v32  ;;  %v8642_v14 = vld [vmem:[#allocation2 + $0x56c] sm:$0xf]  ;;  %v6534_v23 = vld [vmem:[#allocation2 + $0x678] sm:$0xf0] }
 0x107   :  { %2059 = vmatpush.bf16.msra.mxu0 %v5753_v51  ;;  %v6585_v51 = vor.u32 %v8686_v45, %v6582_v46  ;;  %v8674_v19 = vld [vmem:[#allocation2 + $0x66c] sm:$0xf]  ;;  %v6409_v27 = vor.u32 %v8642_v14, %v6406_v18  ;;  %v6646_v40 = vld [vmem:[#allocation2 + $0x758] sm:$0xf0] }
 0x108   :  { %v8706_v24 = vld [vmem:[#allocation2 + $0x76c] sm:$0xf]  ;;  %v6537_v28 = vor.u32 %v8674_v19, %v6534_v23  ;;  %v6246_v48 = vld [vmem:[#allocation2 + $0x438] sm:$0xf0] }
 0x109   :  { %2072 = vmatpush.bf16.msra.mxu1 %v5881_v54  ;;  %2085 = vmatpush.bf16.msra.mxu2 %v6009_v55  ;;  %v6310_v54 = vld [vmem:[#allocation2 + $0x4b8] sm:$0xf0]  ;;  %v8650_v55 = vld [vmem:[#allocation2 + $0x5ac] sm:$0xf] }
 0x10a   :  { %2098 = vmatpush.bf16.msra.mxu3 %v6137_v60  ;;  %v8714_v60 = vld [vmem:[#allocation2 + $0x7ac] sm:$0xf]  ;;  %v6313_v62 = vor.u32 %v8618_v53, %v6310_v54  ;;  %v6441_v63 = vor.u32 %v8650_v55, %v6438_v57  ;;  %v6374_v53 = vld [vmem:[#allocation2 + $0x538] sm:$0xf0] }
 0x10b   :  { %2060 = vmatpush.bf16.msra.mxu0 %v5737_v2  ;;  %v6294_v2 = vld [vmem:[#allocation2 + $0x498] sm:$0xf0]  ;;  %v6697_v3 = vor.u32 %v8714_v60, %v6694_v61  ;;  %v8638_v31 = vld [vmem:[#allocation2 + $0x54c] sm:$0xf] }
 0x10c   :  { %v8702_v39 = vld [vmem:[#allocation2 + $0x74c] sm:$0xf]  ;;  %v6502_v55 = vld [vmem:[#allocation2 + $0x638] sm:$0xf0] }
 0x10d   :  { %2073 = vmatpush.bf16.msra.mxu1 %v5865_v7  ;;  %2086 = vmatpush.bf16.msra.mxu2 %v5993_v8  ;;  %v8678_v7 = vld [vmem:[#allocation2 + $0x68c] sm:$0xf]  ;;  %v6550_v8 = vld [vmem:[#allocation2 + $0x698] sm:$0xf0] }
 0x10e   :  { %2099 = vmatpush.bf16.msra.mxu3 %v6121_v13  ;;  %v6553_v11 = vor.u32 %v8678_v7, %v6550_v8  ;;  %v6278_v13 = vld [vmem:[#allocation2 + $0x478] sm:$0xf0]  ;;  %v8602_v47 = vld [vmem:[#allocation2 + $0x42c] sm:$0xf] }
 0x10f   :  { %2061 = vmatpush.bf16.msra.mxu0 %v5721_v25  ;;  %v9568_v10 = vpop.f32.mrf.mxu0  ;;  %v6662_v25 = vld [vmem:[#allocation2 + $0x778] sm:$0xf0]  ;;  %v6281_v26 = vor.u32 %v8610_v12, %v6278_v13  ;;  %v8666_v54 = vld [vmem:[#allocation2 + $0x62c] sm:$0xf]  ;;  %v6249_v59 = vor.u32 %v8602_v47, %v6246_v48  ;;  %v8756_v12 = vld [vmem:[#allocation5 + $0xf4] sm:$0xf0] }
 0x110   :  { %v6630_v57 = vld [vmem:[#allocation2 + $0x738] sm:$0xf0]  ;;  %v8598_v60 = vld [vmem:[#allocation2 + $0x40c] sm:$0xf]  ;;  %v1856_v22 = vadd.f32 %v9568_v10, %v427_v58  ;;  %v6844_v10 = vld [vmem:[#allocation5 + $0xe0] sm:$0xf] }
 0x111   :  { %2074 = vmatpush.bf16.msra.mxu1 %v5849_v29  ;;  %2087 = vmatpush.bf16.msra.mxu2 %v5977_v30  ;;  %v9570_v16 = vpop.f32.mrf.mxu1  ;;  %v8606_v29 = vld [vmem:[#allocation2 + $0x44c] sm:$0xf]  ;;  %v6262_v30 = vld [vmem:[#allocation2 + $0x458] sm:$0xf0]  ;;  %v6756_v47 = vld [vmem:[#allocation5 + $0x30] sm:$0xf] }
 0x112   :  { %2100 = vmatpush.bf16.msra.mxu3 %v6105_v33  ;;  %2062 = vmatmul.bf16.vlgmr.msra.gmra.mxu0 %v9512_v20  ;;  %v6678_v20 = vld [vmem:[#allocation2 + $0x798] sm:$0xf0]  ;;  %v6665_v33 = vor.u32 %v8706_v24, %v6662_v25  ;;  %v8694_v7 = vld [vmem:[#allocation2 + $0x70c] sm:$0xf]  ;;  %v1869_v23 = vadd.f32 %v9570_v16, %v1856_v22  ;;  %v6780_v24 = vld [vmem:[#allocation5 + $0x60] sm:$0xf] }
 0x113   :  { %2106 = vmatpush.bf16.msrb.mxu0 %v6345_v34  ;;  %v6681_v17 = vor.u32 %v8710_v9, %v6678_v20  ;;  %v6390_v34 = vld [vmem:[#allocation2 + $0x558] sm:$0xf0]  ;;  %v6788_v20 = vld [vmem:[#allocation5 + $0x70] sm:$0xf]  ;;  %v8738_v25 = vld [vmem:[#allocation5 + $0x64] sm:$0xf0] }
 0x114   :  { %2088 = vmatmul.bf16.vlgmr.msra.gmra.mxu2 %v9504_v4  ;;  %2075 = vmatmul.bf16.vlgmr.msra.gmra.mxu1 %v9515_v21  ;;  %v8646_v4 = vld [vmem:[#allocation2 + $0x58c] sm:$0xf]  ;;  %v6393_v45 = vor.u32 %v8638_v31, %v6390_v34  ;;  %v6614_v9 = vld [vmem:[#allocation2 + $0x718] sm:$0xf0]  ;;  %v8736_v31 = vld [vmem:[#allocation5 + $0x54] sm:$0xf0] }
 0x115   :  { %2119 = vmatpush.bf16.msrb.mxu1 %v6473_v35  ;;  %2132 = vmatpush.bf16.msrb.mxu2 %v6601_v36  ;;  %v6425_v21 = vor.u32 %v8646_v4, %v6422_v5  ;;  %v8670_v35 = vld [vmem:[#allocation2 + $0x64c] sm:$0xf]  ;;  %v6518_v36 = vld [vmem:[#allocation2 + $0x658] sm:$0xf0]  ;;  %v6836_v16 = vld [vmem:[#allocation5 + $0xd0] sm:$0xf] }
 0x116   :  { %2145 = vmatpush.bf16.msrb.mxu3 %v6729_v15  ;;  %v6265_v15 = vor.u32 %v8606_v29, %v6262_v30  ;;  %v6521_v46 = vor.u32 %v8670_v35, %v6518_v36  ;;  %v6486_v5 = vld [vmem:[#allocation2 + $0x618] sm:$0xf0]  ;;  %v6772_v30 = vld [vmem:[#allocation5 + $0x50] sm:$0xf]  ;;  %v6748_v58 = vld [vmem:[#allocation5 + $0x20] sm:$0xf] }
 0x117   :  { %2101 = vmatmul.bf16.vlgmr.msra.gmra.mxu3 %v9509_v6  ;;  %2107 = vmatpush.bf16.msrb.mxu0 %v6329_v49  ;;  %v6297_v6 = vor.u32 %v8614_v1, %v6294_v2  ;;  %v9572_v32 = vpop.f32.mrf.mxu2  ;;  %v1857_v43 = vpop.f32.mrf.mxu0  ;;  %v8634_v49 = vld [vmem:[#allocation2 + $0x52c] sm:$0xf]  ;;  %v6358_v1 = vld [vmem:[#allocation2 + $0x518] sm:$0xf0]  ;;  %v6773_v34 = vor.u32 %v8736_v31, %v6772_v30  ;;  %v8755_v30 = vld [vmem:[#allocation5 + $0xf4] sm:$0xf] }
 0x118   :  { %v6377_v61 = vor.u32 %v8634_v49, %v6374_v53  ;;  %v6854_v31 = vld [vmem:[#allocation5 + $0xf8] sm:$0xf0] }
 0x119   :  { %2120 = vmatpush.bf16.msrb.mxu1 %v6457_v50  ;;  %2133 = vmatpush.bf16.msrb.mxu2 %v6585_v51  ;;  %v1870_v50 = vpop.f32.mrf.mxu1  ;;  %v6649_v51 = vor.u32 %v8702_v39, %v6646_v40  ;;  %v8734_v39 = vld [vmem:[#allocation5 + $0x44] sm:$0xf0] }
 0x11a   :  { %2146 = vmatpush.bf16.msrb.mxu3 %v6713_v56  ;;  %v9574_v37 = vpop.f32.mrf.mxu3  ;;  %v8698_v56 = vld [vmem:[#allocation2 + $0x72c] sm:$0xf]  ;;  %v8750_v40 = vld [vmem:[#allocation5 + $0xc4] sm:$0xf0]  ;;  %v6820_v50 = vld [vmem:[#allocation5 + $0xb0] sm:$0xf] }
 0x11b   :  { %2108 = vmatpush.bf16.msrb.mxu0 %v6313_v62  ;;  %v6505_v62 = vor.u32 %v8666_v54, %v6502_v55  ;;  %v6633_v4 = vor.u32 %v8698_v56, %v6630_v57  ;;  %v6908_v54 = vld [vmem:[#allocation5 + $0x160] sm:$0xf]  ;;  %v8770_v55 = vld [vmem:[#allocation5 + $0x164] sm:$0xf0] }
 0x11d   :  { %2121 = vmatpush.bf16.msrb.mxu1 %v6441_v63  ;;  %2134 = vmatpush.bf16.msrb.mxu2 %v6569_v0  ;;  %v6230_v63 = vld [vmem:[#allocation2 + $0x418] sm:$0xf0]  ;;  %v8630_v0 = vld [vmem:[#allocation2 + $0x50c] sm:$0xf] }
 0x11e   :  { %2147 = vmatpush.bf16.msrb.mxu3 %v6697_v3  ;;  %v8662_v3 = vld [vmem:[#allocation2 + $0x60c] sm:$0xf]  ;;  %v6361_v13 = vor.u32 %v8630_v0, %v6358_v1 }
 0x11f   :  { %2109 = vmatpush.bf16.msrb.mxu0 %v6297_v6  ;;  %v1883_v2 = vpop.f32.mrf.mxu2  ;;  %v8740_v6 = vld [vmem:[#allocation5 + $0x74] sm:$0xf0]  ;;  %v6489_v14 = vor.u32 %v8662_v3, %v6486_v5  ;;  %v6900_v3 = vld [vmem:[#allocation5 + $0x150] sm:$0xf] }
 0x120   :  { %v6789_v18 = vor.u32 %v8740_v6, %v6788_v20  ;;  %v8768_v5 = vld [vmem:[#allocation5 + $0x154] sm:$0xf0]  ;;  %v6804_v6 = vld [vmem:[#allocation5 + $0x90] sm:$0xf] }
 0x121   :  { %2122 = vmatpush.bf16.msrb.mxu1 %v6425_v21  ;;  %2135 = vmatpush.bf16.msrb.mxu2 %v6553_v11  ;;  %v6233_v21 = vor.u32 %v8598_v60, %v6230_v63  ;;  %v6852_v11 = vld [vmem:[#allocation5 + $0xf0] sm:$0xf]  ;;  %v6909_v60 = vor.u32 %v8770_v55, %v6908_v54  ;;  %v8746_v63 = vld [vmem:[#allocation5 + $0xa4] sm:$0xf0]  ;;  %v6901_v20 = vor.u32 %v8768_v5, %v6900_v3  ;;  %v8751_v54 = vld [vmem:[#allocation5 + $0xd4] sm:$0xf] }
 0x122   :  { %2148 = vmatpush.bf16.msrb.mxu3 %v6681_v17  ;;  %v1896_v8 = vpop.f32.mrf.mxu3  ;;  %v6617_v17 = vor.u32 %v8694_v7, %v6614_v9  ;;  %v6853_v19 = vor.u32 %v8756_v12, %v6852_v11  ;;  %v8728_v9 = vld [vmem:[#allocation5 + $0x14] sm:$0xf0]  ;;  %v2158_v11 = vmul.f32 0.2, %v9562_v52  ;;  %v6838_v55 = vld [vmem:[#allocation5 + $0xd8] sm:$0xf0] }
 0x123   :  { %2110 = vmatpush.bf16.msrb.mxu0 %v6281_v26  ;;  %v8754_v26 = vld [vmem:[#allocation5 + $0xe4] sm:$0xf0]  ;;  %v6740_v8 = vld [vmem:[#allocation5 + $0x10] sm:$0xf]  ;;  %v6918_v3 = vld [vmem:[#allocation5 + $0x178] sm:$0xf0] }
 0x124   :  { %v6845_v29 = vor.u32 %v8754_v26, %v6844_v10  ;;  %v8742_v26 = vld [vmem:[#allocation5 + $0x84] sm:$0xf0] }
 0x125   :  { %2123 = vmatpush.bf16.msrb.mxu1 %v6409_v27  ;;  %2136 = vmatpush.bf16.msrb.mxu2 %v6537_v28  ;;  %v6781_v27 = vor.u32 %v8738_v25, %v6780_v24  ;;  %v1882_v28 = vadd.f32 %v9572_v32, %v1869_v23  ;;  %v6828_v32 = vld [vmem:[#allocation5 + $0xc0] sm:$0xf]  ;;  %v8726_v23 = vld [vmem:[#allocation5 + $0x4] sm:$0xf0] }
 0x126   :  { %2149 = vmatpush.bf16.msrb.mxu3 %v6665_v33  ;;  %v8752_v33 = vld [vmem:[#allocation5 + $0xd4] sm:$0xf0]  ;;  %v6796_v24 = vld [vmem:[#allocation5 + $0x80] sm:$0xf] }
 0x127   :  { %2111 = vmatpush.bf16.msrb.mxu0 %v6265_v15  ;;  %v1895_v35 = vadd.f32 %v9574_v37, %v1882_v28  ;;  %v6837_v36 = vor.u32 %v8752_v33, %v6836_v16  ;;  %v6790_v28 = vld [vmem:[#allocation5 + $0x78] sm:$0xf0] }
 0x129   :  { %2124 = vmatpush.bf16.msrb.mxu1 %v6393_v45  ;;  %2137 = vmatpush.bf16.msrb.mxu2 %v6521_v46  ;;  %v8772_v45 = vld [vmem:[#allocation5 + $0x174] sm:$0xf0] }
 0x12a   :  { %2150 = vmatpush.bf16.msrb.mxu3 %v6649_v51  ;;  %v8748_v51 = vld [vmem:[#allocation5 + $0xb4] sm:$0xf0] }
 0x12b   :  { %2112 = vmatpush.bf16.msrb.mxu0 %v6249_v59  ;;  %v6821_v56 = vor.u32 %v8748_v51, %v6820_v50  ;;  %v8730_v59 = vld [vmem:[#allocation5 + $0x24] sm:$0xf0]  ;;  %v8760_v50 = vld [vmem:[#allocation5 + $0x114] sm:$0xf0] }
 0x12c   :  { %v6749_v1 = vor.u32 %v8730_v59, %v6748_v58  ;;  %v8758_v58 = vld [vmem:[#allocation5 + $0x104] sm:$0xf0] }
 0x12d   :  { %2125 = vmatpush.bf16.msrb.mxu1 %v6377_v61  ;;  %2138 = vmatpush.bf16.msrb.mxu2 %v6505_v62  ;;  %v6812_v62 = vld [vmem:[#allocation5 + $0xa0] sm:$0xf] }
 0x12e   :  { %2151 = vmatpush.bf16.msrb.mxu3 %v6633_v4  ;;  %v6813_v7 = vor.u32 %v8746_v63, %v6812_v62  ;;  %v6766_v62 = vld [vmem:[#allocation5 + $0x48] sm:$0xf0]  ;;  %v8749_v63 = vld [vmem:[#allocation5 + $0xc4] sm:$0xf] }
 0x12f   :  { %2113 = vmatpush.bf16.msrb.mxu0 %v6233_v21  ;;  %v1907_v43 = vpop.f32.mrf.mxu0  ;;  %v8744_v21 = vld [vmem:[#allocation5 + $0x94] sm:$0xf0] }
 0x130   :  { %v1908_v46 = vadd.f32 %v1907_v43, %v1895_v35  ;;  %v8764_v35 = vld [vmem:[#allocation5 + $0x134] sm:$0xf0]  ;;  %v6782_v43 = vld [vmem:[#allocation5 + $0x68] sm:$0xf0] }
 0x131   :  { %2126 = vmatpush.bf16.msrb.mxu1 %v6361_v13  ;;  %2139 = vmatpush.bf16.msrb.mxu2 %v6489_v14  ;;  %v1920_v48 = vpop.f32.mrf.mxu1  ;;  %v6741_v13 = vor.u32 %v8728_v9, %v6740_v8  ;;  %v6892_v14 = vld [vmem:[#allocation5 + $0x140] sm:$0xf]  ;;  %v6758_v8 = vld [vmem:[#allocation5 + $0x38] sm:$0xf0] }
 0x132   :  { %2152 = vmatpush.bf16.msrb.mxu3 %v6617_v17  ;;  %2114 = vmatmul.bf16.vlgmr.msrb.gmra.mxu0 %v9527_v41  ;;  %v6764_v41 = vld [vmem:[#allocation5 + $0x40] sm:$0xf]  ;;  %v1921_v37 = vadd.f32 %v1920_v48, %v1908_v46  ;;  %v8766_v17 = vld [vmem:[#allocation5 + $0x144] sm:$0xf0] }
 0x133   :  { %2560 = vmatpush.bf16.msra.mxu0 %v6789_v18  ;;  %v6765_v15 = vor.u32 %v8734_v39, %v6764_v41  ;;  %v6805_v18 = vor.u32 %v8744_v21, %v6804_v6  ;;  %v6893_v10 = vor.u32 %v8766_v17, %v6892_v14  ;;  %v6797_v41 = vor.u32 %v8742_v26, %v6796_v24  ;;  %v6876_v46 = vld [vmem:[#allocation5 + $0x120] sm:$0xf]  ;;  %v6822_v6 = vld [vmem:[#allocation5 + $0xb8] sm:$0xf0]  ;;  %v8729_v17 = vld [vmem:[#allocation5 + $0x24] sm:$0xf] }
 0x134   :  { %2127 = vmatmul.bf16.vlgmr.msrb.gmra.mxu1 %v9531_v44  ;;  %2140 = vmatmul.bf16.vlgmr.msrb.gmra.mxu2 %v9525_v38  ;;  %v6916_v44 = vld [vmem:[#allocation5 + $0x170] sm:$0xf]  ;;  %v6829_v38 = vor.u32 %v8750_v40, %v6828_v32  ;;  %v6857_v40 = vor.u32 %v8755_v30, %v6854_v31  ;;  %v6814_v24 = vld [vmem:[#allocation5 + $0xa8] sm:$0xf0]  ;;  %v8727_v30 = vld [vmem:[#allocation5 + $0x14] sm:$0xf] }
 0x135   :  { %2573 = vmatpush.bf16.msra.mxu1 %v6853_v19  ;;  %2153 = vmatmul.bf16.vlgmr.msrb.gmra.mxu3 %v9529_v42  ;;  %v8732_v42 = vld [vmem:[#allocation5 + $0x34] sm:$0xf0]  ;;  %v6917_v49 = vor.u32 %v8772_v45, %v6916_v44  ;;  %v6732_v19 = vld [vmem:[#allocation5] sm:$0xf]  ;;  %v8753_v44 = vld [vmem:[#allocation5 + $0xe4] sm:$0xf] }
 0x136   :  { %v6757_v53 = vor.u32 %v8732_v42, %v6756_v47  ;;  %v6733_v33 = vor.u32 %v8726_v23, %v6732_v19  ;;  %v6846_v45 = vld [vmem:[#allocation5 + $0xe8] sm:$0xf0]  ;;  %v8762_v47 = vld [vmem:[#allocation5 + $0x124] sm:$0xf0]  ;;  %v8745_v23 = vld [vmem:[#allocation5 + $0xa4] sm:$0xf] }
 0x137   :  { %2561 = vmatpush.bf16.msra.mxu0 %v6781_v27  ;;  %2586 = vmatpush.bf16.msra.mxu2 %v6917_v49  ;;  %v1933_v57 = vpop.f32.mrf.mxu2  ;;  %v1909_v4 = vpop.f32.mrf.mxu0  ;;  %v8739_v27 = vld [vmem:[#allocation5 + $0x74] sm:$0xf]  ;;  %v6877_v48 = vor.u32 %v8762_v47, %v6876_v46  ;;  %v6868_v49 = vld [vmem:[#allocation5 + $0x110] sm:$0xf]  ;;  %v6849_v51 = vor.u32 %v8753_v44, %v6846_v45  ;;  %v6742_v31 = vld [vmem:[#allocation5 + $0x18] sm:$0xf0] }
 0x138   :  { %v1934_v61 = vadd.f32 %v1933_v57, %v1921_v37  ;;  %v6793_v39 = vor.u32 %v8739_v27, %v6790_v28  ;;  %v8735_v37 = vld [vmem:[#allocation5 + $0x54] sm:$0xf]  ;;  %v6860_v57 = vld [vmem:[#allocation5 + $0x100] sm:$0xf]  ;;  %v6902_v28 = vld [vmem:[#allocation5 + $0x158] sm:$0xf0] }
 0x139   :  { %2574 = vmatpush.bf16.msra.mxu1 %v6845_v29  ;;  %v1922_v22 = vpop.f32.mrf.mxu1  ;;  %v8771_v4 = vld [vmem:[#allocation5 + $0x174] sm:$0xf]  ;;  %v8725_v44 = vld [vmem:[#allocation5 + $0x4] sm:$0xf]  ;;  %v6734_v45 = vld [vmem:[#allocation5 + $0x8] sm:$0xf0] }
 0x13a   :  { %v1946_v0 = vpop.f32.mrf.mxu3  ;;  %v6921_v22 = vor.u32 %v8771_v4, %v6918_v3  ;;  %v8767_v27 = vld [vmem:[#allocation5 + $0x154] sm:$0xf]  ;;  %v8741_v47 = vld [vmem:[#allocation5 + $0x84] sm:$0xf]  ;;  %v6862_v3 = vld [vmem:[#allocation5 + $0x108] sm:$0xf0] }
 0x13b   :  { %2562 = vmatpush.bf16.msra.mxu0 %v6773_v34  ;;  %2587 = vmatpush.bf16.msra.mxu2 %v6909_v60  ;;  %v1947_v2 = vadd.f32 %v1946_v0, %v1934_v61  ;;  %v6884_v34 = vld [vmem:[#allocation5 + $0x130] sm:$0xf]  ;;  %v6841_v60 = vor.u32 %v8751_v54, %v6838_v55  ;;  %v8733_v61 = vld [vmem:[#allocation5 + $0x44] sm:$0xf]  ;;  %v6830_v0 = vld [vmem:[#allocation5 + $0xc8] sm:$0xf0] }
 0x13c   :  { %v6885_v32 = vor.u32 %v8764_v35, %v6884_v34  ;;  %v6833_v5 = vor.u32 %v8749_v63, %v6830_v0  ;;  %v8743_v34 = vld [vmem:[#allocation5 + $0x94] sm:$0xf]  ;;  %v6806_v35 = vld [vmem:[#allocation5 + $0x98] sm:$0xf0]  ;;  %v8761_v55 = vld [vmem:[#allocation5 + $0x124] sm:$0xf] }
 0x13d   :  { %2575 = vmatpush.bf16.msra.mxu1 %v6837_v36  ;;  %v2159_v12 = vmul.f32 0.2, %v1947_v2  ;;  %v2162_v36 = vmax.f32 %v9562_v52, %v2158_v11  ;;  %v8759_v63 = vld [vmem:[#allocation5 + $0x114] sm:$0xf]  ;;  %v6870_v0 = vld [vmem:[#allocation5 + $0x118] sm:$0xf0] }
 0x13e   :  { %v8757_v4 = vld [vmem:[#allocation5 + $0x104] sm:$0xf] }
 0x13f   :  { %2563 = vmatpush.bf16.msra.mxu0 %v6765_v15  ;;  %2588 = vmatpush.bf16.msra.mxu2 %v6901_v20  ;;  %v1935_v25 = vpop.f32.mrf.mxu2  ;;  %v2163_v16 = vmax.f32 %v1947_v2, %v2159_v12  ;;  %v8737_v15 = vld [vmem:[#allocation5 + $0x64] sm:$0xf]  ;;  %v9589_v42 = vpack.c.bf16 %v2162_v36, %v2162_v36  ;;  %v6769_v2 = vor.u32 %v8733_v61, %v6766_v62  ;;  %v8747_v20 = vld [vmem:[#allocation5 + $0xb4] sm:$0xf] }
 0x140   :  { %v6785_v52 = vor.u32 %v8737_v15, %v6782_v43  ;;  %v8769_v12 = vld [vmem:[#allocation5 + $0x164] sm:$0xf]  ;;  %v6825_v14 = vor.u32 %v8747_v20, %v6822_v6  ;;  %v6894_v15 = vld [vmem:[#allocation5 + $0x148] sm:$0xf0]  ;;  %v6809_v43 = vor.u32 %v8743_v34, %v6806_v35 }
 0x141   :  { %2576 = vmatpush.bf16.msra.mxu1 %v6829_v38  ;;  %v9587_v38 = vpack.c.bf16 %v2163_v16, %v2163_v16 }
 0x142   :  { %v1948_v29 = vpop.f32.mrf.mxu3 }
 0x143   :  { %2564 = vmatpush.bf16.msra.mxu0 %v6757_v53  ;;  %2589 = vmatpush.bf16.msra.mxu2 %v6893_v10  ;;  %v6774_v53 = vld [vmem:[#allocation5 + $0x58] sm:$0xf0]  ;;  %v6817_v29 = vor.u32 %v8745_v23, %v6814_v24 }
 0x144   :  { %v6777_v59 = vor.u32 %v8735_v37, %v6774_v53  ;;  %v6737_v53 = vor.u32 %v8725_v44, %v6734_v45  ;;  %v8787_v45 = vld [vmem:[#allocation5 + $0x1f4] sm:$0xf] }
 0x145   :  { %2577 = vmatpush.bf16.msra.mxu1 %v6821_v56  ;;  %v6869_v56 = vor.u32 %v8760_v50, %v6868_v49  ;;  %v8763_v50 = vld [vmem:[#allocation5 + $0x134] sm:$0xf] }
 0x147   :  { %2565 = vmatpush.bf16.msra.mxu0 %v6749_v1  ;;  %2590 = vmatpush.bf16.msra.mxu2 %v6885_v32  ;;  %v6861_v1 = vor.u32 %v8758_v58, %v6860_v57  ;;  %v6980_v58 = vld [vmem:[#allocation5 + $0x1f0] sm:$0xf] }
 0x149   :  { %2578 = vmatpush.bf16.msra.mxu1 %v6813_v7  ;;  %v8731_v7 = vld [vmem:[#allocation5 + $0x34] sm:$0xf] }
 0x14a   :  { %v6761_v11 = vor.u32 %v8731_v7, %v6758_v8 }
 0x14b   :  { %2566 = vmatpush.bf16.msra.mxu0 %v6741_v13  ;;  %2591 = vmatpush.bf16.msra.mxu2 %v6877_v48  ;;  %v6910_v13 = vld [vmem:[#allocation5 + $0x168] sm:$0xf0] }
 0x14c   :  { %v6913_v19 = vor.u32 %v8769_v12, %v6910_v13  ;;  %v8784_v12 = vld [vmem:[#allocation5 + $0x1d4] sm:$0xf0] }
 0x14d   :  { %2579 = vmatpush.bf16.msra.mxu1 %v6805_v18  ;;  %v6750_v18 = vld [vmem:[#allocation5 + $0x28] sm:$0xf0] }
 0x14e   :  { %v6753_v26 = vor.u32 %v8729_v17, %v6750_v18  ;;  %v6956_v18 = vld [vmem:[#allocation5 + $0x1c0] sm:$0xf] }
 0x14f   :  { %2567 = vmatpush.bf16.msra.mxu0 %v6733_v33  ;;  %2592 = vmatpush.bf16.msra.mxu2 %v6869_v56  ;;  %v1959_v9 = vpop.f32.mrf.mxu0  ;;  %v6905_v33 = vor.u32 %v8767_v27, %v6902_v28  ;;  %v6878_v56 = vld [vmem:[#allocation5 + $0x128] sm:$0xf0] }
 0x151   :  { %2580 = vmatpush.bf16.msra.mxu1 %v6797_v41  ;;  %v1972_v21 = vpop.f32.mrf.mxu1  ;;  %v6745_v41 = vor.u32 %v8727_v30, %v6742_v31  ;;  %v6940_v31 = vld [vmem:[#allocation5 + $0x1a0] sm:$0xf] }
 0x152   :  { %2568 = vmatmul.bf16.vlgmr.msra.gmra.mxu0 %v9589_v42 }
 0x153   :  { %2612 = vmatpush.bf16.msrb.mxu0 %v6793_v39  ;;  %2593 = vmatpush.bf16.msra.mxu2 %v6861_v1  ;;  %v9596_v39 = vld [vmem:[%s9811_s4] sm:$0xf]  ;;  %v6873_v1 = vor.u32 %v8759_v63, %v6870_v0  ;;  %v8779_v0 = vld [vmem:[#allocation5 + $0x1b4] sm:$0xf] }
 0x154   :  { %2581 = vmatmul.bf16.vlgmr.msra.gmra.mxu1 %v9587_v38  ;;  %v428_v32 = vperm.slane %v9596_v39, 2 }
 0x155   :  { %2625 = vmatpush.bf16.msrb.mxu1 %v6857_v40  ;;  %v8765_v40 = vld [vmem:[#allocation5 + $0x144] sm:$0xf] }
 0x156   :  { %v6897_v46 = vor.u32 %v8765_v40, %v6894_v15  ;;  %v1960_v37 = vadd.f32 %v1959_v9, %v428_v32  ;;  %v6972_v9 = vld [vmem:[#allocation5 + $0x1e0] sm:$0xf]  ;;  %v8776_v32 = vld [vmem:[#allocation5 + $0x194] sm:$0xf0] }
 0x157   :  { %2613 = vmatpush.bf16.msrb.mxu0 %v6785_v52  ;;  %2638 = vmatpush.bf16.msrb.mxu2 %v6921_v22  ;;  %v1985_v25 = vpop.f32.mrf.mxu2  ;;  %v1961_v16 = vpop.f32.mrf.mxu0  ;;  %v6798_v52 = vld [vmem:[#allocation5 + $0x88] sm:$0xf0]  ;;  %v8786_v22 = vld [vmem:[#allocation5 + $0x1e4] sm:$0xf0]  ;;  %v6924_v15 = vld [vmem:[#allocation5 + $0x180] sm:$0xf] }
 0x158   :  { %v6801_v57 = vor.u32 %v8741_v47, %v6798_v52  ;;  %v1973_v62 = vadd.f32 %v1972_v21, %v1960_v37  ;;  %v6973_v21 = vor.u32 %v8786_v22, %v6972_v9  ;;  %v8778_v16 = vld [vmem:[#allocation5 + $0x1a4] sm:$0xf0]  ;;  %v8775_v9 = vld [vmem:[#allocation5 + $0x194] sm:$0xf]  ;;  %v6934_v22 = vld [vmem:[#allocation5 + $0x198] sm:$0xf0] }
 0x159   :  { %2626 = vmatpush.bf16.msrb.mxu1 %v6849_v51  ;;  %v1974_v36 = vpop.f32.mrf.mxu1  ;;  %v6886_v51 = vld [vmem:[#allocation5 + $0x138] sm:$0xf0] }
 0x15a   :  { %v1998_v10 = vpop.f32.mrf.mxu3  ;;  %v6889_v54 = vor.u32 %v8763_v50, %v6886_v51  ;;  %v6941_v36 = vor.u32 %v8778_v16, %v6940_v31  ;;  %v6974_v50 = vld [vmem:[#allocation5 + $0x1e8] sm:$0xf0]  ;;  %v2234_v31 = vld [vmem:[%s9812_s25] sm:$0x3] }
 0x15b   :  { %2614 = vmatpush.bf16.msrb.mxu0 %v6777_v59  ;;  %2639 = vmatpush.bf16.msrb.mxu2 %v6913_v19  ;;  %v8788_v59 = vld [vmem:[#allocation5 + $0x1f4] sm:$0xf0]  ;;  %v8782_v19 = vld [vmem:[#allocation5 + $0x1c4] sm:$0xf0]  ;;  %v2236_v16 = vperm.slane %v2234_v31, 0 }
 0x15c   :  { %v6981_v61 = vor.u32 %v8788_v59, %v6980_v58  ;;  %v6957_v23 = vor.u32 %v8782_v19, %v6956_v18  ;;  %v8781_v59 = vld [vmem:[#allocation5 + $0x1c4] sm:$0xf] }
 0x15d   :  { %2627 = vmatpush.bf16.msrb.mxu1 %v6841_v60  ;;  %v6881_v60 = vor.u32 %v8761_v55, %v6878_v56 }
 0x15e   :  { %2599 = vmatpush.bf16.msra.mxu3 %v6981_v61 }
 0x15f   :  { %2615 = vmatpush.bf16.msrb.mxu0 %v6769_v2  ;;  %2640 = vmatpush.bf16.msrb.mxu2 %v6905_v33  ;;  %v1987_v48 = vpop.f32.mrf.mxu2  ;;  %v1986_v2 = vadd.f32 %v1985_v25, %v1973_v62  ;;  %v429_v62 = vperm.slane %v9596_v39, 3  ;;  %v6926_v39 = vld [vmem:[#allocation5 + $0x188] sm:$0xf0] }
 0x161   :  { %2628 = vmatpush.bf16.msrb.mxu1 %v6833_v5  ;;  %v6865_v5 = vor.u32 %v8757_v4, %v6862_v3  ;;  %v1999_v7 = vadd.f32 %v1998_v10, %v1986_v2  ;;  %v6948_v10 = vld [vmem:[#allocation5 + $0x1b0] sm:$0xf]  ;;  %v8777_v3 = vld [vmem:[#allocation5 + $0x1a4] sm:$0xf] }
 0x162   :  { %v2000_v49 = vpop.f32.mrf.mxu3  ;;  %2600 = vmatpush.bf16.msra.mxu3 %v6973_v21 }
 0x163   :  { %2616 = vmatpush.bf16.msrb.mxu0 %v6761_v11  ;;  %2641 = vmatpush.bf16.msrb.mxu2 %v6897_v46  ;;  %v6964_v11 = vld [vmem:[#allocation5 + $0x1d0] sm:$0xf]  ;;  %v6982_v46 = vld [vmem:[#allocation5 + $0x1f8] sm:$0xf0]  ;;  %v8785_v49 = vld [vmem:[#allocation5 + $0x1e4] sm:$0xf] }
 0x164   :  { %v6965_v13 = vor.u32 %v8784_v12, %v6964_v11  ;;  %v6985_v47 = vor.u32 %v8787_v45, %v6982_v46  ;;  %v6977_v51 = vor.u32 %v8785_v49, %v6974_v50  ;;  %v8773_v11 = vld [vmem:[#allocation5 + $0x184] sm:$0xf]  ;;  %v8795_v49 = vld [vmem:[#allocation7 + $0x30] sm:$0xff] }
 0x165   :  { %2629 = vmatpush.bf16.msrb.mxu1 %v6825_v14  ;;  %v6929_v12 = vor.u32 %v8773_v11, %v6926_v39  ;;  %v8803_v50 = vld [vmem:[#allocation7 + $0x70] sm:$0xff] }
 0x166   :  { %2601 = vmatpush.bf16.msra.mxu3 %v6965_v13 }
 0x167   :  { %2617 = vmatpush.bf16.msrb.mxu0 %v6753_v26  ;;  %2642 = vmatpush.bf16.msrb.mxu2 %v6889_v54  ;;  %v8780_v26 = vld [vmem:[#allocation5 + $0x1b4] sm:$0xf0]  ;;  %v6966_v54 = vld [vmem:[#allocation5 + $0x1d8] sm:$0xf0] }
 0x169   :  { %2630 = vmatpush.bf16.msrb.mxu1 %v6817_v29  ;;  %v6949_v29 = vor.u32 %v8780_v26, %v6948_v10 }
 0x16a   :  { %2602 = vmatpush.bf16.msra.mxu3 %v6957_v23 }
 0x16b   :  { %2618 = vmatpush.bf16.msrb.mxu0 %v6745_v41  ;;  %2643 = vmatpush.bf16.msrb.mxu2 %v6881_v60  ;;  %v6932_v41 = vld [vmem:[#allocation5 + $0x190] sm:$0xf]  ;;  %v6958_v60 = vld [vmem:[#allocation5 + $0x1c8] sm:$0xf0] }
 0x16c   :  { %v6933_v40 = vor.u32 %v8776_v32, %v6932_v41  ;;  %v6961_v61 = vor.u32 %v8781_v59, %v6958_v60  ;;  %v8790_v59 = vld [vmem:[#allocation7 + $0x8] sm:$0xff] }
 0x16d   :  { %2631 = vmatpush.bf16.msrb.mxu1 %v6809_v43  ;;  %v8774_v43 = vld [vmem:[#allocation5 + $0x184] sm:$0xf0] }
 0x16e   :  { %2603 = vmatpush.bf16.msra.mxu3 %v6949_v29  ;;  %v6925_v44 = vor.u32 %v8774_v43, %v6924_v15  ;;  %v8802_v60 = vld [vmem:[#allocation7 + $0x68] sm:$0xff] }
 0x16f   :  { %2619 = vmatpush.bf16.msrb.mxu0 %v6737_v53  ;;  %2644 = vmatpush.bf16.msrb.mxu2 %v6873_v1  ;;  %v2011_v8 = vpop.f32.mrf.mxu0  ;;  %v8783_v53 = vld [vmem:[#allocation5 + $0x1d4] sm:$0xf]  ;;  %v6950_v1 = vld [vmem:[#allocation5 + $0x1b8] sm:$0xf0] }
 0x170   :  { %v2012_v20 = vadd.f32 %v2011_v8, %v1999_v7  ;;  %v6969_v56 = vor.u32 %v8783_v53, %v6966_v54  ;;  %v6953_v4 = vor.u32 %v8779_v0, %v6950_v1  ;;  %v8793_v53 = vld [vmem:[#allocation7 + $0x20] sm:$0xff]  ;;  %v8792_v54 = vld [vmem:[#allocation7 + $0x18] sm:$0xff]  ;;  %v8799_v0 = vld [vmem:[#allocation7 + $0x50] sm:$0xff] }
 0x171   :  { %2632 = vmatpush.bf16.msrb.mxu1 %v6801_v57  ;;  %v2024_v6 = vpop.f32.mrf.mxu1  ;;  %v8798_v1 = vld [vmem:[#allocation7 + $0x48] sm:$0xff] }
 0x172   :  { %2620 = vmatmul.bf16.vlgmr.msrb.gmra.mxu0 %v9589_v42  ;;  %v2025_v42 = vadd.f32 %v2024_v6, %v2012_v20  ;;  %2604 = vmatpush.bf16.msra.mxu3 %v6941_v36  ;;  %v6937_v6 = vor.u32 %v8775_v9, %v6934_v22 }
 0x173   :  { %2645 = vmatpush.bf16.msrb.mxu2 %v6865_v5  ;;  %v6942_v5 = vld [vmem:[#allocation5 + $0x1a8] sm:$0xf0] }
 0x174   :  { %2633 = vmatmul.bf16.vlgmr.msrb.gmra.mxu1 %v9587_v38  ;;  %v6945_v8 = vor.u32 %v8777_v3, %v6942_v5  ;;  %v8811_v3 = vld [vmem:[%s9781_s7 + $0x30] sm:$0xff] }
 0x176   :  { %2605 = vmatpush.bf16.msra.mxu3 %v6933_v40  ;;  %v2237_v40 = vperm.slane %v2234_v31, 1 }
 0x177   :  { %v2037_v14 = vpop.f32.mrf.mxu2  ;;  %v2013_v25 = vpop.f32.mrf.mxu0 }
 0x178   :  { %v2038_v17 = vadd.f32 %v2037_v14, %v2025_v42 }
 0x179   :  { %v2026_v27 = vpop.f32.mrf.mxu1 }
 0x17a   :  { %v2050_v38 = vpop.f32.mrf.mxu3  ;;  %2606 = vmatpush.bf16.msra.mxu3 %v6925_v44 }
 0x17b   :  { %v2051_v24 = vadd.f32 %v2050_v38, %v2038_v17 }
 0x17d   :  { %v2160_v28 = vmul.f32 0.2, %v2051_v24 }
 0x17e   :  { %2651 = vmatpush.bf16.msrb.mxu3 %v6985_v47 }
 0x17f   :  { %v2164_v30 = vmax.f32 %v2051_v24, %v2160_v28  ;;  %v2039_v33 = vpop.f32.mrf.mxu2 }
 0x181   :  { %v2168_v34 = vpack.c.bf16 %v2164_v30, %v2164_v30 }
 0x182   :  { %v2052_v35 = vpop.f32.mrf.mxu3  ;;  %2652 = vmatpush.bf16.msrb.mxu3 %v6977_v51  ;;  %v8794_v51 = vld [vmem:[#allocation7 + $0x28] sm:$0xff] }
 0x183   :  { %2594 = vmatmul.bf16.vlgmr.msra.gmra.mxu2 %v2168_v34 }
 0x186   :  { %2653 = vmatpush.bf16.msrb.mxu3 %v6969_v56  ;;  %v8791_v56 = vld [vmem:[#allocation7 + $0x10] sm:$0xff] }
 0x18a   :  { %2654 = vmatpush.bf16.msrb.mxu3 %v6961_v61  ;;  %v8789_v61 = vld [vmem:[#allocation7] sm:$0xff] }
 0x18e   :  { %2655 = vmatpush.bf16.msrb.mxu3 %v6953_v4  ;;  %v8812_v4 = vld [vmem:[%s9781_s7 + $0x38] sm:$0xff] }
 0x18f   :  { %v2063_v52 = vpop.f32.mrf.mxu0  ;;  %2899 = vmatpush.bf16.msra.mxu2 %v8812_v4 }
 0x190   :  { %v2064_v7 = vadd.f32 %v2063_v52, %v429_v62  ;;  %v8796_v52 = vld [vmem:[#allocation7 + $0x38] sm:$0xff]  ;;  %v8801_v62 = vld [vmem:[#allocation7 + $0x60] sm:$0xff] }
 0x191   :  { %v2076_v48 = vpop.f32.mrf.mxu1  ;;  %2802 = vmatpush.bf16.msra.mxu0 %v8796_v52  ;;  %v8817_v52 = vld [vmem:[%s9785_s11] sm:$0xff] }
 0x192   :  { %v2077_v20 = vadd.f32 %v2076_v48, %v2064_v7  ;;  %2656 = vmatpush.bf16.msrb.mxu3 %v6945_v8  ;;  %v8804_v48 = vld [vmem:[#allocation7 + $0x78] sm:$0xff] }
 0x193   :  { %2646 = vmatmul.bf16.vlgmr.msrb.gmra.mxu2 %v2168_v34  ;;  %2815 = vmatpush.bf16.msra.mxu1 %v8804_v48  ;;  %v8822_v48 = vld [vmem:[%s9787_s13 + $0x18] sm:$0xff] }
 0x194   :  { %2900 = vmatpush.bf16.msra.mxu2 %v8811_v3 }
 0x195   :  { %2803 = vmatpush.bf16.msra.mxu0 %v8795_v49  ;;  %v8821_v49 = vld [vmem:[%s9787_s13 + $0x10] sm:$0xff] }
 0x196   :  { %2657 = vmatpush.bf16.msrb.mxu3 %v6937_v6 }
 0x197   :  { %v2089_v37 = vpop.f32.mrf.mxu2  ;;  %v2065_v57 = vpop.f32.mrf.mxu0  ;;  %2816 = vmatpush.bf16.msra.mxu1 %v8803_v50  ;;  %v9176_v50 = vld [vmem:[%s9784_s10] ss:$0 sm:$0xff] }
 0x198   :  { %v2090_v21 = vadd.f32 %v2089_v37, %v2077_v20 }
 0x199   :  { %v2078_v58 = vpop.f32.mrf.mxu1  ;;  %2804 = vmatpush.bf16.msra.mxu0 %v8794_v51 }
 0x19a   :  { %v2102_v55 = vpop.f32.mrf.mxu3  ;;  %2658 = vmatpush.bf16.msrb.mxu3 %v6929_v12 }
 0x19b   :  { %v2103_v42 = vadd.f32 %v2102_v55, %v2090_v21  ;;  %2817 = vmatpush.bf16.msra.mxu1 %v8802_v60 }
 0x19d   :  { %2805 = vmatpush.bf16.msra.mxu0 %v8793_v53 }
 0x19f   :  { %v2091_v63 = vpop.f32.mrf.mxu2  ;;  %2818 = vmatpush.bf16.msra.mxu1 %v8801_v62  ;;  %v7175_v62 = vld [vmem:[#allocation8 + $0x60] sm:$0xf] }
 0x1a0   :  { %v8800_v63 = vld [vmem:[#allocation7 + $0x58] sm:$0xff] }
 0x1a1   :  { %2806 = vmatpush.bf16.msra.mxu0 %v8792_v54 }
 0x1a2   :  { %v2104_v2 = vpop.f32.mrf.mxu3 }
 0x1a3   :  { %2819 = vmatpush.bf16.msra.mxu1 %v8800_v63  ;;  %v8797_v2 = vld [vmem:[#allocation7 + $0x40] sm:$0xff]  ;;  %v8836_v63 = vld [vmem:[#allocation8 + $0x64] sm:$0xf0] }
 0x1a4   :  { %v7176_v4 = vor.u32 %v8836_v63, %v7175_v62  ;;  %v7433_v62 = vld [vmem:[#allocation10 + $0x1f0] sm:$0xf0] }
 0x1a5   :  { %2807 = vmatpush.bf16.msra.mxu0 %v8791_v56  ;;  %v8819_v56 = vld [vmem:[%s9787_s13] sm:$0xff] }
 0x1a7   :  { %2820 = vmatpush.bf16.msra.mxu1 %v8799_v0 }
 0x1a9   :  { %2808 = vmatpush.bf16.msra.mxu0 %v8790_v59  ;;  %v8837_v59 = vld [vmem:[#allocation8 + $0x74] sm:$0xf] }
 0x1ab   :  { %2821 = vmatpush.bf16.msra.mxu1 %v8798_v1  ;;  %v8835_v1 = vld [vmem:[#allocation8 + $0x64] sm:$0xf] }
 0x1ad   :  { %2809 = vmatpush.bf16.msra.mxu0 %v8789_v61  ;;  %v7185_v61 = vld [vmem:[#allocation8 + $0x78] sm:$0xf0] }
 0x1ae   :  { %v7188_v0 = vor.u32 %v8837_v59, %v7185_v61  ;;  %v8899_v61 = vld [vmem:[#allocation10 + $0x1e4] sm:$0xf] }
 0x1af   :  { %v2115_v13 = vpop.f32.mrf.mxu0  ;;  %2822 = vmatpush.bf16.msra.mxu1 %v8797_v2  ;;  %v7177_v2 = vld [vmem:[#allocation8 + $0x68] sm:$0xf0] }
 0x1b0   :  { %v2116_v17 = vadd.f32 %v2115_v13, %v2103_v42  ;;  %v7180_v3 = vor.u32 %v8835_v1, %v7177_v2  ;;  %v7436_v1 = vor.u32 %v8899_v61, %v7433_v62  ;;  %v7271_v2 = vld [vmem:[#allocation10 + $0xa0] sm:$0xf] }
 0x1b1   :  { %v2128_v14 = vpop.f32.mrf.mxu1  ;;  %3052 = vmatpush.bf16.msrb.mxu0 %v8822_v48  ;;  %v7303_v48 = vld [vmem:[#allocation10 + $0xe0] sm:$0xf] }
 0x1b2   :  { %v2129_v38 = vadd.f32 %v2128_v14, %v2116_v17  ;;  %v8810_v17 = vld [vmem:[%s9781_s7 + $0x28] sm:$0xff]  ;;  %v7335_v61 = vld [vmem:[#allocation10 + $0x120] sm:$0xf] }
 0x1b3   :  { %2901 = vmatpush.bf16.msra.mxu2 %v8810_v17  ;;  %v8829_v17 = vld [vmem:[#allocation8 + $0x34] sm:$0xf] }
 0x1b5   :  { %3053 = vmatpush.bf16.msrb.mxu0 %v8821_v49  ;;  %v8869_v49 = vld [vmem:[#allocation10 + $0xec] sm:$0xf0] }
 0x1b7   :  { %v2141_v18 = vpop.f32.mrf.mxu2  ;;  %v2117_v24 = vpop.f32.mrf.mxu0 }
 0x1b8   :  { %v2142_v19 = vadd.f32 %v2141_v18, %v2129_v38  ;;  %v2154_v23 = vpop.f32.mrf.mxu3  ;;  %v8809_v38 = vld [vmem:[%s9781_s7 + $0x20] sm:$0xff]  ;;  %v8808_v18 = vld [vmem:[%s9781_s7 + $0x18] sm:$0xff] }
 0x1b9   :  { %v2130_v25 = vpop.f32.mrf.mxu1  ;;  %2902 = vmatpush.bf16.msra.mxu2 %v8809_v38  ;;  %v8805_v24 = vld [vmem:[%s9781_s7] sm:$0xff]  ;;  %v7153_v38 = vld [vmem:[#allocation8 + $0x38] sm:$0xf0] }
 0x1ba   :  { %v2155_v10 = vadd.f32 %v2154_v23, %v2142_v19  ;;  %v8807_v19 = vld [vmem:[%s9781_s7 + $0x10] sm:$0xff]  ;;  %v8806_v23 = vld [vmem:[%s9781_s7 + $0x8] sm:$0xff]  ;;  %v8816_v25 = vld [vmem:[%s9783_s9 + $0x18] sm:$0xff]  ;;  %s9814_s7 = sld [smem:[#allocation26_spill]] }
 0x1bc   :  { %v2161_v26 = vmul.f32 0.2, %v2155_v10 }
 0x1bd   :  { %2903 = vmatpush.bf16.msra.mxu2 %v8808_v18 }
 0x1be   :  { %v2165_v27 = vmax.f32 %v2155_v10, %v2161_v26  ;;  %v8815_v10 = vld [vmem:[%s9783_s9 + $0x10] sm:$0xff] }
 0x1bf   :  { %v2143_v28 = vpop.f32.mrf.mxu2 }
 0x1c0   :  { %v2169_v29 = vpack.c.bf16 %v2165_v27, %v2165_v27  ;;  %v2156_v30 = vpop.f32.mrf.mxu3  ;;  %v9174_v28 = vld [vmem:[%s9780_s6] ss:$0 sm:$0xff]  ;;  %s9815_s6 = sld [smem:[#allocation27_spill]] }
 0x1c1   :  { %2904 = vmatpush.bf16.msra.mxu2 %v8807_v19  ;;  %v7156_v19 = vor.u32 %v8829_v17, %v7153_v38  ;;  %v8855_v17 = vld [vmem:[#allocation10 + $0x84] sm:$0xf]  ;;  %v7257_v38 = vld [vmem:[#allocation10 + $0x90] sm:$0xf0] }
 0x1c2   :  { %2607 = vmatmul.bf16.vlgmr.msra.gmra.mxu3 %v2169_v29 }
 0x1c3   :  { %2959 = vmatpush.bf16.msra.mxu3 %v8816_v25  ;;  %v8827_v25 = vld [vmem:[#allocation8 + $0x24] sm:$0xf] }
 0x1c5   :  { %2905 = vmatpush.bf16.msra.mxu2 %v8806_v23  ;;  %v7143_v23 = vld [vmem:[#allocation8 + $0x20] sm:$0xf] }
 0x1c6   :  { %s5693_s18 = sshll.u32 %s9815_s6, 4  ;;  %s5694_s18 = int_to_ptr.hbm [resolvable:$true] %s5693_s18 }
 0x1c7   :  { %2960 = vmatpush.bf16.msra.mxu3 %v8815_v10  ;;  %v7145_v10 = vld [vmem:[#allocation8 + $0x28] sm:$0xf0] }
 0x1c9   :  { %2906 = vmatpush.bf16.msra.mxu2 %v8805_v24  ;;  %v8828_v24 = vld [vmem:[#allocation8 + $0x24] sm:$0xf0] }
 0x1cd   :  { %3179 = vmatpush.bf16.msrb.mxu2 %v7188_v0 }
 0x1cf   :  { %v2569_v33 = vpop.f32.mrf.mxu0 }
 0x1d0   :  { %v2570_v34 = vadd.f32 %v2569_v33, %v2236_v16 }
 0x1d1   :  { %v2582_v35 = vpop.f32.mrf.mxu1  ;;  %3180 = vmatpush.bf16.msrb.mxu2 %v7180_v3  ;;  %v8859_v3 = vld [vmem:[#allocation10 + $0xa4] sm:$0xf] }
 0x1d2   :  { %v2583_v36 = vadd.f32 %v2582_v35, %v2570_v34  ;;  %2659 = vmatmul.bf16.vlgmr.msrb.gmra.mxu3 %v2169_v29 }
 0x1d7   :  { %v2571_v41 = vpop.f32.mrf.mxu0 }
 0x1d8   :  { %v8813_v41 = vld [vmem:[%s9783_s9] sm:$0xff] }
 0x1d9   :  { %v2584_v32 = vpop.f32.mrf.mxu1 }
 0x1da   :  { %v8818_v32 = vld [vmem:[%s9785_s11 + $0x8] sm:$0xff] }
 0x1ef   :  { %v2621_v15 = vpop.f32.mrf.mxu0 }
 0x1f0   :  { %v2622_v43 = vadd.f32 %v2621_v15, %v2237_v40  ;;  %v9175_v40 = vld [vmem:[%s9782_s8] ss:$0 sm:$0xff] }
 0x1f1   :  { %v2634_v44 = vpop.f32.mrf.mxu1 }
 0x1f2   :  { %v2635_v45 = vadd.f32 %v2634_v44, %v2622_v43 }
 0x1f7   :  { %v2623_v46 = vpop.f32.mrf.mxu0 }
 0x1f9   :  { %v2636_v47 = vpop.f32.mrf.mxu1 }
 0x206   :  { %v2595_v37 = vpop.f32.mrf.mxu2 }
 0x207   :  { %v2596_v5 = vadd.f32 %v2595_v37, %v2583_v36  ;;  %v8814_v36 = vld [vmem:[%s9783_s9 + $0x8] sm:$0xff] }
 0x208   :  { %2961 = vmatpush.bf16.msra.mxu3 %v8814_v36  ;;  %v8826_v36 = vld [vmem:[#allocation8 + $0x14] sm:$0xf0] }
 0x20c   :  { %2962 = vmatpush.bf16.msra.mxu3 %v8813_v41  ;;  %v8825_v41 = vld [vmem:[#allocation8 + $0x14] sm:$0xf] }
 0x20e   :  { %v2597_v55 = vpop.f32.mrf.mxu2 }
 0x20f   :  { %v8820_v55 = vld [vmem:[%s9787_s13 + $0x8] sm:$0xff] }
 0x210   :  { %2999 = vmatpush.bf16.msrb.mxu3 %v8818_v32  ;;  %3054 = vmatpush.bf16.msrb.mxu0 %v8820_v55 }
 0x214   :  { %3000 = vmatpush.bf16.msrb.mxu3 %v8817_v52  ;;  %3055 = vmatpush.bf16.msrb.mxu0 %v8819_v56  ;;  %v8863_v56 = vld [vmem:[#allocation10 + $0xc4] sm:$0xf] }
 0x216   :  { %v2647_v57 = vpop.f32.mrf.mxu2 }
 0x217   :  { %v2648_v21 = vadd.f32 %v2647_v57, %v2635_v45  ;;  %v7183_v57 = vld [vmem:[#allocation8 + $0x70] sm:$0xf] }
 0x21e   :  { %v2649_v58 = vpop.f32.mrf.mxu2 }
 0x21f   :  { %v8838_v58 = vld [vmem:[#allocation8 + $0x74] sm:$0xf0] }
 0x220   :  { %v7184_v60 = vor.u32 %v8838_v58, %v7183_v57  ;;  %v7289_v57 = vld [vmem:[#allocation10 + $0xd0] sm:$0xf0]  ;;  %v7431_v58 = vld [vmem:[#allocation10 + $0x1e0] sm:$0xf] }
 0x221   :  { %v7292_v63 = vor.u32 %v8863_v56, %v7289_v57  ;;  %v8845_v56 = vld [vmem:[#allocation10 + $0x2c] sm:$0xf0]  ;;  %v8843_v57 = vld [vmem:[#allocation10 + $0x24] sm:$0xf] }
 0x222   :  { %3166 = vmatpush.bf16.msrb.mxu1 %v7184_v60  ;;  %v8901_v60 = vld [vmem:[#allocation10 + $0x1ec] sm:$0xf0] }
 0x223   :  { %v7432_v0 = vor.u32 %v8901_v60, %v7431_v58  ;;  %v7209_v58 = vld [vmem:[#allocation10 + $0x30] sm:$0xf0] }
 0x226   :  { %3167 = vmatpush.bf16.msrb.mxu1 %v7176_v4  ;;  %v8861_v4 = vld [vmem:[#allocation10 + $0xac] sm:$0xf0] }
 0x245   :  { %v2608_v7 = vpop.f32.mrf.mxu3 }
 0x246   :  { %v2609_v8 = vadd.f32 %v2608_v7, %v2596_v5  ;;  %v7167_v5 = vld [vmem:[#allocation8 + $0x50] sm:$0xf]  ;;  %v8834_v7 = vld [vmem:[#allocation8 + $0x54] sm:$0xf0] }
 0x248   :  { %v2664_v9 = vmul.f32 0.2, %v2609_v8 }
 0x24a   :  { %v2666_v22 = vmax.f32 %v2609_v8, %v2664_v9  ;;  %v8833_v8 = vld [vmem:[#allocation8 + $0x54] sm:$0xf]  ;;  %v7169_v9 = vld [vmem:[#allocation8 + $0x58] sm:$0xf0] }
 0x24c   :  { %v2668_v20 = vpack.c.bf16 %v2666_v22, %v2666_v22  ;;  %v7168_v22 = vor.u32 %v8834_v7, %v7167_v5  ;;  %v7273_v5 = vld [vmem:[#allocation10 + $0xb0] sm:$0xf0]  ;;  %v7415_v7 = vld [vmem:[#allocation10 + $0x1c0] sm:$0xf] }
 0x24d   :  { %v2610_v6 = vpop.f32.mrf.mxu3 }
 0x24e   :  { %2810 = vmatmul.bf16.vlgmr.msra.gmra.mxu0 %v2668_v20  ;;  %v7172_v20 = vor.u32 %v8833_v8, %v7169_v9  ;;  %v7159_v6 = vld [vmem:[#allocation8 + $0x40] sm:$0xf]  ;;  %3168 = vmatpush.bf16.msrb.mxu1 %v7168_v22  ;;  %v8897_v8 = vld [vmem:[#allocation10 + $0x1cc] sm:$0xf0]  ;;  %v8895_v22 = vld [vmem:[#allocation10 + $0x1c4] sm:$0xf] }
 0x24f   :  { %3605 = vmatpush.bf16.msra.mxu0 %v7432_v0  ;;  %v7416_v9 = vor.u32 %v8897_v8, %v7415_v7  ;;  %v8877_v0 = vld [vmem:[#allocation10 + $0x12c] sm:$0xf0]  ;;  %v8839_v8 = vld [vmem:[#allocation10 + $0x4] sm:$0xf] }
 0x250   :  { %3181 = vmatpush.bf16.msrb.mxu2 %v7172_v20  ;;  %v7417_v20 = vld [vmem:[#allocation10 + $0x1d0] sm:$0xf0]  ;;  %v8841_v7 = vld [vmem:[#allocation10 + $0xc] sm:$0xf0] }
 0x253   :  { %3606 = vmatpush.bf16.msra.mxu0 %v7416_v9  ;;  %v7193_v9 = vld [vmem:[#allocation10 + $0x10] sm:$0xf0] }
 0x255   :  { %v2660_v11 = vpop.f32.mrf.mxu3 }
 0x256   :  { %v2661_v39 = vadd.f32 %v2660_v11, %v2648_v21  ;;  %v8832_v21 = vld [vmem:[#allocation8 + $0x44] sm:$0xf0]  ;;  %v8831_v11 = vld [vmem:[#allocation8 + $0x44] sm:$0xf] }
 0x258   :  { %v2665_v12 = vmul.f32 0.2, %v2661_v39 }
 0x25a   :  { %v2667_v42 = vmax.f32 %v2661_v39, %v2665_v12  ;;  %v7161_v39 = vld [vmem:[#allocation8 + $0x48] sm:$0xf0]  ;;  %v7160_v12 = vor.u32 %v8832_v21, %v7159_v6  ;;  %v7272_v6 = vor.u32 %v8861_v4, %v7271_v2  ;;  %v7420_v21 = vor.u32 %v8895_v22, %v7417_v20  ;;  %v7337_v2 = vld [vmem:[#allocation10 + $0x130] sm:$0xf0]  ;;  %v7311_v22 = vld [vmem:[#allocation10 + $0xe8] sm:$0xf] }
 0x25c   :  { %v2669_v13 = vpack.c.bf16 %v2667_v42, %v2667_v42  ;;  %v7164_v42 = vor.u32 %v8831_v11, %v7161_v39  ;;  %3169 = vmatpush.bf16.msrb.mxu1 %v7160_v12  ;;  %v7255_v11 = vld [vmem:[#allocation10 + $0x80] sm:$0xf]  ;;  %v8857_v39 = vld [vmem:[#allocation10 + $0x8c] sm:$0xf0]  ;;  %v7276_v12 = vor.u32 %v8859_v3, %v7273_v5  ;;  %v7212_v3 = vor.u32 %v8843_v57, %v7209_v58  ;;  %v7265_v57 = vld [vmem:[#allocation10 + $0x98] sm:$0xf0] }
 0x25d   :  { %v2662_v14 = vpop.f32.mrf.mxu3  ;;  %v7191_v5 = vld [vmem:[#allocation10] sm:$0xf] }
 0x25e   :  { %2823 = vmatmul.bf16.vlgmr.msra.gmra.mxu1 %v2669_v13  ;;  %v7151_v13 = vld [vmem:[#allocation8 + $0x30] sm:$0xf]  ;;  %v8830_v14 = vld [vmem:[#allocation8 + $0x34] sm:$0xf0]  ;;  %3182 = vmatpush.bf16.msrb.mxu2 %v7164_v42  ;;  %v7399_v42 = vld [vmem:[#allocation10 + $0x1a0] sm:$0xf] }
 0x25f   :  { %v7152_v18 = vor.u32 %v8830_v14, %v7151_v13  ;;  %v8893_v13 = vld [vmem:[#allocation10 + $0x1ac] sm:$0xf0]  ;;  %v8891_v14 = vld [vmem:[#allocation10 + $0x1a4] sm:$0xf] }
 0x261   :  { %3170 = vmatpush.bf16.msrb.mxu1 %v7152_v18  ;;  %v7401_v18 = vld [vmem:[#allocation10 + $0x1b0] sm:$0xf0] }
 0x262   :  { %3183 = vmatpush.bf16.msrb.mxu2 %v7156_v19  ;;  %v7400_v19 = vor.u32 %v8893_v13, %v7399_v42  ;;  %v7313_v42 = vld [vmem:[#allocation10 + $0xf8] sm:$0xf0]  ;;  %v7319_v13 = vld [vmem:[#allocation10 + $0x100] sm:$0xf] }
 0x264   :  { %3607 = vmatpush.bf16.msra.mxu0 %v7400_v19  ;;  %v7196_v19 = vor.u32 %v8839_v8, %v7193_v9  ;;  %v7391_v8 = vld [vmem:[#allocation10 + $0x188] sm:$0xf]  ;;  %v8890_v9 = vld [vmem:[#allocation10 + $0x194] sm:$0xf0] }
 0x2cb   :  { %v2811_v26 = vpop.f32.mrf.mxu0 }
 0x2cc   :  { %v2812_v29 = vadd.f32 %v9174_v28, %v2811_v26  ;;  %v7144_v26 = vor.u32 %v8828_v24, %v7143_v23  ;;  %v7148_v28 = vor.u32 %v8827_v25, %v7145_v10  ;;  %v7404_v23 = vor.u32 %v8891_v14, %v7401_v18  ;;  %v7383_v24 = vld [vmem:[#allocation10 + $0x180] sm:$0xf]  ;;  %v8889_v10 = vld [vmem:[#allocation10 + $0x18c] sm:$0xf0]  ;;  %v7321_v18 = vld [vmem:[#allocation10 + $0x110] sm:$0xf0] }
 0x2cd   :  { %v7256_v25 = vor.u32 %v8857_v39, %v7255_v11  ;;  %v7336_v11 = vor.u32 %v8877_v0, %v7335_v61  ;;  %v8873_v14 = vld [vmem:[#allocation10 + $0x10c] sm:$0xf0] }
 0x2ce   :  { %3171 = vmatpush.bf16.msrb.mxu1 %v7144_v26  ;;  %3184 = vmatpush.bf16.msrb.mxu2 %v7148_v28  ;;  %v8887_v26 = vld [vmem:[#allocation10 + $0x184] sm:$0xf]  ;;  %v7260_v28 = vor.u32 %v8855_v17, %v7257_v38 }
 0x2cf   :  { %v8871_v38 = vld [vmem:[#allocation10 + $0x104] sm:$0xf] }
 0x2d3   :  { %v2813_v27 = vpop.f32.mrf.mxu0 }
 0x2d4   :  { %v9177_v27 = vld [vmem:[%s9786_s12] ss:$0 sm:$0xff] }
 0x2db   :  { %v2824_v30 = vpop.f32.mrf.mxu1 }
 0x2dc   :  { %v2825_v31 = vadd.f32 %v2824_v30, %v2812_v29 }
 0x2de   :  { %v2828_v16 = vmul.f32 0.2, %v2825_v31 }
 0x2e0   :  { %v2829_v33 = vmax.f32 %v2825_v31, %v2828_v16 }
 0x2e2   :  { %v2830_v34 = vpack.c.bf16 %v2829_v33, %v2829_v33 }
 0x2e3   :  { %v2826_v35 = vpop.f32.mrf.mxu1 }
 0x2e4   :  { %2907 = vmatmul.bf16.vlgmr.msra.gmra.mxu2 %v2830_v34  ;;  %v7135_v35 = vld [vmem:[#allocation8 + $0x10] sm:$0xf] }
 0x2e5   :  { %v7136_v32 = vor.u32 %v8826_v36, %v7135_v35  ;;  %v7367_v35 = vld [vmem:[#allocation10 + $0x160] sm:$0xf] }
 0x2e7   :  { %3172 = vmatpush.bf16.msrb.mxu1 %v7136_v32  ;;  %v8883_v32 = vld [vmem:[#allocation10 + $0x164] sm:$0xf] }
 0x367   :  { %v2908_v15 = vpop.f32.mrf.mxu2 }
 0x368   :  { %v2909_v43 = vadd.f32 %v9175_v40, %v2908_v15  ;;  %v7137_v40 = vld [vmem:[#allocation8 + $0x18] sm:$0xf0] }
 0x369   :  { %v7140_v15 = vor.u32 %v8825_v41, %v7137_v40  ;;  %v8885_v41 = vld [vmem:[#allocation10 + $0x16c] sm:$0xf0]  ;;  %v7369_v40 = vld [vmem:[#allocation10 + $0x170] sm:$0xf0] }
 0x36a   :  { %v2912_v44 = vmul.f32 0.2, %v2909_v43 }
 0x36b   :  { %3185 = vmatpush.bf16.msrb.mxu2 %v7140_v15 }
 0x36c   :  { %v2913_v45 = vmax.f32 %v2909_v43, %v2912_v44  ;;  %v7127_v43 = vld [vmem:[#allocation8] sm:$0xf]  ;;  %v8824_v44 = vld [vmem:[#allocation8 + $0x4] sm:$0xf0] }
 0x36e   :  { %v2914_v46 = vpack.c.bf16 %v2913_v45, %v2913_v45  ;;  %v8823_v45 = vld [vmem:[#allocation8 + $0x4] sm:$0xf] }
 0x36f   :  { %v2910_v47 = vpop.f32.mrf.mxu2 }
 0x370   :  { %7098 = vmatmul.msk.bf16.vlgmr.msra.gmra.mxu3 %vm2951_vm0, %v2914_v46  ;;  %v7128_v46 = vor.u32 %v8824_v44, %v7127_v43  ;;  %v7129_v47 = vld [vmem:[#allocation8 + $0x8] sm:$0xf0]  ;;  %v7223_v43 = vld [vmem:[#allocation10 + $0x40] sm:$0xf]  ;;  %v8849_v44 = vld [vmem:[#allocation10 + $0x4c] sm:$0xf0] }
 0x371   :  { %v7132_v52 = vor.u32 %v8823_v45, %v7129_v47  ;;  %v8847_v45 = vld [vmem:[#allocation10 + $0x44] sm:$0xf]  ;;  %v7368_v47 = vor.u32 %v8885_v41, %v7367_v35  ;;  %v8902_v35 = vld [vmem:[#allocation10 + $0x1f4] sm:$0xf0] }
 0x372   :  { %3173 = vmatpush.bf16.msrb.mxu1 %v7128_v46  ;;  %v7225_v46 = vld [vmem:[#allocation10 + $0x50] sm:$0xf0] }
 0x373   :  { %3186 = vmatpush.bf16.msrb.mxu2 %v7132_v52  ;;  %v7372_v52 = vor.u32 %v8883_v32, %v7369_v40  ;;  %v7441_v32 = vld [vmem:[#allocation10 + $0x1f8] sm:$0xf0] }
 0x377   :  { %3631 = vmatpush.bf16.msra.mxu2 %v7436_v1  ;;  %v8875_v1 = vld [vmem:[#allocation10 + $0x124] sm:$0xf] }
 0x378   :  { %v7340_v39 = vor.u32 %v8875_v1, %v7337_v2  ;;  %v7247_v1 = vld [vmem:[#allocation10 + $0x68] sm:$0xf]  ;;  %v8854_v2 = vld [vmem:[#allocation10 + $0x74] sm:$0xf0] }
 0x37b   :  { %3632 = vmatpush.bf16.msra.mxu2 %v7420_v21  ;;  %v8868_v21 = vld [vmem:[#allocation10 + $0xec] sm:$0xf] }
 0x37f   :  { %3633 = vmatpush.bf16.msra.mxu2 %v7404_v23 }
 0x3f3   :  { %v2964_v51 = vpop.f32.mrf.mxu3 }
 0x3f4   :  { %v2965_v37 = vadd.f32 %v9176_v50, %v2964_v51  ;;  %v8867_v50 = vld [vmem:[#allocation10 + $0xe4] sm:$0xf]  ;;  %v7304_v51 = vor.u32 %v8869_v49, %v7303_v48  ;;  %v7351_v48 = vld [vmem:[#allocation10 + $0x140] sm:$0xf]  ;;  %v7224_v49 = vor.u32 %v8849_v44, %v7223_v43  ;;  %v8862_v43 = vld [vmem:[#allocation10 + $0xb4] sm:$0xf0] }
 0x3f5   :  { %v8860_v44 = vld [vmem:[#allocation10 + $0xac] sm:$0xf] }
 0x3f6   :  { %v2968_v53 = vpack.c.bf16 %v2965_v37, %v2965_v37  ;;  %v7305_v37 = vld [vmem:[#allocation10 + $0xf0] sm:$0xf0]  ;;  %3592 = vmatpush.bf16.msra.mxu3 %v7304_v51  ;;  %v8879_v51 = vld [vmem:[#allocation10 + $0x144] sm:$0xf] }
 0x3f7   :  { %v7308_v55 = vor.u32 %v8867_v50, %v7305_v37  ;;  %v8881_v50 = vld [vmem:[#allocation10 + $0x14c] sm:$0xf0]  ;;  %v7353_v37 = vld [vmem:[#allocation10 + $0x150] sm:$0xf0] }
 0x3f8   :  { %7107 = vmatmul.msk.bf16.vlgmr.msrb.gmra.mxu3 %vm2989_vm1, %v2968_v53  ;;  %v7287_v53 = vld [vmem:[#allocation10 + $0xc0] sm:$0xf]  ;;  %v7356_v60 = vor.u32 %v8879_v51, %v7353_v37  ;;  %v7425_v51 = vld [vmem:[#allocation10 + $0x1d8] sm:$0xf0] }
 0x3f9   :  { %3618 = vmatpush.bf16.msra.mxu1 %v7308_v55  ;;  %v7207_v55 = vld [vmem:[#allocation10 + $0x20] sm:$0xf] }
 0x3fb   :  { %v2966_v54 = vpop.f32.mrf.mxu3 }
 0x3fc   :  { %v8865_v54 = vld [vmem:[#allocation10 + $0xcc] sm:$0xf0] }
 0x3fd   :  { %v7288_v59 = vor.u32 %v8865_v54, %v7287_v53  ;;  %3619 = vmatpush.bf16.msra.mxu1 %v7292_v63  ;;  %v9178_v53 = vld [vmem:[%s9788_s14] ss:$0 sm:$0xff]  ;;  %v7228_v54 = vor.u32 %v8847_v45, %v7225_v46  ;;  %v7208_v63 = vor.u32 %v8845_v56, %v7207_v55  ;;  %v7281_v46 = vld [vmem:[#allocation10 + $0xb8] sm:$0xf0]  ;;  %v8856_v55 = vld [vmem:[#allocation10 + $0x8c] sm:$0xf] }
 0x3fe   :  { %v7268_v58 = vor.u32 %v8856_v55, %v7265_v57 }
 0x3ff   :  { %3593 = vmatpush.bf16.msra.mxu3 %v7288_v59  ;;  %v7352_v59 = vor.u32 %v8881_v50, %v7351_v48  ;;  %v8898_v48 = vld [vmem:[#allocation10 + $0x1d4] sm:$0xf0] }
 0x401   :  { %3620 = vmatpush.bf16.msra.mxu1 %v7276_v12  ;;  %v7192_v12 = vor.u32 %v8841_v7, %v7191_v5  ;;  %v7249_v5 = vld [vmem:[#allocation10 + $0x78] sm:$0xf0] }
 0x403   :  { %3594 = vmatpush.bf16.msra.mxu3 %v7272_v6  ;;  %v8870_v6 = vld [vmem:[#allocation10 + $0xf4] sm:$0xf0] }
 0x404   :  { %v7312_v23 = vor.u32 %v8870_v6, %v7311_v22  ;;  %v8888_v22 = vld [vmem:[#allocation10 + $0x18c] sm:$0xf]  ;;  %v7393_v6 = vld [vmem:[#allocation10 + $0x198] sm:$0xf0] }
 0x405   :  { %3621 = vmatpush.bf16.msra.mxu1 %v7260_v28 }
 0x407   :  { %3595 = vmatpush.bf16.msra.mxu3 %v7256_v25  ;;  %v7316_v25 = vor.u32 %v8868_v21, %v7313_v42  ;;  %v7396_v21 = vor.u32 %v8888_v22, %v7393_v6  ;;  %v8151_v22 = vld [vmem:[#allocation11 + $0x580] sm:$0xf] }
 0x47b   :  { %v3002_v29 = vpop.f32.mrf.mxu3 }
 0x47c   :  { %v3003_v30 = vadd.f32 %v9177_v27, %v3002_v29  ;;  %v7385_v27 = vld [vmem:[#allocation10 + $0x190] sm:$0xf0]  ;;  %v7239_v29 = vld [vmem:[#allocation10 + $0x60] sm:$0xf] }
 0x47e   :  { %v3006_v31 = vmul.f32 0.2, %v3003_v30 }
 0x480   :  { %v3007_v16 = vmax.f32 %v3003_v30, %v3006_v31  ;;  %v8853_v30 = vld [vmem:[#allocation10 + $0x6c] sm:$0xf0]  ;;  %v8851_v31 = vld [vmem:[#allocation10 + $0x64] sm:$0xf] }
 0x481   :  { %v7240_v36 = vor.u32 %v8853_v30, %v7239_v29  ;;  %v8864_v29 = vld [vmem:[#allocation10 + $0xcc] sm:$0xf]  ;;  %v7297_v30 = vld [vmem:[#allocation10 + $0xd8] sm:$0xf0] }
 0x482   :  { %v3008_v33 = vpack.c.bf16 %v3007_v16, %v3007_v16  ;;  %v7241_v16 = vld [vmem:[#allocation10 + $0x70] sm:$0xf0] }
 0x483   :  { %v3004_v34 = vpop.f32.mrf.mxu3  ;;  %v7244_v15 = vor.u32 %v8851_v31, %v7241_v16  ;;  %3596 = vmatpush.bf16.msra.mxu3 %v7240_v36  ;;  %v7324_v31 = vor.u32 %v8871_v38, %v7321_v18  ;;  %v8900_v36 = vld [vmem:[#allocation10 + $0x1ec] sm:$0xf]  ;;  %v8886_v38 = vld [vmem:[#allocation10 + $0x174] sm:$0xf0] }
 0x484   :  { %7124 = vmatmul.msk.bf16.vlgmr.msrb.gmra.mxu0 %vm2951_vm0, %v3008_v33  ;;  %v7384_v33 = vor.u32 %v8889_v10, %v7383_v24  ;;  %v7388_v34 = vor.u32 %v8887_v26, %v7385_v27  ;;  %v7295_v10 = vld [vmem:[#allocation10 + $0xc8] sm:$0xf]  ;;  %v8866_v26 = vld [vmem:[#allocation10 + $0xd4] sm:$0xf0]  ;;  %v7320_v27 = vor.u32 %v8873_v14, %v7319_v13  ;;  %v7444_v40 = vor.u32 %v8900_v36, %v7441_v32  ;;  %v7233_v13 = vld [vmem:[#allocation10 + $0x58] sm:$0xf0] }
 0x485   :  { %3622 = vmatpush.bf16.msra.mxu1 %v7244_v15  ;;  %v7296_v16 = vor.u32 %v8866_v26, %v7295_v10  ;;  %v7279_v15 = vld [vmem:[#allocation10 + $0xa8] sm:$0xf]  ;;  %v8884_v18 = vld [vmem:[#allocation10 + $0x16c] sm:$0xf] }
 0x486   :  { %3608 = vmatpush.bf16.msra.mxu0 %v7384_v33  ;;  %3634 = vmatpush.bf16.msra.mxu2 %v7388_v34  ;;  %v7300_v33 = vor.u32 %v8864_v29, %v7297_v30  ;;  %v7439_v34 = vld [vmem:[#allocation10 + $0x1e8] sm:$0xf]  ;;  %v7280_v45 = vor.u32 %v8862_v43, %v7279_v15  ;;  %v8840_v32 = vld [vmem:[#allocation10 + $0xc] sm:$0xf]  ;;  %v7201_v15 = vld [vmem:[#allocation10 + $0x18] sm:$0xf0] }
 0x487   :  { %3597 = vmatpush.bf16.msra.mxu3 %v7224_v49  ;;  %v7440_v41 = vor.u32 %v8902_v35, %v7439_v34  ;;  %v8896_v49 = vld [vmem:[#allocation10 + $0x1cc] sm:$0xf]  ;;  %v7359_v29 = vld [vmem:[#allocation10 + $0x148] sm:$0xf] }
 0x488   :  { %v7428_v37 = vor.u32 %v8896_v49, %v7425_v51  ;;  %v7199_v36 = vld [vmem:[#allocation10 + $0x8] sm:$0xf]  ;;  %v8872_v51 = vld [vmem:[#allocation10 + $0x10c] sm:$0xf] }
 0x489   :  { %3623 = vmatpush.bf16.msra.mxu1 %v7228_v54  ;;  %v8858_v54 = vld [vmem:[#allocation10 + $0x94] sm:$0xf0]  ;;  %v7343_v43 = vld [vmem:[#allocation10 + $0x128] sm:$0xf] }
 0x48a   :  { %3609 = vmatpush.bf16.msra.mxu0 %v7368_v47  ;;  %3635 = vmatpush.bf16.msra.mxu2 %v7372_v52  ;;  %v7284_v47 = vor.u32 %v8860_v44, %v7281_v46  ;;  %v7423_v52 = vld [vmem:[#allocation10 + $0x1c8] sm:$0xf]  ;;  %v8878_v44 = vld [vmem:[#allocation10 + $0x134] sm:$0xf0]  ;;  %v8876_v46 = vld [vmem:[#allocation10 + $0x12c] sm:$0xf] }
 0x48b   :  { %3598 = vmatpush.bf16.msra.mxu3 %v7208_v63  ;;  %v7424_v50 = vor.u32 %v8898_v48, %v7423_v52  ;;  %v7409_v63 = vld [vmem:[#allocation10 + $0x1b8] sm:$0xf0]  ;;  %v7344_v52 = vor.u32 %v8878_v44, %v7343_v43  ;;  %v7327_v49 = vld [vmem:[#allocation10 + $0x108] sm:$0xf]  ;;  %v8375_v43 = vld [vmem:[#allocation11 + $0x740] sm:$0xf] }
 0x48c   :  { %v9139_v44 = vld [vmem:[#allocation11 + $0x75c] sm:$0xf0] }
 0x48d   :  { %3624 = vmatpush.bf16.msra.mxu1 %v7212_v3  ;;  %v7248_v3 = vor.u32 %v8854_v2, %v7247_v1  ;;  %v9091_v1 = vld [vmem:[#allocation11 + $0x5dc] sm:$0xf0] }
 0x48e   :  { %3610 = vmatpush.bf16.msra.mxu0 %v7352_v59  ;;  %3636 = vmatpush.bf16.msra.mxu2 %v7356_v60  ;;  %v7407_v59 = vld [vmem:[#allocation10 + $0x1a8] sm:$0xf]  ;;  %v8894_v60 = vld [vmem:[#allocation10 + $0x1b4] sm:$0xf0] }
 0x48f   :  { %3599 = vmatpush.bf16.msra.mxu3 %v7192_v12  ;;  %v7408_v61 = vor.u32 %v8894_v60, %v7407_v59  ;;  %v8848_v12 = vld [vmem:[#allocation10 + $0x4c] sm:$0xf] }
 0x490   :  { %v7236_v14 = vor.u32 %v8848_v12, %v7233_v13  ;;  %v8439_v12 = vld [vmem:[#allocation11 + $0x7c0] sm:$0xf] }
 0x491   :  { %3625 = vmatpush.bf16.msra.mxu1 %v7196_v19 }
 0x492   :  { %3611 = vmatpush.bf16.msra.mxu0 %v7336_v11  ;;  %3637 = vmatpush.bf16.msra.mxu2 %v7340_v39  ;;  %v7231_v11 = vld [vmem:[#allocation10 + $0x48] sm:$0xf]  ;;  %v8850_v39 = vld [vmem:[#allocation10 + $0x54] sm:$0xf0] }
 0x493   :  { %3644 = vmatpush.bf16.msrb.mxu3 %v7312_v23  ;;  %v7232_v42 = vor.u32 %v8850_v39, %v7231_v11  ;;  %v7377_v23 = vld [vmem:[#allocation10 + $0x178] sm:$0xf0]  ;;  %v9027_v11 = vld [vmem:[#allocation11 + $0x3dc] sm:$0xf0] }
 0x494   :  { %v7380_v10 = vor.u32 %v8884_v18, %v7377_v23  ;;  %v8947_v18 = vld [vmem:[#allocation11 + $0x15c] sm:$0xf0] }
 0x495   :  { %v9075_v23 = vld [vmem:[#allocation11 + $0x55c] sm:$0xf0] }
 0x496   :  { %3612 = vmatpush.bf16.msra.mxu0 %v7320_v27  ;;  %3638 = vmatpush.bf16.msra.mxu2 %v7324_v31  ;;  %v8844_v27 = vld [vmem:[#allocation10 + $0x2c] sm:$0xf]  ;;  %v8882_v31 = vld [vmem:[#allocation10 + $0x154] sm:$0xf0] }
 0x497   :  { %3645 = vmatpush.bf16.msrb.mxu3 %v7296_v16  ;;  %v8880_v16 = vld [vmem:[#allocation10 + $0x14c] sm:$0xf]  ;;  %v7360_v34 = vor.u32 %v8882_v31, %v7359_v29  ;;  %v9147_v29 = vld [vmem:[#allocation11 + $0x79c] sm:$0xf0] }
 0x49a   :  { %3657 = vmatpush.bf16.msrb.mxu0 %v7440_v41  ;;  %v8842_v41 = vld [vmem:[#allocation10 + $0x14] sm:$0xf0] }
 0x49b   :  { %3646 = vmatpush.bf16.msrb.mxu3 %v7280_v45  ;;  %v7204_v45 = vor.u32 %v8840_v32, %v7201_v15  ;;  %v7863_v32 = vld [vmem:[#allocation11 + $0x340] sm:$0xf] }
 0x49c   :  { %v9011_v15 = vld [vmem:[#allocation11 + $0x35c] sm:$0xf0] }
 0x49e   :  { %3658 = vmatpush.bf16.msrb.mxu0 %v7424_v50  ;;  %v8874_v50 = vld [vmem:[#allocation10 + $0x114] sm:$0xf0] }
 0x4a2   :  { %3659 = vmatpush.bf16.msrb.mxu0 %v7408_v61  ;;  %v7671_v61 = vld [vmem:[#allocation11 + $0x1c0] sm:$0xf] }
 0x501   :  { %v3057_v62 = vpop.f32.mrf.mxu0 }
 0x502   :  { %v3058_v4 = vadd.f32 %v9178_v53, %v3057_v62  ;;  %v7263_v53 = vld [vmem:[#allocation10 + $0x88] sm:$0xf]  ;;  %v8892_v62 = vld [vmem:[#allocation10 + $0x1ac] sm:$0xf] }
 0x503   :  { %v7264_v56 = vor.u32 %v8858_v54, %v7263_v53  ;;  %v7412_v0 = vor.u32 %v8892_v62, %v7409_v63  ;;  %v7328_v53 = vor.u32 %v8874_v50, %v7327_v49  ;;  %v7329_v54 = vld [vmem:[#allocation10 + $0x118] sm:$0xf0]  ;;  %v8963_v62 = vld [vmem:[#allocation11 + $0x1dc] sm:$0xf0]  ;;  %v7864_v50 = vor.u32 %v9011_v15, %v7863_v32  ;;  %v7897_v15 = vld [vmem:[#allocation11 + $0x3a0] sm:$0xf0] }
 0x504   :  { %v3061_v20 = vmul.f32 0.2, %v3058_v4  ;;  %v7332_v55 = vor.u32 %v8872_v51, %v7329_v54  ;;  %v9059_v49 = vld [vmem:[#allocation11 + $0x4dc] sm:$0xf0] }
 0x505   :  { %3647 = vmatpush.bf16.msrb.mxu3 %v7264_v56  ;;  %v7831_v51 = vld [vmem:[#allocation11 + $0x300] sm:$0xf] }
 0x506   :  { %v3062_v17 = vmax.f32 %v3058_v4, %v3061_v20  ;;  %v8852_v4 = vld [vmem:[#allocation10 + $0x6c] sm:$0xf]  ;;  %v7392_v20 = vor.u32 %v8890_v9, %v7391_v8  ;;  %v8955_v9 = vld [vmem:[#allocation11 + $0x19c] sm:$0xf0] }
 0x507   :  { %v7252_v7 = vor.u32 %v8852_v4, %v7249_v5  ;;  %v7672_v4 = vor.u32 %v8963_v62, %v7671_v61  ;;  %v8343_v54 = vld [vmem:[#allocation11 + $0x700] sm:$0xf] }
 0x508   :  { %v3063_v24 = vpack.c.bf16 %v3062_v17, %v3062_v17  ;;  %3660 = vmatpush.bf16.msrb.mxu0 %v7392_v20  ;;  %v7375_v17 = vld [vmem:[#allocation10 + $0x168] sm:$0xf]  ;;  %v9083_v20 = vld [vmem:[#allocation11 + $0x59c] sm:$0xf0] }
 0x509   :  { %v3059_v28 = vpop.f32.mrf.mxu0  ;;  %3648 = vmatpush.bf16.msrb.mxu3 %v7248_v3  ;;  %v7376_v19 = vor.u32 %v8886_v38, %v7375_v17  ;;  %v7639_v3 = vld [vmem:[#allocation11 + $0x180] sm:$0xf]  ;;  %v8152_v17 = vor.u32 %v9083_v20, %v8151_v22 }
 0x50a   :  { %3174 = vmatmul.bf16.vlgmr.msrb.gmra.mxu1 %v3063_v24  ;;  %3187 = vmatmul.bf16.vlgmr.msrb.gmra.mxu2 %v3063_v24  ;;  %v7215_v24 = vld [vmem:[#allocation10 + $0x28] sm:$0xf]  ;;  %v7217_v28 = vld [vmem:[#allocation10 + $0x38] sm:$0xf0]  ;;  %v7640_v13 = vor.u32 %v8955_v9, %v7639_v3  ;;  %v9051_v61 = vld [vmem:[#allocation11 + $0x49c] sm:$0xf0] }
 0x50b   :  { %3670 = vmatpush.bf16.msrb.mxu1 %v7316_v25  ;;  %3683 = vmatpush.bf16.msrb.mxu2 %v7444_v40  ;;  %v8846_v25 = vld [vmem:[#allocation10 + $0x34] sm:$0xf0]  ;;  %v7220_v30 = vor.u32 %v8844_v27, %v7217_v28  ;;  %v7200_v40 = vor.u32 %v8842_v41, %v7199_v36  ;;  %v9019_v27 = vld [vmem:[#allocation11 + $0x39c] sm:$0xf0] }
 0x50c   :  { %v7216_v26 = vor.u32 %v8846_v25, %v7215_v24  ;;  %3661 = vmatpush.bf16.msrb.mxu0 %v7376_v19  ;;  %v8119_v19 = vld [vmem:[#allocation11 + $0x540] sm:$0xf] }
 0x50d   :  { %3649 = vmatpush.bf16.msrb.mxu3 %v7232_v42  ;;  %v9155_v42 = vld [vmem:[#allocation11 + $0x7dc] sm:$0xf0] }
 0x50e   :  { %v7895_v25 = vld [vmem:[#allocation11 + $0x380] sm:$0xf] }
 0x50f   :  { %3671 = vmatpush.bf16.msrb.mxu1 %v7300_v33  ;;  %3684 = vmatpush.bf16.msrb.mxu2 %v7428_v37  ;;  %v7361_v33 = vld [vmem:[#allocation10 + $0x158] sm:$0xf0]  ;;  %v3080_v37 = vld [vmem:[%s9790_s16] sm:$0x3]  ;;  %v7896_v41 = vor.u32 %v9019_v27, %v7895_v25 }
 0x510   :  { %v7364_v35 = vor.u32 %v8880_v16, %v7361_v33  ;;  %3662 = vmatpush.bf16.msrb.mxu0 %v7360_v34  ;;  %v3082_v56 = vperm.slane %v3080_v37, 0  ;;  %v3083_v59 = vperm.slane %v3080_v37, 1  ;;  %v8407_v28 = vld [vmem:[#allocation11 + $0x780] sm:$0xf]  ;;  %v8120_v33 = vor.u32 %v9075_v23, %v8119_v19  ;;  %v7673_v19 = vld [vmem:[#allocation11 + $0x1e0] sm:$0xf0] }
 0x511   :  { %3650 = vmatpush.bf16.msrb.mxu3 %v7216_v26  ;;  %v7575_v16 = vld [vmem:[#allocation11 + $0x100] sm:$0xf]  ;;  %v8376_v37 = vor.u32 %v9139_v44, %v8375_v43 }
 0x512   :  { %v8939_v34 = vld [vmem:[#allocation11 + $0x11c] sm:$0xf0] }
 0x513   :  { %3672 = vmatpush.bf16.msrb.mxu1 %v7284_v47  ;;  %3685 = vmatpush.bf16.msrb.mxu2 %v7412_v0  ;;  %v7345_v47 = vld [vmem:[#allocation10 + $0x138] sm:$0xf0]  ;;  %v8183_v0 = vld [vmem:[#allocation11 + $0x5c0] sm:$0xf] }
 0x514   :  { %v7348_v48 = vor.u32 %v8876_v46, %v7345_v47  ;;  %3663 = vmatpush.bf16.msrb.mxu0 %v7344_v52  ;;  %v8184_v5 = vor.u32 %v9091_v1, %v8183_v0  ;;  %v9067_v36 = vld [vmem:[#allocation11 + $0x51c] sm:$0xf0] }
 0x515   :  { %3651 = vmatpush.bf16.msrb.mxu3 %v7200_v40  ;;  %v8408_v40 = vor.u32 %v9147_v29, %v8407_v28  ;;  %v7543_v46 = vld [vmem:[#allocation11 + $0xc0] sm:$0xf]  ;;  %v8951_v29 = vld [vmem:[#allocation11 + $0x184] sm:$0xf] }
 0x516   :  { %v8931_v52 = vld [vmem:[#allocation11 + $0xdc] sm:$0xf0] }
 0x517   :  { %3673 = vmatpush.bf16.msrb.mxu1 %v7268_v58  ;;  %3686 = vmatpush.bf16.msrb.mxu2 %v7396_v21  ;;  %v7927_v21 = vld [vmem:[#allocation11 + $0x3c0] sm:$0xf] }
 0x518   :  { %3664 = vmatpush.bf16.msrb.mxu0 %v7328_v53  ;;  %v7928_v24 = vor.u32 %v9027_v11, %v7927_v21  ;;  %v9003_v53 = vld [vmem:[#allocation11 + $0x31c] sm:$0xf0] }
 0x519   :  { %v7832_v62 = vor.u32 %v9003_v53, %v7831_v51  ;;  %v8995_v1 = vld [vmem:[#allocation11 + $0x2dc] sm:$0xf0] }
 0x51a   :  { %v8915_v9 = vld [vmem:[#allocation11 + $0x5c] sm:$0xf0] }
 0x51b   :  { %3674 = vmatpush.bf16.msrb.mxu1 %v7252_v7  ;;  %3687 = vmatpush.bf16.msrb.mxu2 %v7380_v10  ;;  %v8440_v10 = vor.u32 %v9155_v42, %v8439_v12  ;;  %v7991_v22 = vld [vmem:[#allocation11 + $0x440] sm:$0xf] }
 0x51c   :  { %v9043_v20 = vld [vmem:[#allocation11 + $0x45c] sm:$0xf0] }
 0x51d   :  { %v7767_v21 = vld [vmem:[#allocation11 + $0x280] sm:$0xf] }
 0x51e   :  { %v8279_v12 = vld [vmem:[#allocation11 + $0x680] sm:$0xf] }
 0x51f   :  { %3675 = vmatpush.bf16.msrb.mxu1 %v7236_v14  ;;  %3688 = vmatpush.bf16.msrb.mxu2 %v7364_v35  ;;  %v7607_v14 = vld [vmem:[#allocation11 + $0x140] sm:$0xf] }
 0x520   :  { %v7608_v31 = vor.u32 %v8947_v18, %v7607_v14  ;;  %v8087_v35 = vld [vmem:[#allocation11 + $0x500] sm:$0xf]  ;;  %v8959_v18 = vld [vmem:[#allocation11 + $0x1c4] sm:$0xf] }
 0x521   :  { %v8088_v47 = vor.u32 %v9067_v36, %v8087_v35  ;;  %v9115_v42 = vld [vmem:[#allocation11 + $0x69c] sm:$0xf0]  ;;  %v7676_v27 = vor.u32 %v8959_v18, %v7673_v19  ;;  %v8943_v36 = vld [vmem:[#allocation11 + $0x144] sm:$0xf] }
 0x522   :  { %v7447_v14 = vld [vmem:[#allocation11] sm:$0xf]  ;;  %v8280_v23 = vor.u32 %v9115_v42, %v8279_v12  ;;  %v8441_v12 = vld [vmem:[#allocation11 + $0x7e0] sm:$0xf0] }
 0x523   :  { %3676 = vmatpush.bf16.msrb.mxu1 %v7220_v30  ;;  %3689 = vmatpush.bf16.msrb.mxu2 %v7348_v48  ;;  %v8055_v48 = vld [vmem:[#allocation11 + $0x4c0] sm:$0xf]  ;;  %v9071_v18 = vld [vmem:[#allocation11 + $0x544] sm:$0xf] }
 0x524   :  { %v8979_v25 = vld [vmem:[#allocation11 + $0x25c] sm:$0xf0]  ;;  %v8121_v19 = vld [vmem:[#allocation11 + $0x560] sm:$0xf0] }
 0x525   :  { %v9035_v51 = vld [vmem:[#allocation11 + $0x41c] sm:$0xf0] }
 0x527   :  { %3677 = vmatpush.bf16.msrb.mxu1 %v7204_v45  ;;  %3690 = vmatpush.bf16.msrb.mxu2 %v7332_v55  ;;  %v7576_v45 = vor.u32 %v8939_v34, %v7575_v16  ;;  %v9131_v55 = vld [vmem:[#allocation11 + $0x71c] sm:$0xf0]  ;;  %v9023_v16 = vld [vmem:[#allocation11 + $0x3c4] sm:$0xf] }
 0x528   :  { %v8344_v0 = vor.u32 %v9131_v55, %v8343_v54  ;;  %v9107_v54 = vld [vmem:[#allocation11 + $0x65c] sm:$0xf0]  ;;  %v8927_v55 = vld [vmem:[#allocation11 + $0xc4] sm:$0xf] }
 0x587   :  { %v3175_v57 = vpop.f32.mrf.mxu1 }
 0x588   :  { %v3176_v58 = vadd.f32 %v3175_v57, %v3082_v56  ;;  %v7544_v56 = vor.u32 %v8931_v52, %v7543_v46  ;;  %v7511_v57 = vld [vmem:[#allocation11 + $0x80] sm:$0xf]  ;;  %v7577_v46 = vld [vmem:[#allocation11 + $0x120] sm:$0xf0] }
 0x58a   :  { %v3192_v60 = vmul.f32 0.2, %v3176_v58 }
 0x58c   :  { %v3194_v63 = vmax.f32 %v3176_v58, %v3192_v60  ;;  %v8056_v58 = vor.u32 %v9059_v49, %v8055_v48  ;;  %v8023_v60 = vld [vmem:[#allocation11 + $0x480] sm:$0xf]  ;;  %v7865_v48 = vld [vmem:[#allocation11 + $0x360] sm:$0xf0] }
 0x58d   :  { %v3188_v2 = vpop.f32.mrf.mxu2 }
 0x58e   :  { %v9679_v7 = vpack.c.bf16 %v3194_v63, %v3194_v63  ;;  %v3189_v8 = vadd.f32 %v3188_v2, %v3083_v59  ;;  %v8923_v59 = vld [vmem:[#allocation11 + $0x9c] sm:$0xf0] }
 0x58f   :  { %v3177_v6 = vpop.f32.mrf.mxu1  ;;  %v7799_v63 = vld [vmem:[#allocation11 + $0x2c0] sm:$0xf]  ;;  %v7512_v3 = vor.u32 %v8923_v59, %v7511_v57  ;;  %v8999_v59 = vld [vmem:[#allocation11 + $0x304] sm:$0xf] }
 0x590   :  { %v3193_v39 = vmul.f32 0.2, %v3189_v8  ;;  %3600 = vmatmul.bf16.vlgmr.msra.gmra.mxu3 %v9679_v7  ;;  %3626 = vmatmul.bf16.vlgmr.msra.gmra.mxu1 %v9679_v7  ;;  %v8311_v2 = vld [vmem:[#allocation11 + $0x6c0] sm:$0xf]  ;;  %v7800_v6 = vor.u32 %v8995_v1, %v7799_v63  ;;  %v8185_v63 = vld [vmem:[#allocation11 + $0x5e0] sm:$0xf0] }
 0x591   :  { %5262 = vmatpush.bf16.msra.mxu3 %v7672_v4  ;;  %5288 = vmatpush.bf16.msra.mxu1 %v8184_v5  ;;  %v9123_v4 = vld [vmem:[#allocation11 + $0x6dc] sm:$0xf0] }
 0x592   :  { %v3195_v38 = vmax.f32 %v3189_v8, %v3193_v39  ;;  %v7479_v5 = vld [vmem:[#allocation11 + $0x40] sm:$0xf]  ;;  %v8024_v8 = vor.u32 %v9051_v61, %v8023_v60  ;;  %v8312_v11 = vor.u32 %v9123_v4, %v8311_v2  ;;  %v7833_v60 = vld [vmem:[#allocation11 + $0x320] sm:$0xf0] }
 0x593   :  { %v8987_v39 = vld [vmem:[#allocation11 + $0x29c] sm:$0xf0]  ;;  %v9087_v61 = vld [vmem:[#allocation11 + $0x5c4] sm:$0xf] }
 0x594   :  { %v9683_v26 = vpack.c.bf16 %v3195_v38, %v3195_v38  ;;  %v7768_v38 = vor.u32 %v8987_v39, %v7767_v21  ;;  %v8215_v1 = vld [vmem:[#allocation11 + $0x600] sm:$0xf]  ;;  %v9151_v39 = vld [vmem:[#allocation11 + $0x7c4] sm:$0xf] }
 0x595   :  { %v3190_v30 = vpop.f32.mrf.mxu2  ;;  %5263 = vmatpush.bf16.msra.mxu3 %v7640_v13  ;;  %5289 = vmatpush.bf16.msra.mxu1 %v8152_v17  ;;  %v7992_v13 = vor.u32 %v9043_v20, %v7991_v22  ;;  %v8907_v17 = vld [vmem:[#allocation11 + $0x1c] sm:$0xf0]  ;;  %v7801_v22 = vld [vmem:[#allocation11 + $0x2e0] sm:$0xf0]  ;;  %v8444_v42 = vor.u32 %v9151_v39, %v8441_v12 }
 0x596   :  { %3613 = vmatmul.bf16.vlgmr.msra.gmra.mxu0 %v9683_v26  ;;  %3639 = vmatmul.bf16.vlgmr.msra.gmra.mxu2 %v9683_v26  ;;  %v7641_v30 = vld [vmem:[#allocation11 + $0x1a0] sm:$0xf0]  ;;  %v9099_v2 = vld [vmem:[#allocation11 + $0x61c] sm:$0xf0] }
 0x597   :  { %5275 = vmatpush.bf16.msra.mxu0 %v7928_v24  ;;  %5301 = vmatpush.bf16.msra.mxu2 %v8440_v10  ;;  %v7735_v24 = vld [vmem:[#allocation11 + $0x240] sm:$0xf]  ;;  %v7448_v10 = vor.u32 %v8907_v17, %v7447_v14  ;;  %v7644_v34 = vor.u32 %v8951_v29, %v7641_v30  ;;  %v8216_v4 = vor.u32 %v9099_v2, %v8215_v1  ;;  %v9079_v20 = vld [vmem:[#allocation11 + $0x584] sm:$0xf] }
 0x598   :  { %v7736_v28 = vor.u32 %v8979_v25, %v7735_v24  ;;  %v8983_v14 = vld [vmem:[#allocation11 + $0x284] sm:$0xf]  ;;  %v8124_v24 = vor.u32 %v9071_v18, %v8121_v19 }
 0x599   :  { %5264 = vmatpush.bf16.msra.mxu3 %v7608_v31  ;;  %5290 = vmatpush.bf16.msra.mxu1 %v8120_v33  ;;  %v8971_v31 = vld [vmem:[#allocation11 + $0x21c] sm:$0xf0]  ;;  %v7929_v33 = vld [vmem:[#allocation11 + $0x3e0] sm:$0xf0] }
 0x59a   :  { %v7932_v32 = vor.u32 %v9023_v16, %v7929_v33  ;;  %v9143_v25 = vld [vmem:[#allocation11 + $0x784] sm:$0xf] }
 0x59b   :  { %5276 = vmatpush.bf16.msra.mxu0 %v7896_v41  ;;  %5302 = vmatpush.bf16.msra.mxu2 %v8408_v40  ;;  %v7609_v41 = vld [vmem:[#allocation11 + $0x160] sm:$0xf0] }
 0x59c   :  { %v9015_v40 = vld [vmem:[#allocation11 + $0x384] sm:$0xf]  ;;  %v7612_v43 = vor.u32 %v8943_v36, %v7609_v41 }
 0x59d   :  { %5265 = vmatpush.bf16.msra.mxu3 %v7576_v45  ;;  %5291 = vmatpush.bf16.msra.mxu1 %v8088_v47  ;;  %v7900_v44 = vor.u32 %v9015_v40, %v7897_v15  ;;  %v8935_v45 = vld [vmem:[#allocation11 + $0x104] sm:$0xf] }
 0x59e   :  { %v9007_v47 = vld [vmem:[#allocation11 + $0x344] sm:$0xf]  ;;  %v7580_v52 = vor.u32 %v8935_v45, %v7577_v46 }
 0x59f   :  { %5277 = vmatpush.bf16.msra.mxu0 %v7864_v50  ;;  %5303 = vmatpush.bf16.msra.mxu2 %v8376_v37  ;;  %v7868_v49 = vor.u32 %v9007_v47, %v7865_v48  ;;  %v7959_v50 = vld [vmem:[#allocation11 + $0x400] sm:$0xf]  ;;  %v7449_v29 = vld [vmem:[#allocation11 + $0x20] sm:$0xf0] }
 0x5a0   :  { %3652 = vmatmul.bf16.vlgmr.msrb.gmra.mxu3 %v9679_v7  ;;  %3678 = vmatmul.bf16.vlgmr.msrb.gmra.mxu1 %v9679_v7  ;;  %v7480_v7 = vor.u32 %v8915_v9, %v7479_v5  ;;  %v8247_v37 = vld [vmem:[#allocation11 + $0x640] sm:$0xf]  ;;  %v7960_v53 = vor.u32 %v9035_v51, %v7959_v50  ;;  %v7513_v5 = vld [vmem:[#allocation11 + $0xa0] sm:$0xf0] }
 0x5a1   :  { %5266 = vmatpush.bf16.msra.mxu3 %v7544_v56  ;;  %5292 = vmatpush.bf16.msra.mxu1 %v8056_v58  ;;  %v7545_v56 = vld [vmem:[#allocation11 + $0xe0] sm:$0xf0]  ;;  %v8248_v57 = vor.u32 %v9107_v54, %v8247_v37 }
 0x5a2   :  { %v7548_v58 = vor.u32 %v8927_v55, %v7545_v56  ;;  %v8975_v30 = vld [vmem:[#allocation11 + $0x244] sm:$0xf] }
 0x5a3   :  { %5278 = vmatpush.bf16.msra.mxu0 %v7832_v62  ;;  %5304 = vmatpush.bf16.msra.mxu2 %v8344_v0  ;;  %v7836_v62 = vor.u32 %v8999_v59, %v7833_v60  ;;  %v8188_v0 = vor.u32 %v9087_v61, %v8185_v63  ;;  %v9063_v16 = vld [vmem:[#allocation11 + $0x504] sm:$0xf] }
 0x5a4   :  { %v8089_v33 = vld [vmem:[#allocation11 + $0x520] sm:$0xf0] }
 0x5a5   :  { %5267 = vmatpush.bf16.msra.mxu3 %v7512_v3  ;;  %5293 = vmatpush.bf16.msra.mxu1 %v8024_v8  ;;  %v8919_v3 = vld [vmem:[#allocation11 + $0x84] sm:$0xf] }
 0x5a6   :  { %3665 = vmatmul.bf16.vlgmr.msrb.gmra.mxu0 %v9683_v26  ;;  %3691 = vmatmul.bf16.vlgmr.msrb.gmra.mxu2 %v9683_v26  ;;  %v7703_v26 = vld [vmem:[#allocation11 + $0x200] sm:$0xf]  ;;  %v8991_v8 = vld [vmem:[#allocation11 + $0x2c4] sm:$0xf]  ;;  %v7516_v9 = vor.u32 %v8919_v3, %v7513_v5 }
 0x5a7   :  { %5279 = vmatpush.bf16.msra.mxu0 %v7800_v6  ;;  %5305 = vmatpush.bf16.msra.mxu2 %v8312_v11  ;;  %v7704_v35 = vor.u32 %v8971_v31, %v7703_v26  ;;  %v8153_v6 = vld [vmem:[#allocation11 + $0x5a0] sm:$0xf0]  ;;  %v7804_v21 = vor.u32 %v8991_v8, %v7801_v22  ;;  %v9694_v3 = vld [vmem:[%s9813_s23] sm:$0xf] }
 0x5a8   :  { %v8156_v11 = vor.u32 %v9079_v20, %v8153_v6  ;;  %v7737_v31 = vld [vmem:[#allocation11 + $0x260] sm:$0xf0]  ;;  %v3264_v5 = vperm.slane %v9694_v3, 0 }
 0x5a9   :  { %5268 = vmatpush.bf16.msra.mxu3 %v7480_v7  ;;  %5294 = vmatpush.bf16.msra.mxu1 %v7992_v13  ;;  %v8911_v7 = vld [vmem:[#allocation11 + $0x44] sm:$0xf] }
 0x5aa   :  { %v7481_v13 = vld [vmem:[#allocation11 + $0x60] sm:$0xf0] }
 0x5ab   :  { %5280 = vmatpush.bf16.msra.mxu0 %v7768_v38  ;;  %5306 = vmatpush.bf16.msra.mxu2 %v8280_v23  ;;  %v7484_v17 = vor.u32 %v8911_v7, %v7481_v13  ;;  %v7769_v38 = vld [vmem:[#allocation11 + $0x2a0] sm:$0xf0]  ;;  %v7679_v13 = vld [vmem:[#allocation11 + $0x1c8] sm:$0xf] }
 0x5ac   :  { %v7772_v23 = vor.u32 %v8983_v14, %v7769_v38  ;;  %v9135_v36 = vld [vmem:[#allocation11 + $0x744] sm:$0xf]  ;;  %v8964_v14 = vld [vmem:[#allocation11 + $0x1e4] sm:$0xf0] }
 0x5ad   :  { %5269 = vmatpush.bf16.msra.mxu3 %v7448_v10  ;;  %5295 = vmatpush.bf16.msra.mxu1 %v7960_v53  ;;  %v8409_v10 = vld [vmem:[#allocation11 + $0x7a0] sm:$0xf0] }
 0x5ae   :  { %v8377_v41 = vld [vmem:[#allocation11 + $0x760] sm:$0xf0] }
 0x5af   :  { %5281 = vmatpush.bf16.msra.mxu0 %v7736_v28  ;;  %5307 = vmatpush.bf16.msra.mxu2 %v8248_v57  ;;  %v8903_v28 = vld [vmem:[#allocation11 + $0x4] sm:$0xf] }
 0x5b0   :  { %v7452_v26 = vor.u32 %v8903_v28, %v7449_v29  ;;  %v8967_v40 = vld [vmem:[#allocation11 + $0x204] sm:$0xf]  ;;  %v7935_v29 = vld [vmem:[#allocation11 + $0x3c8] sm:$0xf] }
 0x5b1   :  { %5314 = vmatpush.bf16.msrb.mxu3 %v7676_v27  ;;  %5340 = vmatpush.bf16.msrb.mxu1 %v8188_v0  ;;  %v8412_v27 = vor.u32 %v9143_v25, %v8409_v10  ;;  %v7705_v15 = vld [vmem:[#allocation11 + $0x220] sm:$0xf0]  ;;  %v7647_v25 = vld [vmem:[#allocation11 + $0x188] sm:$0xf] }
 0x5b2   :  { %v8057_v45 = vld [vmem:[#allocation11 + $0x4e0] sm:$0xf0]  ;;  %v8956_v10 = vld [vmem:[#allocation11 + $0x1a4] sm:$0xf0] }
 0x5b3   :  { %5282 = vmatpush.bf16.msra.mxu0 %v7704_v35  ;;  %5308 = vmatpush.bf16.msra.mxu2 %v8216_v4  ;;  %v8092_v35 = vor.u32 %v9063_v16, %v8089_v33  ;;  %v9127_v46 = vld [vmem:[#allocation11 + $0x704] sm:$0xf]  ;;  %v7648_v16 = vor.u32 %v8956_v10, %v7647_v25  ;;  %v7775_v10 = vld [vmem:[#allocation11 + $0x288] sm:$0xf] }
 0x5b4   :  { %v8345_v47 = vld [vmem:[#allocation11 + $0x720] sm:$0xf0] }
 0x5b5   :  { %5315 = vmatpush.bf16.msrb.mxu3 %v7644_v34  ;;  %5341 = vmatpush.bf16.msrb.mxu1 %v8156_v11  ;;  %v7740_v34 = vor.u32 %v8975_v30, %v7737_v31  ;;  %v8348_v48 = vor.u32 %v9127_v46, %v8345_v47  ;;  %v8025_v50 = vld [vmem:[#allocation11 + $0x4a0] sm:$0xf0]  ;;  %v9028_v30 = vld [vmem:[#allocation11 + $0x3e4] sm:$0xf0] }
 0x5b6   :  { %v9119_v37 = vld [vmem:[#allocation11 + $0x6c4] sm:$0xf]  ;;  %v7936_v33 = vor.u32 %v9028_v30, %v7935_v29  ;;  %v8127_v29 = vld [vmem:[#allocation11 + $0x548] sm:$0xf] }
 0x5b7   :  { %5327 = vmatpush.bf16.msrb.mxu0 %v7932_v32  ;;  %5353 = vmatpush.bf16.msrb.mxu2 %v8444_v42  ;;  %v8380_v32 = vor.u32 %v9135_v36, %v8377_v41  ;;  %v8313_v53 = vld [vmem:[#allocation11 + $0x6e0] sm:$0xf0]  ;;  %v8948_v41 = vld [vmem:[#allocation11 + $0x164] sm:$0xf0] }
 0x5b8   :  { %v8316_v54 = vor.u32 %v9119_v37, %v8313_v53  ;;  %v9039_v55 = vld [vmem:[#allocation11 + $0x444] sm:$0xf] }
 0x5b9   :  { %5316 = vmatpush.bf16.msrb.mxu3 %v7612_v43  ;;  %5342 = vmatpush.bf16.msrb.mxu1 %v8124_v24  ;;  %v9055_v43 = vld [vmem:[#allocation11 + $0x4c4] sm:$0xf]  ;;  %v7680_v24 = vor.u32 %v8964_v14, %v7679_v13  ;;  %v9156_v13 = vld [vmem:[#allocation11 + $0x7e4] sm:$0xf0] }
 0x5ba   :  { %v7993_v56 = vld [vmem:[#allocation11 + $0x460] sm:$0xf0] }
 0x5bb   :  { %5328 = vmatpush.bf16.msrb.mxu0 %v7900_v44  ;;  %5354 = vmatpush.bf16.msrb.mxu2 %v8412_v27  ;;  %v7708_v44 = vor.u32 %v8967_v40, %v7705_v15  ;;  %v9111_v57 = vld [vmem:[#allocation11 + $0x684] sm:$0xf]  ;;  %v9020_v40 = vld [vmem:[#allocation11 + $0x3a4] sm:$0xf0] }
 0x5bc   :  { %v8281_v59 = vld [vmem:[#allocation11 + $0x6a0] sm:$0xf0] }
 0x5bd   :  { %5317 = vmatpush.bf16.msrb.mxu3 %v7580_v52  ;;  %5343 = vmatpush.bf16.msrb.mxu1 %v8092_v35  ;;  %v8060_v52 = vor.u32 %v9055_v43, %v8057_v45  ;;  %v8284_v60 = vor.u32 %v9111_v57, %v8281_v59  ;;  %v9031_v61 = vld [vmem:[#allocation11 + $0x404] sm:$0xf]  ;;  %v7615_v35 = vld [vmem:[#allocation11 + $0x148] sm:$0xf]  ;;  %v3267_v43 = vperm.slane %v9694_v3, 3 }
 0x5be   :  { %v9103_v63 = vld [vmem:[#allocation11 + $0x644] sm:$0xf]  ;;  %v7616_v46 = vor.u32 %v8948_v41, %v7615_v35  ;;  %v8932_v57 = vld [vmem:[#allocation11 + $0xe4] sm:$0xf0] }
 0x5bf   :  { %5329 = vmatpush.bf16.msrb.mxu0 %v7868_v49  ;;  %5355 = vmatpush.bf16.msrb.mxu2 %v8380_v32  ;;  %v9047_v49 = vld [vmem:[#allocation11 + $0x484] sm:$0xf]  ;;  %v7903_v32 = vld [vmem:[#allocation11 + $0x388] sm:$0xf] }
 0x5c0   :  { %v8028_v51 = vor.u32 %v9047_v49, %v8025_v50  ;;  %v8249_v1 = vld [vmem:[#allocation11 + $0x660] sm:$0xf0]  ;;  %v7904_v47 = vor.u32 %v9020_v40, %v7903_v32  ;;  %v8940_v49 = vld [vmem:[#allocation11 + $0x124] sm:$0xf0] }
 0x5c1   :  { %5318 = vmatpush.bf16.msrb.mxu3 %v7548_v58  ;;  %5344 = vmatpush.bf16.msrb.mxu1 %v8060_v52  ;;  %v7996_v58 = vor.u32 %v9039_v55, %v7993_v56  ;;  %v8252_v4 = vor.u32 %v9103_v63, %v8249_v1  ;;  %v9095_v8 = vld [vmem:[#allocation11 + $0x604] sm:$0xf]  ;;  %v7583_v52 = vld [vmem:[#allocation11 + $0x108] sm:$0xf] }
 0x5c2   :  { %v7871_v50 = vld [vmem:[#allocation11 + $0x348] sm:$0xf] }
 0x5c3   :  { %5330 = vmatpush.bf16.msrb.mxu0 %v7836_v62  ;;  %5356 = vmatpush.bf16.msrb.mxu2 %v8348_v48  ;;  %v7961_v62 = vld [vmem:[#allocation11 + $0x420] sm:$0xf0]  ;;  %v7551_v56 = vld [vmem:[#allocation11 + $0xc8] sm:$0xf] }
 0x5c4   :  { %v7964_v0 = vor.u32 %v9031_v61, %v7961_v62  ;;  %v9004_v61 = vld [vmem:[#allocation11 + $0x324] sm:$0xf0] }
 0x5c5   :  { %5319 = vmatpush.bf16.msrb.mxu3 %v7516_v9  ;;  %5345 = vmatpush.bf16.msrb.mxu1 %v8028_v51  ;;  %v8217_v9 = vld [vmem:[#allocation11 + $0x620] sm:$0xf0]  ;;  %v9012_v51 = vld [vmem:[#allocation11 + $0x364] sm:$0xf0] }
 0x5c6   :  { %v8220_v22 = vor.u32 %v9095_v8, %v8217_v9  ;;  %v7872_v55 = vor.u32 %v9012_v51, %v7871_v50  ;;  %v8191_v63 = vld [vmem:[#allocation11 + $0x5c8] sm:$0xf] }
 0x5c7   :  { %5331 = vmatpush.bf16.msrb.mxu0 %v7804_v21  ;;  %5357 = vmatpush.bf16.msrb.mxu2 %v8316_v54  ;;  %v3265_v21 = vperm.slane %v9694_v3, 1  ;;  %v7584_v54 = vor.u32 %v8940_v49, %v7583_v52  ;;  %v7519_v9 = vld [vmem:[#allocation11 + $0x88] sm:$0xf]  ;;  %v8960_v52 = vld [vmem:[#allocation11 + $0x1cc] sm:$0xf] }
 0x5c8   :  { %v7455_v35 = vld [vmem:[#allocation11 + $0x8] sm:$0xf] }
 0x5c9   :  { %5320 = vmatpush.bf16.msrb.mxu3 %v7484_v17  ;;  %5346 = vmatpush.bf16.msrb.mxu1 %v7996_v58  ;;  %v8908_v41 = vld [vmem:[#allocation11 + $0x24] sm:$0xf0] }
 0x5ca   :  { %v7456_v49 = vor.u32 %v8908_v41, %v7455_v35  ;;  %v7711_v51 = vld [vmem:[#allocation11 + $0x208] sm:$0xf]  ;;  %v8928_v35 = vld [vmem:[#allocation11 + $0xcc] sm:$0xf] }
 0x5cb   :  { %5332 = vmatpush.bf16.msrb.mxu0 %v7772_v23  ;;  %5358 = vmatpush.bf16.msrb.mxu2 %v8284_v60  ;;  %v7839_v60 = vld [vmem:[#allocation11 + $0x308] sm:$0xf]  ;;  %v7553_v41 = vld [vmem:[#allocation11 + $0xe8] sm:$0xf0] }
 0x5cc   :  { %v7840_v8 = vor.u32 %v9004_v61, %v7839_v60  ;;  %v8952_v60 = vld [vmem:[#allocation11 + $0x18c] sm:$0xf] }
 0x5cd   :  { %5321 = vmatpush.bf16.msrb.mxu3 %v7452_v26  ;;  %5347 = vmatpush.bf16.msrb.mxu1 %v7964_v0  ;;  %v9092_v0 = vld [vmem:[#allocation11 + $0x5e4] sm:$0xf0]  ;;  %v7649_v61 = vld [vmem:[#allocation11 + $0x1a8] sm:$0xf0] }
 0x5cf   :  { %5333 = vmatpush.bf16.msrb.mxu0 %v7740_v34  ;;  %5359 = vmatpush.bf16.msrb.mxu2 %v8252_v4  ;;  %v3266_v34 = vperm.slane %v9694_v3, 2 }
 0x5d3   :  { %5334 = vmatpush.bf16.msrb.mxu0 %v7708_v44  ;;  %5360 = vmatpush.bf16.msrb.mxu2 %v8220_v22  ;;  %v8924_v22 = vld [vmem:[#allocation11 + $0xa4] sm:$0xf0] }
 0x60d   :  { %v3627_v2 = vpop.f32.mrf.mxu1 }
 0x60e   :  { %v3628_v42 = vadd.f32 %v3627_v2, %v3265_v21 }
 0x613   :  { %v3601_v20 = vpop.f32.mrf.mxu3  ;;  %v3614_v6 = vpop.f32.mrf.mxu0 }
 0x614   :  { %v3602_v11 = vadd.f32 %v3601_v20, %v3264_v5  ;;  %v7552_v5 = vor.u32 %v8932_v57, %v7551_v56  ;;  %v7807_v20 = vld [vmem:[#allocation11 + $0x2c8] sm:$0xf] }
 0x615   :  { %v3629_v39 = vpop.f32.mrf.mxu1  ;;  %v9060_v56 = vld [vmem:[#allocation11 + $0x4e4] sm:$0xf0] }
 0x616   :  { %v3615_v12 = vadd.f32 %v3614_v6, %v3602_v11  ;;  %v8192_v11 = vor.u32 %v9092_v0, %v8191_v63  ;;  %v8996_v39 = vld [vmem:[#allocation11 + $0x2e4] sm:$0xf0]  ;;  %v7937_v63 = vld [vmem:[#allocation11 + $0x3e8] sm:$0xf0] }
 0x618   :  { %v3696_v7 = vmul.f32 0.2, %v3615_v12 }
 0x619   :  { %v3640_v17 = vpop.f32.mrf.mxu2 }
 0x61a   :  { %v3700_v38 = vmax.f32 %v3615_v12, %v3696_v7  ;;  %v3641_v18 = vadd.f32 %v3640_v17, %v3628_v42  ;;  %v8159_v12 = vld [vmem:[#allocation11 + $0x588] sm:$0xf]  ;;  %v7520_v17 = vor.u32 %v8924_v22, %v7519_v9 }
 0x61b   :  { %v3603_v19 = vpop.f32.mrf.mxu3  ;;  %v3616_v23 = vpop.f32.mrf.mxu0  ;;  %v9084_v42 = vld [vmem:[#allocation11 + $0x5a4] sm:$0xf0] }
 0x61c   :  { %v9698_v27 = vpack.c.bf16 %v3700_v38, %v3700_v38  ;;  %v3697_v28 = vmul.f32 0.2, %v3641_v18  ;;  %v8447_v7 = vld [vmem:[#allocation11 + $0x7c8] sm:$0xf]  ;;  %v7808_v38 = vor.u32 %v8996_v39, %v7807_v20  ;;  %v8944_v20 = vld [vmem:[#allocation11 + $0x14c] sm:$0xf] }
 0x61d   :  { %v3679_v26 = vpop.f32.mrf.mxu1  ;;  %v8916_v19 = vld [vmem:[#allocation11 + $0x64] sm:$0xf0]  ;;  %v8448_v25 = vor.u32 %v9156_v13, %v8447_v7  ;;  %v7905_v39 = vld [vmem:[#allocation11 + $0x3a8] sm:$0xf0] }
 0x61e   :  { %v3701_v31 = vmax.f32 %v3641_v18, %v3697_v28  ;;  %5270 = vmatmul.bf16.vlgmr.msra.gmra.mxu3 %v9698_v27  ;;  %v3680_v58 = vadd.f32 %v3679_v26, %v3267_v43  ;;  %v7487_v18 = vld [vmem:[#allocation11 + $0x48] sm:$0xf] }
 0x61f   :  { %5366 = vmatpush.bf16.msra.mxu3 %v7680_v24  ;;  %v8160_v24 = vor.u32 %v9084_v42, %v8159_v12  ;;  %v8988_v28 = vld [vmem:[#allocation11 + $0x2a4] sm:$0xf0] }
 0x620   :  { %v9702_v36 = vpack.c.bf16 %v3701_v31, %v3701_v31  ;;  %v9076_v26 = vld [vmem:[#allocation11 + $0x564] sm:$0xf0] }
 0x621   :  { %v3642_v15 = vpop.f32.mrf.mxu2  ;;  %v8415_v31 = vld [vmem:[#allocation11 + $0x788] sm:$0xf]  ;;  %v8128_v32 = vor.u32 %v9076_v26, %v8127_v29 }
 0x622   :  { %5283 = vmatmul.bf16.vlgmr.msra.gmra.mxu0 %v9702_v36  ;;  %v7743_v15 = vld [vmem:[#allocation11 + $0x248] sm:$0xf] }
 0x623   :  { %5367 = vmatpush.bf16.msra.mxu3 %v7648_v16  ;;  %5379 = vmatpush.bf16.msra.mxu0 %v7936_v33  ;;  %v3653_v44 = vpop.f32.mrf.mxu3  ;;  %v3666_v45 = vpop.f32.mrf.mxu0  ;;  %v9148_v16 = vld [vmem:[#allocation11 + $0x7a4] sm:$0xf0]  ;;  %v7488_v33 = vor.u32 %v8916_v19, %v7487_v18  ;;  %v8936_v19 = vld [vmem:[#allocation11 + $0x10c] sm:$0xf] }
 0x624   :  { %v3654_v48 = vadd.f32 %v3653_v44, %v3266_v34  ;;  %v7776_v34 = vor.u32 %v8988_v28, %v7775_v10  ;;  %v8416_v40 = vor.u32 %v9148_v16, %v8415_v31  ;;  %v8980_v43 = vld [vmem:[#allocation11 + $0x264] sm:$0xf0]  ;;  %v7873_v10 = vld [vmem:[#allocation11 + $0x368] sm:$0xf0] }
 0x625   :  { %v3681_v37 = vpop.f32.mrf.mxu1  ;;  %v8095_v44 = vld [vmem:[#allocation11 + $0x508] sm:$0xf]  ;;  %v7744_v50 = vor.u32 %v8980_v43, %v7743_v15  ;;  %v9088_v15 = vld [vmem:[#allocation11 + $0x5cc] sm:$0xf] }
 0x626   :  { %v3667_v53 = vadd.f32 %v3666_v45, %v3654_v48  ;;  %v9068_v45 = vld [vmem:[#allocation11 + $0x524] sm:$0xf0]  ;;  %v7681_v48 = vld [vmem:[#allocation11 + $0x1e8] sm:$0xf0] }
 0x627   :  { %5368 = vmatpush.bf16.msra.mxu3 %v7616_v46  ;;  %5380 = vmatpush.bf16.msra.mxu0 %v7904_v47  ;;  %v8383_v46 = vld [vmem:[#allocation11 + $0x748] sm:$0xf]  ;;  %v8096_v37 = vor.u32 %v9068_v45, %v8095_v44  ;;  %v7684_v57 = vor.u32 %v8960_v52, %v7681_v48  ;;  %v8193_v43 = vld [vmem:[#allocation11 + $0x5e8] sm:$0xf0] }
 0x628   :  { %v3698_v59 = vmul.f32 0.2, %v3667_v53  ;;  %v9140_v47 = vld [vmem:[#allocation11 + $0x764] sm:$0xf0] }
 0x629   :  { %v3692_v62 = vpop.f32.mrf.mxu2  ;;  %v8319_v9 = vld [vmem:[#allocation11 + $0x6c8] sm:$0xf] }
 0x62a   :  { %v3702_v1 = vmax.f32 %v3667_v53, %v3698_v59  ;;  %v3693_v2 = vadd.f32 %v3692_v62, %v3680_v58  ;;  %v8384_v53 = vor.u32 %v9140_v47, %v8383_v46  ;;  %v8351_v58 = vld [vmem:[#allocation11 + $0x708] sm:$0xf]  ;;  %v9024_v62 = vld [vmem:[#allocation11 + $0x3cc] sm:$0xf]  ;;  %v7556_v47 = vor.u32 %v8928_v35, %v7553_v41  ;;  %v8957_v35 = vld [vmem:[#allocation11 + $0x1ac] sm:$0xf0] }
 0x62b   :  { %5369 = vmatpush.bf16.msra.mxu3 %v7584_v54  ;;  %5381 = vmatpush.bf16.msra.mxu0 %v7872_v55  ;;  %v3655_v4 = vpop.f32.mrf.mxu3  ;;  %v3668_v3 = vpop.f32.mrf.mxu0  ;;  %v8972_v54 = vld [vmem:[#allocation11 + $0x224] sm:$0xf0]  ;;  %v7943_v41 = vld [vmem:[#allocation11 + $0x3d0] sm:$0xf] }
 0x62c   :  { %v9706_v6 = vpack.c.bf16 %v3702_v1, %v3702_v1  ;;  %v3699_v21 = vmul.f32 0.2, %v3693_v2  ;;  %v8063_v55 = vld [vmem:[#allocation11 + $0x4c8] sm:$0xf]  ;;  %v7712_v0 = vor.u32 %v8972_v54, %v7711_v51  ;;  %v8196_v51 = vor.u32 %v9088_v15, %v8193_v43  ;;  %v9080_v54 = vld [vmem:[#allocation11 + $0x58c] sm:$0xf] }
 0x62d   :  { %v9132_v59 = vld [vmem:[#allocation11 + $0x724] sm:$0xf0]  ;;  %v8064_v1 = vor.u32 %v9060_v56, %v8063_v55  ;;  %v8161_v55 = vld [vmem:[#allocation11 + $0x5a8] sm:$0xf0] }
 0x62e   :  { %v3703_v14 = vmax.f32 %v3693_v2, %v3699_v21  ;;  %5296 = vmatmul.bf16.vlgmr.msra.gmra.mxu1 %v9706_v6  ;;  %5322 = vmatmul.bf16.vlgmr.msrb.gmra.mxu3 %v9698_v27  ;;  %v8352_v2 = vor.u32 %v9132_v59, %v8351_v58  ;;  %v8031_v4 = vld [vmem:[#allocation11 + $0x488] sm:$0xf]  ;;  %v7617_v21 = vld [vmem:[#allocation11 + $0x168] sm:$0xf0] }
 0x62f   :  { %5370 = vmatpush.bf16.msra.mxu3 %v7552_v5  ;;  %5382 = vmatpush.bf16.msra.mxu0 %v7840_v8  ;;  %v9052_v3 = vld [vmem:[#allocation11 + $0x4a4] sm:$0xf0]  ;;  %v7652_v5 = vor.u32 %v8952_v60, %v7649_v61  ;;  %v7940_v8 = vor.u32 %v9024_v62, %v7937_v63  ;;  %v9152_v56 = vld [vmem:[#allocation11 + $0x7cc] sm:$0xf]  ;;  %v8164_v63 = vor.u32 %v9080_v54, %v8161_v55 }
 0x630   :  { %v9710_v23 = vpack.c.bf16 %v3703_v14, %v3703_v14  ;;  %5392 = vmatpush.bf16.msra.mxu1 %v8192_v11  ;;  %v9124_v22 = vld [vmem:[#allocation11 + $0x6e4] sm:$0xf0]  ;;  %v9016_v11 = vld [vmem:[#allocation11 + $0x38c] sm:$0xf]  ;;  %v8032_v12 = vor.u32 %v9052_v3, %v8031_v4  ;;  %v7620_v14 = vor.u32 %v8944_v20, %v7617_v21 }
 0x631   :  { %v3694_v30 = vpop.f32.mrf.mxu2  ;;  %v8320_v42 = vor.u32 %v9124_v22, %v8319_v9  ;;  %v7999_v7 = vld [vmem:[#allocation11 + $0x448] sm:$0xf]  ;;  %v8912_v61 = vld [vmem:[#allocation11 + $0x4c] sm:$0xf] }
 0x632   :  { %5309 = vmatmul.bf16.vlgmr.msra.gmra.mxu2 %v9710_v23  ;;  %5335 = vmatmul.bf16.vlgmr.msrb.gmra.mxu0 %v9702_v36  ;;  %v9044_v13 = vld [vmem:[#allocation11 + $0x464] sm:$0xf0]  ;;  %v7489_v62 = vld [vmem:[#allocation11 + $0x68] sm:$0xf0] }
 0x633   :  { %5371 = vmatpush.bf16.msra.mxu3 %v7520_v17  ;;  %5383 = vmatpush.bf16.msra.mxu0 %v7808_v38  ;;  %v7908_v17 = vor.u32 %v9016_v11, %v7905_v39  ;;  %v8287_v38 = vld [vmem:[#allocation11 + $0x688] sm:$0xf]  ;;  %v8000_v28 = vor.u32 %v9044_v13, %v7999_v7  ;;  %v9072_v4 = vld [vmem:[#allocation11 + $0x54c] sm:$0xf]  ;;  %v7492_v9 = vor.u32 %v8912_v61, %v7489_v62  ;;  %v7591_v61 = vld [vmem:[#allocation11 + $0x110] sm:$0xf] }
 0x634   :  { %5393 = vmatpush.bf16.msra.mxu1 %v8160_v24  ;;  %5405 = vmatpush.bf16.msra.mxu2 %v8448_v25  ;;  %v9116_v18 = vld [vmem:[#allocation11 + $0x6a4] sm:$0xf0]  ;;  %v7585_v24 = vld [vmem:[#allocation11 + $0x128] sm:$0xf0]  ;;  %v8941_v62 = vld [vmem:[#allocation11 + $0x12c] sm:$0xf0] }
 0x635   :  { %v9008_v25 = vld [vmem:[#allocation11 + $0x34c] sm:$0xf]  ;;  %v8288_v29 = vor.u32 %v9116_v18, %v8287_v38  ;;  %v7967_v30 = vld [vmem:[#allocation11 + $0x408] sm:$0xf]  ;;  %v7588_v31 = vor.u32 %v8936_v19, %v7585_v24  ;;  %v7687_v38 = vld [vmem:[#allocation11 + $0x1d0] sm:$0xf] }
 0x636   :  { %v9036_v26 = vld [vmem:[#allocation11 + $0x424] sm:$0xf0]  ;;  %v7876_v16 = vor.u32 %v9008_v25, %v7873_v10  ;;  %v8129_v3 = vld [vmem:[#allocation11 + $0x568] sm:$0xf0]  ;;  %v8965_v18 = vld [vmem:[#allocation11 + $0x1ec] sm:$0xf0] }
 0x637   :  { %5372 = vmatpush.bf16.msra.mxu3 %v7488_v33  ;;  %5384 = vmatpush.bf16.msra.mxu0 %v7776_v34  ;;  %v8255_v33 = vld [vmem:[#allocation11 + $0x648] sm:$0xf]  ;;  %v7968_v44 = vor.u32 %v9036_v26, %v7967_v30  ;;  %v8904_v20 = vld [vmem:[#allocation11 + $0xc] sm:$0xf]  ;;  %v8132_v11 = vor.u32 %v9072_v4, %v8129_v3 }
 0x638   :  { %5394 = vmatpush.bf16.msra.mxu1 %v8128_v32  ;;  %5406 = vmatpush.bf16.msra.mxu2 %v8416_v40  ;;  %v9108_v34 = vld [vmem:[#allocation11 + $0x664] sm:$0xf0]  ;;  %v9000_v32 = vld [vmem:[#allocation11 + $0x30c] sm:$0xf] }
 0x639   :  { %v7841_v40 = vld [vmem:[#allocation11 + $0x328] sm:$0xf0]  ;;  %v8256_v45 = vor.u32 %v9108_v34, %v8255_v33  ;;  %v8223_v46 = vld [vmem:[#allocation11 + $0x608] sm:$0xf]  ;;  %v7655_v34 = vld [vmem:[#allocation11 + $0x190] sm:$0xf] }
 0x63a   :  { %v7844_v52 = vor.u32 %v9000_v32, %v7841_v40  ;;  %v9100_v48 = vld [vmem:[#allocation11 + $0x624] sm:$0xf0]  ;;  %v7457_v21 = vld [vmem:[#allocation11 + $0x28] sm:$0xf0]  ;;  %v9029_v32 = vld [vmem:[#allocation11 + $0x3ec] sm:$0xf0] }
 0x63b   :  { %5373 = vmatpush.bf16.msra.mxu3 %v7456_v49  ;;  %5385 = vmatpush.bf16.msra.mxu0 %v7744_v50  ;;  %v8920_v49 = vld [vmem:[#allocation11 + $0x8c] sm:$0xf]  ;;  %v8224_v58 = vor.u32 %v9100_v48, %v8223_v46  ;;  %v7460_v19 = vor.u32 %v8904_v20, %v7457_v21  ;;  %v7656_v46 = vor.u32 %v8957_v35, %v7655_v34  ;;  %v7559_v20 = vld [vmem:[#allocation11 + $0xd0] sm:$0xf] }
 0x63c   :  { %5395 = vmatpush.bf16.msra.mxu1 %v8096_v37  ;;  %5407 = vmatpush.bf16.msra.mxu2 %v8384_v53  ;;  %v7521_v50 = vld [vmem:[#allocation11 + $0xa8] sm:$0xf0]  ;;  %v8933_v21 = vld [vmem:[#allocation11 + $0xec] sm:$0xf0] }
 0x63d   :  { %v8992_v37 = vld [vmem:[#allocation11 + $0x2cc] sm:$0xf]  ;;  %v7524_v59 = vor.u32 %v8920_v49, %v7521_v50  ;;  %v7623_v49 = vld [vmem:[#allocation11 + $0x150] sm:$0xf] }
 0x63e   :  { %5348 = vmatmul.bf16.vlgmr.msrb.gmra.mxu1 %v9706_v6  ;;  %5374 = vmatmul.bf16.vlgmr.msra.gmra.mxu3 %v9698_v27  ;;  %v7809_v53 = vld [vmem:[#allocation11 + $0x2e8] sm:$0xf0]  ;;  %v8949_v50 = vld [vmem:[#allocation11 + $0x16c] sm:$0xf0] }
 0x63f   :  { %5418 = vmatpush.bf16.msrb.mxu3 %v7684_v57  ;;  %5386 = vmatpush.bf16.msra.mxu0 %v7712_v0  ;;  %v8449_v57 = vld [vmem:[#allocation11 + $0x7e8] sm:$0xf0]  ;;  %v7812_v60 = vor.u32 %v8992_v37, %v7809_v53  ;;  %v9021_v37 = vld [vmem:[#allocation11 + $0x3ac] sm:$0xf0] }
 0x640   :  { %5396 = vmatpush.bf16.msra.mxu1 %v8064_v1  ;;  %5408 = vmatpush.bf16.msra.mxu2 %v8352_v2  ;;  %v8452_v0 = vor.u32 %v9152_v56, %v8449_v57  ;;  %v8984_v1 = vld [vmem:[#allocation11 + $0x28c] sm:$0xf]  ;;  %v7624_v57 = vor.u32 %v8949_v50, %v7623_v49  ;;  %v7495_v35 = vld [vmem:[#allocation11 + $0x50] sm:$0xf] }
 0x641   :  { %v7777_v2 = vld [vmem:[#allocation11 + $0x2a8] sm:$0xf0]  ;;  %v7463_v49 = vld [vmem:[#allocation11 + $0x10] sm:$0xf] }
 0x642   :  { %5361 = vmatmul.bf16.vlgmr.msrb.gmra.mxu2 %v9710_v23  ;;  %5387 = vmatmul.bf16.vlgmr.msra.gmra.mxu0 %v9702_v36  ;;  %v7780_v22 = vor.u32 %v8984_v1, %v7777_v2  ;;  %v9064_v7 = vld [vmem:[#allocation11 + $0x50c] sm:$0xf]  ;;  %v8909_v50 = vld [vmem:[#allocation11 + $0x2c] sm:$0xf0] }
 0x643   :  { %5419 = vmatpush.bf16.msrb.mxu3 %v7652_v5  ;;  %5431 = vmatpush.bf16.msrb.mxu0 %v7940_v8  ;;  %v9144_v5 = vld [vmem:[#allocation11 + $0x78c] sm:$0xf] }
 0x644   :  { %5397 = vmatpush.bf16.msra.mxu1 %v8032_v12  ;;  %5409 = vmatpush.bf16.msra.mxu2 %v8320_v42  ;;  %v8417_v8 = vld [vmem:[#allocation11 + $0x7a8] sm:$0xf0] }
 0x645   :  { %v8420_v39 = vor.u32 %v9144_v5, %v8417_v8  ;;  %v8976_v12 = vld [vmem:[#allocation11 + $0x24c] sm:$0xf]  ;;  %v7592_v5 = vor.u32 %v8941_v62, %v7591_v61  ;;  %v7464_v61 = vor.u32 %v8909_v50, %v7463_v49  ;;  %v8929_v49 = vld [vmem:[#allocation11 + $0xd4] sm:$0xf] }
 0x646   :  { %v7745_v42 = vld [vmem:[#allocation11 + $0x268] sm:$0xf0]  ;;  %v7561_v50 = vld [vmem:[#allocation11 + $0xf0] sm:$0xf0] }
 0x647   :  { %5420 = vmatpush.bf16.msrb.mxu3 %v7620_v14  ;;  %5432 = vmatpush.bf16.msrb.mxu0 %v7908_v17  ;;  %v8097_v13 = vld [vmem:[#allocation11 + $0x528] sm:$0xf0]  ;;  %v7748_v24 = vor.u32 %v8976_v12, %v7745_v42  ;;  %v8199_v12 = vld [vmem:[#allocation11 + $0x5d0] sm:$0xf] }
 0x648   :  { %5398 = vmatpush.bf16.msra.mxu1 %v8000_v28  ;;  %5410 = vmatpush.bf16.msra.mxu2 %v8288_v29  ;;  %v9136_v14 = vld [vmem:[#allocation11 + $0x74c] sm:$0xf]  ;;  %v8100_v10 = vor.u32 %v9064_v7, %v8097_v13  ;;  %v9093_v42 = vld [vmem:[#allocation11 + $0x5ec] sm:$0xf0] }
 0x649   :  { %v8385_v17 = vld [vmem:[#allocation11 + $0x768] sm:$0xf0] }
 0x64a   :  { %v8968_v25 = vld [vmem:[#allocation11 + $0x20c] sm:$0xf]  ;;  %v8388_v28 = vor.u32 %v9136_v14, %v8385_v17  ;;  %v7560_v17 = vor.u32 %v8933_v21, %v7559_v20  ;;  %v7657_v20 = vld [vmem:[#allocation11 + $0x1b0] sm:$0xf0] }
 0x64b   :  { %5421 = vmatpush.bf16.msrb.mxu3 %v7588_v31  ;;  %5433 = vmatpush.bf16.msrb.mxu0 %v7876_v16  ;;  %v7713_v29 = vld [vmem:[#allocation11 + $0x228] sm:$0xf0]  ;;  %v7688_v31 = vor.u32 %v8965_v18, %v7687_v38  ;;  %v9025_v21 = vld [vmem:[#allocation11 + $0x3d4] sm:$0xf] }
 0x64c   :  { %5399 = vmatpush.bf16.msra.mxu1 %v7968_v44  ;;  %5411 = vmatpush.bf16.msra.mxu2 %v8256_v45  ;;  %v9056_v30 = vld [vmem:[#allocation11 + $0x4cc] sm:$0xf]  ;;  %v7716_v40 = vor.u32 %v8968_v25, %v7713_v29  ;;  %v8200_v25 = vor.u32 %v9093_v42, %v8199_v12  ;;  %v8167_v29 = vld [vmem:[#allocation11 + $0x590] sm:$0xf] }
 0x64d   :  { %v8065_v26 = vld [vmem:[#allocation11 + $0x4e8] sm:$0xf0] }
 0x64e   :  { %v9128_v16 = vld [vmem:[#allocation11 + $0x70c] sm:$0xf]  ;;  %v8068_v15 = vor.u32 %v9056_v30, %v8065_v26  ;;  %v9085_v30 = vld [vmem:[#allocation11 + $0x5ac] sm:$0xf0] }
 0x64f   :  { %5422 = vmatpush.bf16.msrb.mxu3 %v7556_v47  ;;  %5434 = vmatpush.bf16.msrb.mxu0 %v7844_v52  ;;  %v8353_v33 = vld [vmem:[#allocation11 + $0x728] sm:$0xf0]  ;;  %v7944_v47 = vor.u32 %v9029_v32, %v7943_v41  ;;  %v8455_v26 = vld [vmem:[#allocation11 + $0x7d0] sm:$0xf]  ;;  %v8168_v32 = vor.u32 %v9085_v30, %v8167_v29 }
 0x650   :  { %5444 = vmatpush.bf16.msrb.mxu1 %v8196_v51  ;;  %5412 = vmatpush.bf16.msra.mxu2 %v8224_v58  ;;  %v8356_v43 = vor.u32 %v9128_v16, %v8353_v33  ;;  %v9048_v44 = vld [vmem:[#allocation11 + $0x48c] sm:$0xf]  ;;  %v7911_v51 = vld [vmem:[#allocation11 + $0x390] sm:$0xf] }
 0x651   :  { %5400 = vmatmul.bf16.vlgmr.msra.gmra.mxu1 %v9706_v6  ;;  %v8033_v45 = vld [vmem:[#allocation11 + $0x4a8] sm:$0xf0]  ;;  %v7912_v58 = vor.u32 %v9021_v37, %v7911_v51  ;;  %v8917_v41 = vld [vmem:[#allocation11 + $0x6c] sm:$0xf0] }
 0x652   :  { %v9120_v52 = vld [vmem:[#allocation11 + $0x6cc] sm:$0xf]  ;;  %v8036_v53 = vor.u32 %v9048_v44, %v8033_v45  ;;  %v8135_v44 = vld [vmem:[#allocation11 + $0x550] sm:$0xf] }
 0x653   :  { %5423 = vmatpush.bf16.msrb.mxu3 %v7524_v59  ;;  %5435 = vmatpush.bf16.msrb.mxu0 %v7812_v60  ;;  %v8321_v48 = vld [vmem:[#allocation11 + $0x6e8] sm:$0xf0]  ;;  %v9077_v45 = vld [vmem:[#allocation11 + $0x56c] sm:$0xf0] }
 0x654   :  { %5445 = vmatpush.bf16.msrb.mxu1 %v8164_v63  ;;  %5457 = vmatpush.bf16.msrb.mxu2 %v8452_v0  ;;  %v8324_v54 = vor.u32 %v9120_v52, %v8321_v48  ;;  %v9040_v55 = vld [vmem:[#allocation11 + $0x44c] sm:$0xf]  ;;  %v7879_v63 = vld [vmem:[#allocation11 + $0x350] sm:$0xf]  ;;  %v7496_v52 = vor.u32 %v8917_v41, %v7495_v35  ;;  %v8136_v51 = vor.u32 %v9077_v45, %v8135_v44  ;;  %v8937_v35 = vld [vmem:[#allocation11 + $0x114] sm:$0xf] }
 0x655   :  { %5413 = vmatmul.bf16.vlgmr.msra.gmra.mxu2 %v9710_v23  ;;  %v8001_v56 = vld [vmem:[#allocation11 + $0x468] sm:$0xf0]  ;;  %v9013_v0 = vld [vmem:[#allocation11 + $0x36c] sm:$0xf0]  ;;  %v7593_v41 = vld [vmem:[#allocation11 + $0x130] sm:$0xf0] }
 0x656   :  { %v9112_v59 = vld [vmem:[#allocation11 + $0x68c] sm:$0xf]  ;;  %v8004_v1 = vor.u32 %v9040_v55, %v8001_v56  ;;  %v7880_v8 = vor.u32 %v9013_v0, %v7879_v63  ;;  %v8103_v55 = vld [vmem:[#allocation11 + $0x510] sm:$0xf] }
 0x657   :  { %5424 = vmatpush.bf16.msrb.mxu3 %v7492_v9  ;;  %5436 = vmatpush.bf16.msrb.mxu0 %v7780_v22  ;;  %v8289_v60 = vld [vmem:[#allocation11 + $0x6a8] sm:$0xf0]  ;;  %v9069_v56 = vld [vmem:[#allocation11 + $0x52c] sm:$0xf0] }
 0x658   :  { %5446 = vmatpush.bf16.msrb.mxu1 %v8132_v11  ;;  %5458 = vmatpush.bf16.msrb.mxu2 %v8420_v39  ;;  %v8292_v2 = vor.u32 %v9112_v59, %v8289_v60  ;;  %v9032_v4 = vld [vmem:[#allocation11 + $0x40c] sm:$0xf]  ;;  %v7847_v11 = vld [vmem:[#allocation11 + $0x310] sm:$0xf]  ;;  %v8961_v59 = vld [vmem:[#allocation11 + $0x1d4] sm:$0xf]  ;;  %v8104_v0 = vor.u32 %v9069_v56, %v8103_v55 }
 0x659   :  { %v7969_v3 = vld [vmem:[#allocation11 + $0x428] sm:$0xf0]  ;;  %v9005_v39 = vld [vmem:[#allocation11 + $0x32c] sm:$0xf0]  ;;  %v7689_v60 = vld [vmem:[#allocation11 + $0x1f0] sm:$0xf0] }
 0x65a   :  { %v9104_v9 = vld [vmem:[#allocation11 + $0x64c] sm:$0xf]  ;;  %v7972_v7 = vor.u32 %v9032_v4, %v7969_v3  ;;  %v7848_v38 = vor.u32 %v9005_v39, %v7847_v11  ;;  %v7719_v63 = vld [vmem:[#allocation11 + $0x210] sm:$0xf]  ;;  %v7945_v11 = vld [vmem:[#allocation11 + $0x3f0] sm:$0xf0] }
 0x65b   :  { %5425 = vmatpush.bf16.msrb.mxu3 %v7460_v19  ;;  %5437 = vmatpush.bf16.msrb.mxu0 %v7748_v24  ;;  %v8257_v22 = vld [vmem:[#allocation11 + $0x668] sm:$0xf0]  ;;  %v7527_v19 = vld [vmem:[#allocation11 + $0x90] sm:$0xf] }
 0x65c   :  { %5447 = vmatpush.bf16.msrb.mxu1 %v8100_v10  ;;  %5459 = vmatpush.bf16.msrb.mxu2 %v8388_v28  ;;  %v8260_v13 = vor.u32 %v9104_v9, %v8257_v22  ;;  %v9096_v14 = vld [vmem:[#allocation11 + $0x60c] sm:$0xf]  ;;  %v8925_v24 = vld [vmem:[#allocation11 + $0xac] sm:$0xf0]  ;;  %v8953_v22 = vld [vmem:[#allocation11 + $0x194] sm:$0xf] }
 0x65d   :  { %v8225_v18 = vld [vmem:[#allocation11 + $0x628] sm:$0xf0]  ;;  %v7815_v10 = vld [vmem:[#allocation11 + $0x2d0] sm:$0xf]  ;;  %v7528_v33 = vor.u32 %v8925_v24, %v7527_v19  ;;  %v8945_v19 = vld [vmem:[#allocation11 + $0x154] sm:$0xf] }
 0x65e   :  { %5426 = vmatmul.bf16.vlgmr.msrb.gmra.mxu3 %v9698_v27  ;;  %v8997_v28 = vld [vmem:[#allocation11 + $0x2ec] sm:$0xf0]  ;;  %v8228_v16 = vor.u32 %v9096_v14, %v8225_v18  ;;  %v7660_v14 = vor.u32 %v8953_v22, %v7657_v20  ;;  %v7625_v24 = vld [vmem:[#allocation11 + $0x170] sm:$0xf0] }
 0x65f   :  { %5470 = vmatpush.bf16.msra.mxu3 %v7688_v31  ;;  %5438 = vmatpush.bf16.msrb.mxu0 %v7716_v40  ;;  %v9157_v31 = vld [vmem:[#allocation11 + $0x7ec] sm:$0xf0]  ;;  %v7816_v34 = vor.u32 %v8997_v28, %v7815_v10  ;;  %v7913_v10 = vld [vmem:[#allocation11 + $0x3b0] sm:$0xf0] }
 0x660   :  { %5448 = vmatpush.bf16.msrb.mxu1 %v8068_v15  ;;  %5460 = vmatpush.bf16.msrb.mxu2 %v8356_v43  ;;  %v8456_v40 = vor.u32 %v9157_v31, %v8455_v26  ;;  %v7783_v15 = vld [vmem:[#allocation11 + $0x290] sm:$0xf]  ;;  %v7628_v31 = vor.u32 %v8945_v19, %v7625_v24  ;;  %v8913_v20 = vld [vmem:[#allocation11 + $0x54] sm:$0xf] }
 0x661   :  { %v8989_v43 = vld [vmem:[#allocation11 + $0x2ac] sm:$0xf0]  ;;  %v8905_v19 = vld [vmem:[#allocation11 + $0x14] sm:$0xf] }
 0x662   :  { %5439 = vmatmul.bf16.vlgmr.msrb.gmra.mxu0 %v9702_v36  ;;  %v7784_v48 = vor.u32 %v8989_v43, %v7783_v15  ;;  %v8071_v4 = vld [vmem:[#allocation11 + $0x4d0] sm:$0xf]  ;;  %v7465_v24 = vld [vmem:[#allocation11 + $0x30] sm:$0xf0] }
 0x663   :  { %5471 = vmatpush.bf16.msra.mxu3 %v7656_v46  ;;  %5483 = vmatpush.bf16.msra.mxu0 %v7944_v47  ;;  %v8423_v46 = vld [vmem:[#allocation11 + $0x790] sm:$0xf] }
 0x664   :  { %5449 = vmatpush.bf16.msrb.mxu1 %v8036_v53  ;;  %5461 = vmatpush.bf16.msrb.mxu2 %v8324_v54  ;;  %v9149_v47 = vld [vmem:[#allocation11 + $0x7ac] sm:$0xf0] }
 0x665   :  { %v8424_v37 = vor.u32 %v9149_v47, %v8423_v46  ;;  %v7751_v53 = vld [vmem:[#allocation11 + $0x250] sm:$0xf]  ;;  %v7596_v46 = vor.u32 %v8937_v35, %v7593_v41  ;;  %v7468_v35 = vor.u32 %v8905_v19, %v7465_v24  ;;  %v8265_v19 = vld [vmem:[#allocation11 + $0x670] sm:$0xf0]  ;;  %v7567_v24 = vld [vmem:[#allocation11 + $0xd8] sm:$0xf] }
 0x666   :  { %v8981_v54 = vld [vmem:[#allocation11 + $0x26c] sm:$0xf0] }
 0x667   :  { %5472 = vmatpush.bf16.msra.mxu3 %v7624_v57  ;;  %5484 = vmatpush.bf16.msra.mxu0 %v7912_v58  ;;  %v8391_v57 = vld [vmem:[#allocation11 + $0x750] sm:$0xf]  ;;  %v7752_v62 = vor.u32 %v8981_v54, %v7751_v53  ;;  %v9089_v53 = vld [vmem:[#allocation11 + $0x5d4] sm:$0xf] }
 0x668   :  { %5450 = vmatpush.bf16.msrb.mxu1 %v8004_v1  ;;  %5462 = vmatpush.bf16.msrb.mxu2 %v8292_v2  ;;  %v9141_v58 = vld [vmem:[#allocation11 + $0x76c] sm:$0xf0]  ;;  %v8201_v54 = vld [vmem:[#allocation11 + $0x5f0] sm:$0xf0] }
 0x669   :  { %v8392_v1 = vor.u32 %v9141_v58, %v8391_v57  ;;  %v8973_v2 = vld [vmem:[#allocation11 + $0x22c] sm:$0xf0]  ;;  %v7564_v58 = vor.u32 %v8929_v49, %v7561_v50  ;;  %v8958_v49 = vld [vmem:[#allocation11 + $0x1b4] sm:$0xf0] }
 0x66a   :  { %v9061_v3 = vld [vmem:[#allocation11 + $0x4ec] sm:$0xf0]  ;;  %v7720_v39 = vor.u32 %v8973_v2, %v7719_v63  ;;  %v8204_v63 = vor.u32 %v9089_v53, %v8201_v54  ;;  %v9081_v2 = vld [vmem:[#allocation11 + $0x594] sm:$0xf]  ;;  %v7951_v50 = vld [vmem:[#allocation11 + $0x3d8] sm:$0xf] }
 0x66b   :  { %5473 = vmatpush.bf16.msra.mxu3 %v7592_v5  ;;  %5485 = vmatpush.bf16.msra.mxu0 %v7880_v8  ;;  %v7692_v5 = vor.u32 %v8961_v59, %v7689_v60  ;;  %v8359_v8 = vld [vmem:[#allocation11 + $0x710] sm:$0xf]  ;;  %v8072_v12 = vor.u32 %v9061_v3, %v8071_v4  ;;  %v8169_v4 = vld [vmem:[#allocation11 + $0x5b0] sm:$0xf0] }
 0x66c   :  { %5451 = vmatpush.bf16.msrb.mxu1 %v7972_v7  ;;  %5463 = vmatpush.bf16.msrb.mxu2 %v8260_v13  ;;  %v9133_v9 = vld [vmem:[#allocation11 + $0x72c] sm:$0xf0]  ;;  %v9153_v3 = vld [vmem:[#allocation11 + $0x7d4] sm:$0xf] }
 0x66d   :  { %v8360_v42 = vor.u32 %v9133_v9, %v8359_v8  ;;  %v8039_v7 = vld [vmem:[#allocation11 + $0x490] sm:$0xf] }
 0x66e   :  { %v9053_v13 = vld [vmem:[#allocation11 + $0x4ac] sm:$0xf0] }
 0x66f   :  { %5474 = vmatpush.bf16.msra.mxu3 %v7560_v17  ;;  %5486 = vmatpush.bf16.msra.mxu0 %v7848_v38  ;;  %v7948_v17 = vor.u32 %v9025_v21, %v7945_v11  ;;  %v8327_v38 = vld [vmem:[#allocation11 + $0x6d0] sm:$0xf]  ;;  %v8040_v28 = vor.u32 %v9053_v13, %v8039_v7  ;;  %v7497_v21 = vld [vmem:[#allocation11 + $0x70] sm:$0xf0]  ;;  %v8172_v11 = vor.u32 %v9081_v2, %v8169_v4 }
 0x670   :  { %5496 = vmatpush.bf16.msra.mxu1 %v8200_v25  ;;  %5464 = vmatpush.bf16.msrb.mxu2 %v8228_v16  ;;  %v9125_v18 = vld [vmem:[#allocation11 + $0x6ec] sm:$0xf0]  ;;  %v9017_v25 = vld [vmem:[#allocation11 + $0x394] sm:$0xf] }
 0x671   :  { %5452 = vmatmul.bf16.vlgmr.msrb.gmra.mxu1 %v9706_v6  ;;  %v8328_v29 = vor.u32 %v9125_v18, %v8327_v38  ;;  %v8007_v30 = vld [vmem:[#allocation11 + $0x450] sm:$0xf]  ;;  %v7916_v16 = vor.u32 %v9017_v25, %v7913_v10  ;;  %v9073_v7 = vld [vmem:[#allocation11 + $0x554] sm:$0xf]  ;;  %v7500_v38 = vor.u32 %v8913_v20, %v7497_v21  ;;  %v7599_v20 = vld [vmem:[#allocation11 + $0x118] sm:$0xf] }
 0x672   :  { %v9045_v26 = vld [vmem:[#allocation11 + $0x46c] sm:$0xf0]  ;;  %v8137_v13 = vld [vmem:[#allocation11 + $0x570] sm:$0xf0]  ;;  %v8942_v21 = vld [vmem:[#allocation11 + $0x134] sm:$0xf0] }
 0x673   :  { %5475 = vmatpush.bf16.msra.mxu3 %v7528_v33  ;;  %5487 = vmatpush.bf16.msra.mxu0 %v7816_v34  ;;  %v8295_v33 = vld [vmem:[#allocation11 + $0x690] sm:$0xf]  ;;  %v8008_v15 = vor.u32 %v9045_v26, %v8007_v30  ;;  %v8140_v25 = vor.u32 %v9073_v7, %v8137_v13  ;;  %v9065_v30 = vld [vmem:[#allocation11 + $0x514] sm:$0xf] }
 0x674   :  { %5497 = vmatpush.bf16.msra.mxu1 %v8168_v32  ;;  %5509 = vmatpush.bf16.msra.mxu2 %v8456_v40  ;;  %v9117_v34 = vld [vmem:[#allocation11 + $0x6ac] sm:$0xf0]  ;;  %v9009_v32 = vld [vmem:[#allocation11 + $0x354] sm:$0xf] }
 0x675   :  { %5465 = vmatmul.bf16.vlgmr.msrb.gmra.mxu2 %v9710_v23  ;;  %v7881_v40 = vld [vmem:[#allocation11 + $0x370] sm:$0xf0]  ;;  %v8296_v43 = vor.u32 %v9117_v34, %v8295_v33  ;;  %v7975_v44 = vld [vmem:[#allocation11 + $0x410] sm:$0xf]  ;;  %v7695_v33 = vld [vmem:[#allocation11 + $0x1d8] sm:$0xf] }
 0x676   :  { %v9037_v45 = vld [vmem:[#allocation11 + $0x42c] sm:$0xf0]  ;;  %v7884_v47 = vor.u32 %v9009_v32, %v7881_v40  ;;  %v8105_v26 = vld [vmem:[#allocation11 + $0x530] sm:$0xf0]  ;;  %v8966_v34 = vld [vmem:[#allocation11 + $0x1f4] sm:$0xf0] }
 0x677   :  { %5476 = vmatpush.bf16.msra.mxu3 %v7496_v52  ;;  %5488 = vmatpush.bf16.msra.mxu0 %v7784_v48  ;;  %v8263_v52 = vld [vmem:[#allocation11 + $0x650] sm:$0xf]  ;;  %v7976_v55 = vor.u32 %v9037_v45, %v7975_v44  ;;  %v8969_v32 = vld [vmem:[#allocation11 + $0x214] sm:$0xf]  ;;  %v8108_v40 = vor.u32 %v9065_v30, %v8105_v26  ;;  %v8207_v30 = vld [vmem:[#allocation11 + $0x5d8] sm:$0xf] }
 0x678   :  { %5498 = vmatpush.bf16.msra.mxu1 %v8136_v51  ;;  %5510 = vmatpush.bf16.msra.mxu2 %v8424_v37  ;;  %v9109_v48 = vld [vmem:[#allocation11 + $0x66c] sm:$0xf0]  ;;  %v9001_v51 = vld [vmem:[#allocation11 + $0x314] sm:$0xf]  ;;  %v9094_v26 = vld [vmem:[#allocation11 + $0x5f4] sm:$0xf0] }
 0x679   :  { %v7849_v37 = vld [vmem:[#allocation11 + $0x330] sm:$0xf0]  ;;  %v8264_v56 = vor.u32 %v9109_v48, %v8263_v52  ;;  %v8231_v57 = vld [vmem:[#allocation11 + $0x610] sm:$0xf]  ;;  %v7663_v48 = vld [vmem:[#allocation11 + $0x198] sm:$0xf] }
 0x67a   :  { %v7852_v59 = vor.u32 %v9001_v51, %v7849_v37  ;;  %v9101_v60 = vld [vmem:[#allocation11 + $0x62c] sm:$0xf0]  ;;  %v9057_v44 = vld [vmem:[#allocation11 + $0x4d4] sm:$0xf]  ;;  %v9030_v51 = vld [vmem:[#allocation11 + $0x3f4] sm:$0xf0] }
 0x67b   :  { %5477 = vmatpush.bf16.msra.mxu3 %v7464_v61  ;;  %5489 = vmatpush.bf16.msra.mxu0 %v7752_v62  ;;  %v8921_v61 = vld [vmem:[#allocation11 + $0x94] sm:$0xf]  ;;  %v8232_v8 = vor.u32 %v9101_v60, %v8231_v57  ;;  %v7664_v57 = vor.u32 %v8958_v49, %v7663_v48  ;;  %v9737_v49 = vld [vmem:[%s9814_s7] sm:$0xff] }
 0x67c   :  { %5499 = vmatpush.bf16.msra.mxu1 %v8104_v0  ;;  %5511 = vmatpush.bf16.msra.mxu2 %v8392_v1  ;;  %v7529_v62 = vld [vmem:[#allocation11 + $0xb0] sm:$0xf0] }
 0x67d   :  { %v8993_v0 = vld [vmem:[#allocation11 + $0x2d4] sm:$0xf]  ;;  %v7532_v9 = vor.u32 %v8921_v61, %v7529_v62  ;;  %v7631_v61 = vld [vmem:[#allocation11 + $0x158] sm:$0xf] }
 0x67e   :  { %5478 = vmatmul.bf16.vlgmr.msra.gmra.mxu3 %v9698_v27  ;;  %v7817_v1 = vld [vmem:[#allocation11 + $0x2f0] sm:$0xf0]  ;;  %v8950_v62 = vld [vmem:[#allocation11 + $0x174] sm:$0xf0] }
 0x67f   :  { %5522 = vmatpush.bf16.msrb.mxu3 %v7692_v5  ;;  %5490 = vmatpush.bf16.msra.mxu0 %v7720_v39  ;;  %v8457_v5 = vld [vmem:[#allocation11 + $0x7f0] sm:$0xf0]  ;;  %v7820_v22 = vor.u32 %v8993_v0, %v7817_v1  ;;  %v9022_v0 = vld [vmem:[#allocation11 + $0x3b4] sm:$0xf0] }
 0x680   :  { %5500 = vmatpush.bf16.msra.mxu1 %v8072_v12  ;;  %5512 = vmatpush.bf16.msra.mxu2 %v8360_v42  ;;  %v8460_v39 = vor.u32 %v9153_v3, %v8457_v5  ;;  %v8985_v12 = vld [vmem:[#allocation11 + $0x294] sm:$0xf]  ;;  %v7632_v5 = vor.u32 %v8950_v62, %v7631_v61  ;;  %v9078_v61 = vld [vmem:[#allocation11 + $0x574] sm:$0xf0] }
 0x681   :  { %v7785_v42 = vld [vmem:[#allocation11 + $0x2b0] sm:$0xf0]  ;;  %v8431_v62 = vld [vmem:[#allocation11 + $0x798] sm:$0xf] }
 0x682   :  { %5491 = vmatmul.bf16.vlgmr.msra.gmra.mxu0 %v9702_v36  ;;  %v7788_v18 = vor.u32 %v8985_v12, %v7785_v42  ;;  %v8073_v45 = vld [vmem:[#allocation11 + $0x4f0] sm:$0xf0] }
 0x683   :  { %5523 = vmatpush.bf16.msrb.mxu3 %v7660_v14  ;;  %5535 = vmatpush.bf16.msrb.mxu0 %v7948_v17  ;;  %v9145_v14 = vld [vmem:[#allocation11 + $0x794] sm:$0xf]  ;;  %v8076_v53 = vor.u32 %v9057_v44, %v8073_v45  ;;  %v8998_v44 = vld [vmem:[#allocation11 + $0x2f4] sm:$0xf0] }
 0x684   :  { %5501 = vmatpush.bf16.msra.mxu1 %v8040_v28  ;;  %5513 = vmatpush.bf16.msra.mxu2 %v8328_v29  ;;  %v8425_v17 = vld [vmem:[#allocation11 + $0x7b0] sm:$0xf0]  ;;  %v8175_v45 = vld [vmem:[#allocation11 + $0x598] sm:$0xf] }
 0x685   :  { %v8428_v10 = vor.u32 %v9145_v14, %v8425_v17  ;;  %v8977_v28 = vld [vmem:[#allocation11 + $0x254] sm:$0xf]  ;;  %v7600_v14 = vor.u32 %v8942_v21, %v7599_v20  ;;  %v8982_v20 = vld [vmem:[#allocation11 + $0x274] sm:$0xf0] }
 0x686   :  { %v7753_v29 = vld [vmem:[#allocation11 + $0x270] sm:$0xf0]  ;;  %v8111_v21 = vld [vmem:[#allocation11 + $0x518] sm:$0xf] }
 0x687   :  { %5524 = vmatpush.bf16.msrb.mxu3 %v7628_v31  ;;  %5536 = vmatpush.bf16.msrb.mxu0 %v7916_v16  ;;  %v9137_v31 = vld [vmem:[#allocation11 + $0x754] sm:$0xf]  ;;  %v7756_v41 = vor.u32 %v8977_v28, %v7753_v29  ;;  %v9006_v28 = vld [vmem:[#allocation11 + $0x334] sm:$0xf0] }
 0x688   :  { %5502 = vmatpush.bf16.msra.mxu1 %v8008_v15  ;;  %5514 = vmatpush.bf16.msra.mxu2 %v8296_v43  ;;  %v8393_v16 = vld [vmem:[#allocation11 + $0x770] sm:$0xf0] }
 0x689   :  { %v8396_v15 = vor.u32 %v9137_v31, %v8393_v16  ;;  %v7721_v43 = vld [vmem:[#allocation11 + $0x230] sm:$0xf0] }
 0x68a   :  { %v8361_v52 = vld [vmem:[#allocation11 + $0x730] sm:$0xf0]  ;;  %v7724_v37 = vor.u32 %v8969_v32, %v7721_v43  ;;  %v7535_v32 = vld [vmem:[#allocation11 + $0x98] sm:$0xf] }
 0x68b   :  { %5525 = vmatpush.bf16.msrb.mxu3 %v7596_v46  ;;  %5537 = vmatpush.bf16.msrb.mxu0 %v7884_v47  ;;  %v7696_v46 = vor.u32 %v8966_v34, %v7695_v33  ;;  %v9129_v47 = vld [vmem:[#allocation11 + $0x714] sm:$0xf]  ;;  %v7823_v43 = vld [vmem:[#allocation11 + $0x2d8] sm:$0xf] }
 0x68c   :  { %5503 = vmatpush.bf16.msra.mxu1 %v7976_v55  ;;  %5515 = vmatpush.bf16.msra.mxu2 %v8264_v56  ;;  %v8364_v54 = vor.u32 %v9129_v47, %v8361_v52  ;;  %v9049_v55 = vld [vmem:[#allocation11 + $0x494] sm:$0xf]  ;;  %v8463_v47 = vld [vmem:[#allocation11 + $0x7d8] sm:$0xf] }
 0x68d   :  { %v8041_v56 = vld [vmem:[#allocation11 + $0x4b0] sm:$0xf0]  ;;  %v9158_v52 = vld [vmem:[#allocation11 + $0x7f4] sm:$0xf0] }
 0x68e   :  { %v8329_v60 = vld [vmem:[#allocation11 + $0x6f0] sm:$0xf0]  ;;  %v8044_v1 = vor.u32 %v9049_v55, %v8041_v56  ;;  %v8464_v56 = vor.u32 %v9158_v52, %v8463_v47  ;;  %v9054_v47 = vld [vmem:[#allocation11 + $0x4b4] sm:$0xf0] }
 0x68f   :  { %5526 = vmatpush.bf16.msrb.mxu3 %v7564_v58  ;;  %5538 = vmatpush.bf16.msrb.mxu0 %v7852_v59  ;;  %v7952_v58 = vor.u32 %v9030_v51, %v7951_v50  ;;  %v9121_v59 = vld [vmem:[#allocation11 + $0x6d4] sm:$0xf]  ;;  %v7824_v51 = vor.u32 %v8998_v44, %v7823_v43 }
 0x690   :  { %5548 = vmatpush.bf16.msrb.mxu1 %v8204_v63  ;;  %5516 = vmatpush.bf16.msra.mxu2 %v8232_v8  ;;  %v7919_v63 = vld [vmem:[#allocation11 + $0x398] sm:$0xf]  ;;  %v8332_v2 = vor.u32 %v9121_v59, %v8329_v60  ;;  %v9041_v4 = vld [vmem:[#allocation11 + $0x454] sm:$0xf] }
 0x691   :  { %5504 = vmatmul.bf16.vlgmr.msra.gmra.mxu1 %v9706_v6  ;;  %v8009_v3 = vld [vmem:[#allocation11 + $0x470] sm:$0xf0]  ;;  %v7920_v8 = vor.u32 %v9022_v0, %v7919_v63  ;;  %v8143_v59 = vld [vmem:[#allocation11 + $0x558] sm:$0xf]  ;;  %v3966_v0 = vperm.slane %v9737_v49, 0 }
 0x692   :  { %v8012_v12 = vor.u32 %v9041_v4, %v8009_v3  ;;  %v9033_v7 = vld [vmem:[#allocation11 + $0x414] sm:$0xf]  ;;  %v9150_v63 = vld [vmem:[#allocation11 + $0x7b4] sm:$0xf0] }
 0x693   :  { %5527 = vmatpush.bf16.msrb.mxu3 %v7532_v9  ;;  %5539 = vmatpush.bf16.msrb.mxu0 %v7820_v22  ;;  %v9113_v9 = vld [vmem:[#allocation11 + $0x694] sm:$0xf]  ;;  %v7471_v3 = vld [vmem:[#allocation11 + $0x18] sm:$0xf] }
 0x694   :  { %5549 = vmatpush.bf16.msrb.mxu1 %v8172_v11  ;;  %5561 = vmatpush.bf16.msrb.mxu2 %v8460_v39  ;;  %v8297_v22 = vld [vmem:[#allocation11 + $0x6b0] sm:$0xf0]  ;;  %v7887_v11 = vld [vmem:[#allocation11 + $0x358] sm:$0xf] }
 0x695   :  { %5517 = vmatmul.bf16.vlgmr.msra.gmra.mxu2 %v9710_v23  ;;  %v9014_v39 = vld [vmem:[#allocation11 + $0x374] sm:$0xf0]  ;;  %v8300_v42 = vor.u32 %v9113_v9, %v8297_v22  ;;  %v7977_v13 = vld [vmem:[#allocation11 + $0x430] sm:$0xf0]  ;;  %v8432_v9 = vor.u32 %v9150_v63, %v8431_v62 }
 0x696   :  { %v7888_v17 = vor.u32 %v9014_v39, %v7887_v11  ;;  %v7980_v31 = vor.u32 %v9033_v7, %v7977_v13  ;;  %v9097_v33 = vld [vmem:[#allocation11 + $0x614] sm:$0xf]  ;;  %v7759_v22 = vld [vmem:[#allocation11 + $0x258] sm:$0xf]  ;;  %v8962_v7 = vld [vmem:[#allocation11 + $0x1dc] sm:$0xf] }
 0x697   :  { %5528 = vmatpush.bf16.msrb.mxu3 %v7500_v38  ;;  %5540 = vmatpush.bf16.msrb.mxu0 %v7788_v18  ;;  %v9105_v18 = vld [vmem:[#allocation11 + $0x654] sm:$0xf]  ;;  %v9070_v11 = vld [vmem:[#allocation11 + $0x534] sm:$0xf0]  ;;  %v7697_v13 = vld [vmem:[#allocation11 + $0x1f8] sm:$0xf0] }
 0x698   :  { %5550 = vmatpush.bf16.msrb.mxu1 %v8140_v25  ;;  %5562 = vmatpush.bf16.msrb.mxu2 %v8428_v10  ;;  %v8934_v25 = vld [vmem:[#allocation11 + $0xf4] sm:$0xf0]  ;;  %v8268_v16 = vor.u32 %v9105_v18, %v8265_v19 }
 0x699   :  { %v7855_v10 = vld [vmem:[#allocation11 + $0x318] sm:$0xf]  ;;  %v7568_v34 = vor.u32 %v8934_v25, %v7567_v24  ;;  %v8112_v24 = vor.u32 %v9070_v11, %v8111_v21 }
 0x69a   :  { %v8399_v39 = vld [vmem:[#allocation11 + $0x758] sm:$0xf] }
 0x69b   :  { %5529 = vmatpush.bf16.msrb.mxu3 %v7468_v35  ;;  %5541 = vmatpush.bf16.msrb.mxu0 %v7756_v41  ;;  %v7856_v35 = vor.u32 %v9006_v28, %v7855_v10  ;;  %v8233_v41 = vld [vmem:[#allocation11 + $0x630] sm:$0xf0]  ;;  %v7727_v19 = vld [vmem:[#allocation11 + $0x218] sm:$0xf] }
 0x69c   :  { %5551 = vmatpush.bf16.msrb.mxu1 %v8108_v40  ;;  %5563 = vmatpush.bf16.msrb.mxu2 %v8396_v15  ;;  %v8926_v40 = vld [vmem:[#allocation11 + $0xb4] sm:$0xf0]  ;;  %v8208_v15 = vor.u32 %v9094_v26, %v8207_v30  ;;  %v8236_v48 = vor.u32 %v9097_v33, %v8233_v41  ;;  %v7700_v26 = vor.u32 %v8962_v7, %v7697_v13  ;;  %v8954_v33 = vld [vmem:[#allocation11 + $0x19c] sm:$0xf] }
 0x69d   :  { %v7536_v50 = vor.u32 %v8926_v40, %v7535_v32  ;;  %v8974_v10 = vld [vmem:[#allocation11 + $0x234] sm:$0xf0]  ;;  %v9026_v41 = vld [vmem:[#allocation11 + $0x3dc] sm:$0xf] }
 0x69e   :  { %5530 = vmatmul.bf16.vlgmr.msrb.gmra.mxu3 %v9698_v27  ;;  %v8079_v28 = vld [vmem:[#allocation11 + $0x4d8] sm:$0xf]  ;;  %v7953_v32 = vld [vmem:[#allocation11 + $0x3f8] sm:$0xf0]  ;;  %v7728_v40 = vor.u32 %v8974_v10, %v7727_v19 }
 0x69f   :  { %5574 = vmatpush.bf16.msra.mxu3 %v7696_v46  ;;  %5542 = vmatpush.bf16.msrb.mxu0 %v7724_v37  ;;  %v9730_v38 = vpop.f32.mrf.mxu0  ;;  %v9086_v46 = vld [vmem:[#allocation11 + $0x5b4] sm:$0xf0]  ;;  %v7857_v10 = vld [vmem:[#allocation11 + $0x338] sm:$0xf0] }
 0x6a0   :  { %5552 = vmatpush.bf16.msrb.mxu1 %v8076_v53  ;;  %5564 = vmatpush.bf16.msrb.mxu2 %v8364_v54  ;;  %v7503_v53 = vld [vmem:[#allocation11 + $0x58] sm:$0xf]  ;;  %v8176_v55 = vor.u32 %v9086_v46, %v8175_v45 }
 0x6a1   :  { %v9732_v29 = vpop.f32.mrf.mxu3  ;;  %v8918_v54 = vld [vmem:[#allocation11 + $0x74] sm:$0xf0] }
 0x6a2   :  { %5543 = vmatmul.bf16.vlgmr.msrb.gmra.mxu0 %v9702_v36  ;;  %v9062_v30 = vld [vmem:[#allocation11 + $0x4f4] sm:$0xf0] }
 0x6a3   :  { %5575 = vmatpush.bf16.msra.mxu3 %v7664_v57  ;;  %5587 = vmatpush.bf16.msra.mxu0 %v7952_v58  ;;  %v7791_v57 = vld [vmem:[#allocation11 + $0x298] sm:$0xf]  ;;  %v8080_v44 = vor.u32 %v9062_v30, %v8079_v28  ;;  %v9090_v30 = vld [vmem:[#allocation11 + $0x5dc] sm:$0xf] }
 0x6a4   :  { %5553 = vmatpush.bf16.msrb.mxu1 %v8044_v1  ;;  %5565 = vmatpush.bf16.msrb.mxu2 %v8332_v2  ;;  %v8990_v58 = vld [vmem:[#allocation11 + $0x2b4] sm:$0xf0]  ;;  %v7504_v1 = vor.u32 %v8918_v54, %v7503_v53  ;;  %v7633_v54 = vld [vmem:[#allocation11 + $0x178] sm:$0xf0] }
 0x6a5   :  { %v7792_v2 = vor.u32 %v8990_v58, %v7791_v57  ;;  %v8047_v46 = vld [vmem:[#allocation11 + $0x498] sm:$0xf]  ;;  %v3967_v58 = vperm.slane %v9737_v49, 1 }
 0x6a6   :  { %v9046_v62 = vld [vmem:[#allocation11 + $0x474] sm:$0xf0] }
 0x6a7   :  { %5576 = vmatpush.bf16.msra.mxu3 %v7632_v5  ;;  %5588 = vmatpush.bf16.msra.mxu0 %v7920_v8  ;;  %v5286_v37 = vpop.f32.mrf.mxu0  ;;  %v8910_v5 = vld [vmem:[#allocation11 + $0x34] sm:$0xf0]  ;;  %v8144_v8 = vor.u32 %v9078_v61, %v8143_v59  ;;  %v8048_v59 = vor.u32 %v9054_v47, %v8047_v46  ;;  %v9082_v46 = vld [vmem:[#allocation11 + $0x59c] sm:$0xf] }
 0x6a8   :  { %5554 = vmatpush.bf16.msrb.mxu1 %v8012_v12  ;;  %5566 = vmatpush.bf16.msrb.mxu2 %v8300_v42  ;;  %v9142_v12 = vld [vmem:[#allocation11 + $0x774] sm:$0xf0]  ;;  %v5272_v42 = vadd.f32 %v9732_v29, %v3966_v0  ;;  %v8946_v37 = vld [vmem:[#allocation11 + $0x15c] sm:$0xf] }
 0x6a9   :  { %v5273_v60 = vpop.f32.mrf.mxu3  ;;  %v8400_v25 = vor.u32 %v9142_v12, %v8399_v39  ;;  %v8367_v29 = vld [vmem:[#allocation11 + $0x718] sm:$0xf]  ;;  %v7636_v63 = vor.u32 %v8946_v37, %v7633_v54 }
 0x6aa   :  { %v8015_v61 = vld [vmem:[#allocation11 + $0x458] sm:$0xf] }
 0x6ab   :  { %5577 = vmatpush.bf16.msra.mxu3 %v7600_v14  ;;  %5589 = vmatpush.bf16.msra.mxu0 %v7888_v17  ;;  %v5297_v4 = vpop.f32.mrf.mxu1  ;;  %v7472_v14 = vor.u32 %v8910_v5, %v7471_v3  ;;  %v7760_v17 = vor.u32 %v8982_v20, %v7759_v22  ;;  %v8938_v3 = vld [vmem:[#allocation11 + $0x11c] sm:$0xf]  ;;  %v8016_v20 = vor.u32 %v9046_v62, %v8015_v61  ;;  %v7983_v11 = vld [vmem:[#allocation11 + $0x418] sm:$0xf] }
 0x6ac   :  { %5555 = vmatpush.bf16.msrb.mxu1 %v7980_v31  ;;  %5567 = vmatpush.bf16.msrb.mxu2 %v8268_v16  ;;  %v9134_v16 = vld [vmem:[#allocation11 + $0x734] sm:$0xf0]  ;;  %v7601_v5 = vld [vmem:[#allocation11 + $0x138] sm:$0xf0] }
 0x6ad   :  { %v8368_v45 = vor.u32 %v9134_v16, %v8367_v29  ;;  %v9038_v39 = vld [vmem:[#allocation11 + $0x434] sm:$0xf0]  ;;  %v7604_v12 = vor.u32 %v8938_v3, %v7601_v5  ;;  %v9074_v61 = vld [vmem:[#allocation11 + $0x55c] sm:$0xf] }
 0x6ae   :  { %v8271_v13 = vld [vmem:[#allocation11 + $0x658] sm:$0xf]  ;;  %v7984_v29 = vor.u32 %v9038_v39, %v7983_v11  ;;  %v7761_v11 = vld [vmem:[#allocation11 + $0x278] sm:$0xf0] }
 0x6af   :  { %5578 = vmatpush.bf16.msra.mxu3 %v7568_v34  ;;  %5590 = vmatpush.bf16.msra.mxu0 %v7856_v35  ;;  %v9743_v18 = vpop.f32.mrf.mxu0  ;;  %v5285_v34 = vadd.f32 %v9730_v38, %v5272_v42  ;;  %v7665_v35 = vld [vmem:[#allocation11 + $0x1b8] sm:$0xf0]  ;;  %v9126_v38 = vld [vmem:[#allocation11 + $0x6f4] sm:$0xf0] }
 0x6b0   :  { %5600 = vmatpush.bf16.msra.mxu1 %v8208_v15  ;;  %5568 = vmatpush.bf16.msrb.mxu2 %v8236_v48  ;;  %v7668_v52 = vor.u32 %v8954_v33, %v7665_v35  ;;  %v7956_v48 = vor.u32 %v9026_v41, %v7953_v32  ;;  %v8239_v33 = vld [vmem:[#allocation11 + $0x618] sm:$0xf]  ;;  %v9066_v39 = vld [vmem:[#allocation11 + $0x51c] sm:$0xf] }
 0x6b1   :  { %5556 = vmatmul.bf16.vlgmr.msrb.gmra.mxu1 %v9706_v6  ;;  %v9745_v31 = vpop.f32.mrf.mxu3  ;;  %v5298_v43 = vadd.f32 %v5297_v4, %v5285_v34  ;;  %v9118_v4 = vld [vmem:[#allocation11 + $0x6b4] sm:$0xf0] }
 0x6b2   :  { %v5324_v19 = vadd.f32 %v9745_v31, %v3967_v58  ;;  %v9102_v32 = vld [vmem:[#allocation11 + $0x634] sm:$0xf0]  ;;  %v8922_v31 = vld [vmem:[#allocation11 + $0x9c] sm:$0xf] }
 0x6b3   :  { %5579 = vmatpush.bf16.msra.mxu3 %v7536_v50  ;;  %5591 = vmatpush.bf16.msra.mxu0 %v7824_v51  ;;  %v5299_v15 = vpop.f32.mrf.mxu1  ;;  %v8335_v51 = vld [vmem:[#allocation11 + $0x6d8] sm:$0xf] }
 0x6b4   :  { %5601 = vmatpush.bf16.msra.mxu1 %v8176_v55  ;;  %5613 = vmatpush.bf16.msra.mxu2 %v8464_v56  ;;  %v9018_v55 = vld [vmem:[#allocation11 + $0x39c] sm:$0xf]  ;;  %v8336_v60 = vor.u32 %v9126_v38, %v8335_v51  ;;  %v5337_v15 = vadd.f32 %v9743_v18, %v5324_v19  ;;  %v8240_v38 = vor.u32 %v9102_v32, %v8239_v33 }
 0x6b5   :  { %5569 = vmatmul.bf16.vlgmr.msrb.gmra.mxu2 %v9710_v23  ;;  %v5310_v50 = vpop.f32.mrf.mxu2  ;;  %v7921_v56 = vld [vmem:[#allocation11 + $0x3b8] sm:$0xf0] }
 0x6b6   :  { %v5311_v53 = vadd.f32 %v5310_v50, %v5298_v43  ;;  %v7924_v0 = vor.u32 %v9018_v55, %v7921_v56  ;;  %v8465_v50 = vld [vmem:[#allocation11 + $0x7f8] sm:$0xf0] }
 0x6b7   :  { %5580 = vmatpush.bf16.msra.mxu3 %v7504_v1  ;;  %5592 = vmatpush.bf16.msra.mxu0 %v7792_v2  ;;  %v5338_v57 = vpop.f32.mrf.mxu0  ;;  %v8303_v2 = vld [vmem:[#allocation11 + $0x698] sm:$0xf]  ;;  %v8914_v55 = vld [vmem:[#allocation11 + $0x5c] sm:$0xf] }
 0x6b8   :  { %5602 = vmatpush.bf16.msra.mxu1 %v8144_v8  ;;  %5614 = vmatpush.bf16.msra.mxu2 %v8432_v9  ;;  %5678 = vst [vmem:[#allocation13] sm:$0xff] %v5311_v53  ;;  %v9010_v8 = vld [vmem:[#allocation11 + $0x35c] sm:$0xf]  ;;  %v8304_v21 = vor.u32 %v9118_v4, %v8303_v2  ;;  %v3968_v2 = vperm.slane %v9737_v49, 2 }
 0x6b9   :  { %v5325_v1 = vpop.f32.mrf.mxu3  ;;  %v7889_v9 = vld [vmem:[#allocation11 + $0x378] sm:$0xf0] }
 0x6ba   :  { %v7892_v42 = vor.u32 %v9010_v8, %v7889_v9  ;;  %v7505_v56 = vld [vmem:[#allocation11 + $0x78] sm:$0xf0] }
 0x6bb   :  { %5581 = vmatpush.bf16.msra.mxu3 %v7472_v14  ;;  %5593 = vmatpush.bf16.msra.mxu0 %v7760_v17  ;;  %v5349_v22 = vpop.f32.mrf.mxu1  ;;  %v9110_v14 = vld [vmem:[#allocation11 + $0x674] sm:$0xf0]  ;;  %v8930_v17 = vld [vmem:[#allocation11 + $0xdc] sm:$0xf]  ;;  %v7508_v4 = vor.u32 %v8914_v55, %v7505_v56 }
 0x6bc   :  { %5603 = vmatpush.bf16.msra.mxu1 %v8112_v24  ;;  %5615 = vmatpush.bf16.msra.mxu2 %v8400_v25  ;;  %v7569_v24 = vld [vmem:[#allocation11 + $0xf8] sm:$0xf0]  ;;  %v8272_v16 = vor.u32 %v9110_v14, %v8271_v13  ;;  %v5350_v51 = vadd.f32 %v5349_v22, %v5337_v15 }
 0x6bd   :  { %v5312_v7 = vpop.f32.mrf.mxu2  ;;  %v9002_v25 = vld [vmem:[#allocation11 + $0x31c] sm:$0xf]  ;;  %v7572_v34 = vor.u32 %v8930_v17, %v7569_v24 }
 0x6be   :  { %5582 = vmatmul.bf16.vlgmr.msra.gmra.mxu3 %v9698_v27  ;;  %v7860_v35 = vor.u32 %v9002_v25, %v7857_v10  ;;  %v8433_v1 = vld [vmem:[#allocation11 + $0x7b8] sm:$0xf0] }
 0x6bf   :  { %5626 = vmatpush.bf16.msrb.mxu3 %v7700_v26  ;;  %5594 = vmatpush.bf16.msra.mxu0 %v7728_v40  ;;  %v9752_v28 = vpop.f32.mrf.mxu0  ;;  %v8209_v26 = vld [vmem:[#allocation11 + $0x5f8] sm:$0xf0] }
 0x6c0   :  { %5604 = vmatpush.bf16.msra.mxu1 %v8080_v44  ;;  %5616 = vmatpush.bf16.msra.mxu2 %v8368_v45  ;;  %v7537_v40 = vld [vmem:[#allocation11 + $0xb8] sm:$0xf0]  ;;  %v8212_v43 = vor.u32 %v9090_v30, %v8209_v26 }
 0x6c1   :  { %v9754_v41 = vpop.f32.mrf.mxu3  ;;  %v8994_v44 = vld [vmem:[#allocation11 + $0x2dc] sm:$0xf]  ;;  %v7540_v37 = vor.u32 %v8922_v31, %v7537_v40 }
 0x6c2   :  { %5595 = vmatmul.bf16.vlgmr.msra.gmra.mxu0 %v9702_v36  ;;  %v7825_v45 = vld [vmem:[#allocation11 + $0x2f8] sm:$0xf0] }
 0x6c3   :  { %5627 = vmatpush.bf16.msrb.mxu3 %v7668_v52  ;;  %5639 = vmatpush.bf16.msrb.mxu0 %v7956_v48  ;;  %v5351_v47 = vpop.f32.mrf.mxu1  ;;  %v8177_v52 = vld [vmem:[#allocation11 + $0x5b8] sm:$0xf0]  ;;  %v7828_v53 = vor.u32 %v8994_v44, %v7825_v45 }
 0x6c4   :  { %5605 = vmatpush.bf16.msra.mxu1 %v8048_v59  ;;  %5617 = vmatpush.bf16.msra.mxu2 %v8336_v60  ;;  %v9154_v48 = vld [vmem:[#allocation11 + $0x7dc] sm:$0xf]  ;;  %v8180_v18 = vor.u32 %v9082_v46, %v8177_v52 }
 0x6c5   :  { %v5362_v54 = vpop.f32.mrf.mxu2  ;;  %v8468_v57 = vor.u32 %v9154_v48, %v8465_v50  ;;  %v8986_v59 = vld [vmem:[#allocation11 + $0x29c] sm:$0xf] }
 0x6c6   :  { %v5363_v58 = vadd.f32 %v5362_v54, %v5350_v51  ;;  %v7793_v60 = vld [vmem:[#allocation11 + $0x2b8] sm:$0xf0] }
 0x6c7   :  { %5628 = vmatpush.bf16.msrb.mxu3 %v7636_v63  ;;  %5640 = vmatpush.bf16.msrb.mxu0 %v7924_v0  ;;  %v5390_v62 = vpop.f32.mrf.mxu0  ;;  %v8145_v63 = vld [vmem:[#allocation11 + $0x578] sm:$0xf0]  ;;  %v7796_v3 = vor.u32 %v8986_v59, %v7793_v60 }
 0x6c8   :  { %5606 = vmatpush.bf16.msra.mxu1 %v8016_v20  ;;  %5618 = vmatpush.bf16.msra.mxu2 %v8304_v21  ;;  %v9146_v0 = vld [vmem:[#allocation11 + $0x79c] sm:$0xf]  ;;  %5679 = vst [vmem:[#allocation13 + $0x8] sm:$0xff] %v5363_v58  ;;  %v8148_v22 = vor.u32 %v9074_v61, %v8145_v63 }
 0x6c9   :  { %v5377_v5 = vpop.f32.mrf.mxu3  ;;  %v8906_v8 = vld [vmem:[#allocation11 + $0x1c] sm:$0xf]  ;;  %v8436_v20 = vor.u32 %v9146_v0, %v8433_v1 }
 0x6ca   :  { %v7473_v9 = vld [vmem:[#allocation11 + $0x38] sm:$0xf0] }
 0x6cb   :  { %5629 = vmatpush.bf16.msrb.mxu3 %v7604_v12  ;;  %5641 = vmatpush.bf16.msrb.mxu0 %v7892_v42  ;;  %v8978_v21 = vld [vmem:[#allocation11 + $0x25c] sm:$0xf]  ;;  %v7476_v14 = vor.u32 %v8906_v8, %v7473_v9 }
 0x6cc   :  { %5607 = vmatpush.bf16.msra.mxu1 %v7984_v29  ;;  %5619 = vmatpush.bf16.msra.mxu2 %v8272_v16  ;;  %v8113_v12 = vld [vmem:[#allocation11 + $0x538] sm:$0xf0]  ;;  %v7764_v17 = vor.u32 %v8978_v21, %v7761_v11  ;;  %v5376_v29 = vadd.f32 %v9754_v41, %v3968_v2  ;;  %v3969_v2 = vperm.slane %v9737_v49, 3 }
 0x6cd   :  { %v9138_v42 = vld [vmem:[#allocation11 + $0x75c] sm:$0xf]  ;;  %v5364_v19 = vpop.f32.mrf.mxu2  ;;  %v8116_v24 = vor.u32 %v9066_v39, %v8113_v12 }
 0x6ce   :  { %v8401_v7 = vld [vmem:[#allocation11 + $0x778] sm:$0xf0]  ;;  %v5401_v13 = vpop.f32.mrf.mxu1  ;;  %v5389_v15 = vadd.f32 %v9752_v28, %v5376_v29 }
 0x6cf   :  { %5630 = vmatpush.bf16.msrb.mxu3 %v7572_v34  ;;  %5642 = vmatpush.bf16.msrb.mxu0 %v7860_v35  ;;  %v8404_v25 = vor.u32 %v9138_v42, %v8401_v7  ;;  %v8970_v10 = vld [vmem:[#allocation11 + $0x21c] sm:$0xf]  ;;  %v3970_v42 = vperm.slane %v9737_v49, 4 }
 0x6d0   :  { %5652 = vmatpush.bf16.msrb.mxu1 %v8212_v43  ;;  %5620 = vmatpush.bf16.msra.mxu2 %v8240_v38  ;;  %v7729_v30 = vld [vmem:[#allocation11 + $0x238] sm:$0xf0]  ;;  %v5402_v41 = vadd.f32 %v5401_v13, %v5389_v15 }
 0x6d1   :  { %5608 = vmatmul.bf16.vlgmr.msra.gmra.mxu1 %v9706_v6  ;;  %v9058_v26 = vld [vmem:[#allocation11 + $0x4dc] sm:$0xf]  ;;  %v7732_v35 = vor.u32 %v8970_v10, %v7729_v30 }
 0x6d2   :  { %v8081_v16 = vld [vmem:[#allocation11 + $0x4f8] sm:$0xf0] }
 0x6d3   :  { %5631 = vmatpush.bf16.msrb.mxu3 %v7540_v37  ;;  %5643 = vmatpush.bf16.msrb.mxu0 %v7828_v53  ;;  %v9130_v33 = vld [vmem:[#allocation11 + $0x71c] sm:$0xf]  ;;  %v8084_v32 = vor.u32 %v9058_v26, %v8081_v16  ;;  %v3971_v16 = vperm.slane %v9737_v49, 5 }
 0x6d4   :  { %5653 = vmatpush.bf16.msrb.mxu1 %v8180_v18  ;;  %5665 = vmatpush.bf16.msrb.mxu2 %v8468_v57  ;;  %v8369_v34 = vld [vmem:[#allocation11 + $0x738] sm:$0xf0] }
 0x6d5   :  { %5621 = vmatmul.bf16.vlgmr.msra.gmra.mxu2 %v9710_v23  ;;  %v8372_v31 = vor.u32 %v9130_v33, %v8369_v34  ;;  %v9050_v40 = vld [vmem:[#allocation11 + $0x49c] sm:$0xf] }
 0x6d6   :  { %v8049_v43 = vld [vmem:[#allocation11 + $0x4b8] sm:$0xf0]  ;;  %v5403_v46 = vpop.f32.mrf.mxu1 }
 0x6d7   :  { %5632 = vmatpush.bf16.msrb.mxu3 %v7508_v4  ;;  %5644 = vmatpush.bf16.msrb.mxu0 %v7796_v3  ;;  %v9122_v44 = vld [vmem:[#allocation11 + $0x6dc] sm:$0xf]  ;;  %v8052_v47 = vor.u32 %v9050_v40, %v8049_v43 }
 0x6d8   :  { %5654 = vmatpush.bf16.msrb.mxu1 %v8148_v22  ;;  %5666 = vmatpush.bf16.msrb.mxu2 %v8436_v20  ;;  %v8337_v45 = vld [vmem:[#allocation11 + $0x6f8] sm:$0xf0]  ;;  %v5414_v48 = vpop.f32.mrf.mxu2 }
 0x6d9   :  { %v8340_v52 = vor.u32 %v9122_v44, %v8337_v45  ;;  %v9042_v50 = vld [vmem:[#allocation11 + $0x45c] sm:$0xf]  ;;  %v5415_v51 = vadd.f32 %v5414_v48, %v5402_v41 }
 0x6da   :  { %v8017_v38 = vld [vmem:[#allocation11 + $0x478] sm:$0xf0] }
 0x6db   :  { %5633 = vmatpush.bf16.msrb.mxu3 %v7476_v14  ;;  %5645 = vmatpush.bf16.msrb.mxu0 %v7764_v17  ;;  %v9114_v37 = vld [vmem:[#allocation11 + $0x69c] sm:$0xf]  ;;  %5680 = vst [vmem:[#allocation13 + $0x10] sm:$0xff] %v5415_v51  ;;  %v8020_v28 = vor.u32 %v9042_v50, %v8017_v38 }
 0x6dc   :  { %5655 = vmatpush.bf16.msrb.mxu1 %v8116_v24  ;;  %5667 = vmatpush.bf16.msrb.mxu2 %v8404_v25  ;;  %v8305_v53 = vld [vmem:[#allocation11 + $0x6b8] sm:$0xf0] }
 0x6dd   :  { %v9034_v54 = vld [vmem:[#allocation11 + $0x41c] sm:$0xf] }
 0x6de   :  { %5634 = vmatmul.bf16.vlgmr.msrb.gmra.mxu3 %v9698_v27  ;;  %v8308_v27 = vor.u32 %v9114_v37, %v8305_v53  ;;  %v7985_v55 = vld [vmem:[#allocation11 + $0x438] sm:$0xf0] }
 0x6df   :  { %5646 = vmatpush.bf16.msrb.mxu0 %v7732_v35  ;;  %v9106_v56 = vld [vmem:[#allocation11 + $0x65c] sm:$0xf]  ;;  %v5440_v57 = vpop.f32.mrf.mxu0  ;;  %v7988_v58 = vor.u32 %v9034_v54, %v7985_v55 }
 0x6e0   :  { %5656 = vmatpush.bf16.msrb.mxu1 %v8084_v32  ;;  %5668 = vmatpush.bf16.msrb.mxu2 %v8372_v31  ;;  %v8273_v18 = vld [vmem:[#allocation11 + $0x678] sm:$0xf0]  ;;  %v5416_v60 = vpop.f32.mrf.mxu2 }
 0x6e1   :  { %v8276_v59 = vor.u32 %v9106_v56, %v8273_v18  ;;  %v5427_v61 = vpop.f32.mrf.mxu3  ;;  %v9098_v62 = vld [vmem:[#allocation11 + $0x61c] sm:$0xf]  ;;  %v3973_v18 = vperm.slane %v9737_v49, 7 }
 0x6e2   :  { %5647 = vmatmul.bf16.vlgmr.msrb.gmra.mxu0 %v9702_v36  ;;  %v8241_v63 = vld [vmem:[#allocation11 + $0x638] sm:$0xf0]  ;;  %v5428_v3 = vadd.f32 %v5427_v61, %v3969_v2 }
 0x6e3   :  { %v8244_v36 = vor.u32 %v9098_v62, %v8241_v63 }
 0x6e4   :  { %5657 = vmatpush.bf16.msrb.mxu1 %v8052_v47  ;;  %5669 = vmatpush.bf16.msrb.mxu2 %v8340_v52  ;;  %v5441_v5 = vadd.f32 %v5440_v57, %v5428_v3  ;;  %v3972_v47 = vperm.slane %v9737_v49, 6 }
 0x6e7   :  { %v5442_v0 = vpop.f32.mrf.mxu0 }
 0x6e8   :  { %5658 = vmatpush.bf16.msrb.mxu1 %v8020_v28  ;;  %5670 = vmatpush.bf16.msrb.mxu2 %v8308_v27 }
 0x6e9   :  { %v5429_v1 = vpop.f32.mrf.mxu3 }
 0x6ec   :  { %5659 = vmatpush.bf16.msrb.mxu1 %v7988_v58  ;;  %5671 = vmatpush.bf16.msrb.mxu2 %v8276_v59 }
 0x6ee   :  { %v5453_v4 = vpop.f32.mrf.mxu1 }
 0x6ef   :  { %5660 = vmatmul.bf16.vlgmr.msrb.gmra.mxu1 %v9706_v6  ;;  %v5454_v9 = vadd.f32 %v5453_v4, %v5441_v5 }
 0x6f0   :  { %5672 = vmatpush.bf16.msrb.mxu2 %v8244_v36 }
 0x6f3   :  { %5673 = vmatmul.bf16.vlgmr.msrb.gmra.mxu2 %v9710_v23 }
 0x6f6   :  { %v5455_v8 = vpop.f32.mrf.mxu1 }
 0x6f8   :  { %v5466_v22 = vpop.f32.mrf.mxu2 }
 0x6f9   :  { %v5467_v20 = vadd.f32 %v5466_v22, %v5454_v9 }
 0x6fb   :  { %5681 = vst [vmem:[#allocation13 + $0x18] sm:$0xff] %v5467_v20 }
 0x6ff   :  { %v5492_v21 = vpop.f32.mrf.mxu0 }
 0x700   :  { %v5468_v11 = vpop.f32.mrf.mxu2 }
 0x701   :  { %v5479_v39 = vpop.f32.mrf.mxu3 }
 0x702   :  { %v5480_v13 = vadd.f32 %v5479_v39, %v3970_v42 }
 0x704   :  { %v5493_v14 = vadd.f32 %v5492_v21, %v5480_v13 }
 0x707   :  { %v5494_v12 = vpop.f32.mrf.mxu0 }
 0x709   :  { %v5481_v6 = vpop.f32.mrf.mxu3 }
 0x70e   :  { %v5505_v7 = vpop.f32.mrf.mxu1 }
 0x70f   :  { %v5506_v23 = vadd.f32 %v5505_v7, %v5493_v14 }
 0x716   :  { %v5507_v17 = vpop.f32.mrf.mxu1 }
 0x718   :  { %v5518_v19 = vpop.f32.mrf.mxu2 }
 0x719   :  { %v5519_v24 = vadd.f32 %v5518_v19, %v5506_v23 }
 0x71b   :  { %5682 = vst [vmem:[#allocation13 + $0x20] sm:$0xff] %v5519_v24 }
 0x71f   :  { %v5544_v25 = vpop.f32.mrf.mxu0 }
 0x720   :  { %v5520_v10 = vpop.f32.mrf.mxu2 }
 0x721   :  { %v5531_v30 = vpop.f32.mrf.mxu3 }
 0x722   :  { %v5532_v34 = vadd.f32 %v5531_v30, %v3971_v16 }
 0x724   :  { %v5545_v35 = vadd.f32 %v5544_v25, %v5532_v34 }
 0x727   :  { %v5546_v26 = vpop.f32.mrf.mxu0 }
 0x729   :  { %v5533_v29 = vpop.f32.mrf.mxu3 }
 0x72e   :  { %v5557_v33 = vpop.f32.mrf.mxu1 }
 0x72f   :  { %v5558_v31 = vadd.f32 %v5557_v33, %v5545_v35 }
 0x736   :  { %v5559_v32 = vpop.f32.mrf.mxu1 }
 0x738   :  { %v5570_v40 = vpop.f32.mrf.mxu2 }
 0x739   :  { %v5571_v15 = vadd.f32 %v5570_v40, %v5558_v31 }
 0x73b   :  { %5683 = vst [vmem:[#allocation13 + $0x28] sm:$0xff] %v5571_v15 }
 0x73f   :  { %v5596_v43 = vpop.f32.mrf.mxu0 }
 0x740   :  { %v5572_v44 = vpop.f32.mrf.mxu2 }
 0x741   :  { %v5583_v45 = vpop.f32.mrf.mxu3 }
 0x742   :  { %v5584_v48 = vadd.f32 %v5583_v45, %v3972_v47 }
 0x744   :  { %v5597_v50 = vadd.f32 %v5596_v43, %v5584_v48 }
 0x747   :  { %v5598_v46 = vpop.f32.mrf.mxu0 }
 0x749   :  { %v5585_v41 = vpop.f32.mrf.mxu3 }
 0x74e   :  { %v5609_v52 = vpop.f32.mrf.mxu1 }
 0x74f   :  { %v5610_v38 = vadd.f32 %v5609_v52, %v5597_v50 }
 0x756   :  { %v5611_v51 = vpop.f32.mrf.mxu1 }
 0x758   :  { %v5622_v37 = vpop.f32.mrf.mxu2 }
 0x759   :  { %v5623_v53 = vadd.f32 %v5622_v37, %v5610_v38 }
 0x75b   :  { %5684 = vst [vmem:[#allocation13 + $0x30] sm:$0xff] %v5623_v53 }
 0x75f   :  { %v5648_v28 = vpop.f32.mrf.mxu0 }
 0x760   :  { %v5624_v27 = vpop.f32.mrf.mxu2 }
 0x761   :  { %v5635_v54 = vpop.f32.mrf.mxu3 }
 0x762   :  { %v5636_v58 = vadd.f32 %v5635_v54, %v3973_v18 }
 0x764   :  { %v5649_v59 = vadd.f32 %v5648_v28, %v5636_v58 }
 0x767   :  { %v5650_v55 = vpop.f32.mrf.mxu0 }
 0x769   :  { %v5637_v56 = vpop.f32.mrf.mxu3 }
 0x76c   :  { %v5661_v57 = vpop.f32.mrf.mxu1 }
 0x76d   :  { %v5662_v61 = vadd.f32 %v5661_v57, %v5649_v59 }
 0x774   :  { %v5663_v60 = vpop.f32.mrf.mxu1 }
 0x776   :  { %v5674_v62 = vpop.f32.mrf.mxu2 }
 0x777   :  { %v5675_v63 = vadd.f32 %v5674_v62, %v5662_v61 }
 0x779   :  { %5685 = vst [vmem:[#allocation13 + $0x38] sm:$0xff] %v5675_v63 }
 0x77a   :  { %5696 = dma.vmem_to_hbm [thread:$0]  %s5692_s3, 1024, %s5694_s18, [#allocation4]  }
 0x77e   :  { %v5676_v36 = vpop.f32.mrf.mxu2 }
 0x77f   :  { %9356 = dma.done.wait [#allocation4], 1024  }
 0x780   :  { %9357 = vsyncadd [#allocation4], 4294966272 }
 0x781   :  { %5701 = vsyncpa [#allocation3], 1 }
 0x782   :  { %5702 = vsyncpa [#allocation6], 1 }
 0x783   :  { %5703 = vsyncpa [#allocation9], 1 }
 0x784   :  { %5704 = vsyncpa [#allocation12], 1 }
 0x785   :  { %5705 = vsyncpa [#allocation4], 1 }

</bundles_post_ra>
